<compile_context>
chip_gen: v5e
topology: v5e:2x2
jax: 0.10.0
libtpu: 0.0.40
codegen_flags: <defaults>
</compile_context>

<pallas_src>
import functools

import jax
import jax.numpy as jnp
from jax.experimental import pallas as pl
from jax.experimental.pallas import tpu as pltpu

C = 3          # SimpleResidualBlock channel count (in == out)
KH = KW = 3    # kernel size


def _round_up(x, m):
    return ((x + m - 1) // m) * m


def _choose_tiling(N, HWp, HWP):
    """Pick (NS, NG): NS images packed on sublanes, NG sub-batches per step."""
    NS = max(1, min(8, N))
    if N <= 8:
        return NS, 1

    def step_vmem_bytes(ng):
        nb = NS * ng
        # double-buffered input + output blocks plus the padded scratch
        return 4 * (2 * 2 * C * nb * HWp + C * NS * HWP)

    ng = 1
    while (ng < 8                                   # <= 64 images per step
           and N >= NS * ng * 4                     # keep >= 2 full grid steps
           and step_vmem_bytes(ng * 2) <= (8 << 20)):
        ng *= 2
    return NS, ng


def _conv3x3_bias(xpad_ref, w_ref, b_ref, mask_p, mask_m, *, W, HWp, OFF, NS):
    """3x3 'SAME' conv + bias over NS images held in the padded scratch.

    xpad_ref : (C, NS, HWP) f32 VMEM; [:, :, OFF:OFF+HWp] holds the images
               (row-major H*W flatten, zero tail beyond H*W); the rest is zero.
    w_ref    : (C*C*KH*KW,) f32 SMEM, flattened PyTorch OIHW weights.
    b_ref    : (C,)         f32 SMEM bias.
    mask_p/m : (NS, HWp) f32 0/1 masks validating the dx=+1 / dx=-1 tap groups.
    returns  : list of C arrays (NS, HWp) f32 = conv + bias (no ReLU).
    """
    out = [jnp.full((NS, HWp), b_ref[co], dtype=jnp.float32) for co in range(C)]
    for kx in range(KW):
        dx = kx - 1
        # dx == 0 taps accumulate straight into `out`; dx = +/-1 taps go to a
        # temporary group and are masked once at the end (horizontal edges).
        grp = out if dx == 0 else [jnp.zeros((NS, HWp), jnp.float32)
                                   for _ in range(C)]
        for ci in range(C):
            for ky in range(KH):
                dy = ky - 1
                start = OFF + dy * W + dx            # vertical overflow -> pad
                patch = xpad_ref[ci, :, start:start + HWp]   # (NS, HWp)
                for co in range(C):
                    wv = w_ref[(co * C + ci) * (KH * KW) + ky * KW + kx]
                    grp[co] = grp[co] + wv * patch
        if dx == 1:
            out = [out[co] + mask_p * grp[co] for co in range(C)]
        elif dx == -1:
            out = [out[co] + mask_m * grp[co] for co in range(C)]
    return out


def _resblock_kernel(x_ref, w1_ref, b1_ref, w2_ref, b2_ref, out_ref, xpad_ref,
                     *, W, HW, HWp, OFF, NS, NG):
    """out = relu(conv2(relu(conv1(x)))) + x for NS*NG images (one grid step)."""
    # Hoisted 0/1 masks (shared by both convs and all NG sub-batches).
    col = jax.lax.broadcasted_iota(jnp.int32, (NS, HWp), 1) % W
    mask_p = (col < W - 1).astype(jnp.float32)       # dx = +1 taps valid here
    mask_m = (col > 0).astype(jnp.float32)           # dx = -1 taps valid here
    tail = None
    if HWp != HW:                                    # keep the HW..HWp tail zero
        lane = jax.lax.broadcasted_iota(jnp.int32, (NS, HWp), 1)
        tail = (lane < HW).astype(jnp.float32)

    # Zero ONLY the pad strips (interior is fully rewritten for every conv).
    # Unconditional every step: never gate on program_id under megacore split.
    zero_strip = jnp.zeros((NS, OFF), jnp.float32)
    for ci in range(C):
        xpad_ref[ci, :, :OFF] = zero_strip
        xpad_ref[ci, :, OFF + HWp:] = zero_strip

    for g in range(NG):                              # static sub-batch loop
        r0 = g * NS

        # conv1 + relu1 (h stays in VMEM, never touches HBM)
        for ci in range(C):
            xpad_ref[ci, :, OFF:OFF + HWp] = x_ref[ci, r0:r0 + NS, :]
        h = _conv3x3_bias(xpad_ref, w1_ref, b1_ref, mask_p, mask_m,
                          W=W, HWp=HWp, OFF=OFF, NS=NS)
        for co in range(C):
            hc = jnp.maximum(h[co], 0.0)
            if tail is not None:
                hc = hc * tail                       # conv2 must see zero tail
            xpad_ref[co, :, OFF:OFF + HWp] = hc

        # conv2 + relu2, then residual add (relu BEFORE the add, per module)
        y = _conv3x3_bias(xpad_ref, w2_ref, b2_ref, mask_p, mask_m,
                          W=W, HWp=HWp, OFF=OFF, NS=NS)
        for co in range(C):
            out_ref[co, r0:r0 + NS, :] = (jnp.maximum(y[co], 0.0)
                                          + x_ref[co, r0:r0 + NS, :])


def simple_residual_block(x_nchw, w1, b1, w2, b2):
    """Forward pass of SimpleResidualBlock.

    x_nchw : (N, 3, H, W) float32 (PyTorch NCHW)
    w1, w2 : (3, 3, 3, 3) PyTorch OIHW; b1, b2: (3,)
    returns: (N, 3, H, W) float32
    """
    x_nchw = x_nchw.astype(jnp.float32)
    N, Cc, H, W = x_nchw.shape
    assert Cc == C, f"SimpleResidualBlock expects {C} channels, got {Cc}"
    HW = H * W
    HWp = _round_up(HW, 128)          # lane-dense (unmasked) output stores
    OFF = _round_up(W + 1, 128)       # 128-aligned interior offset
    assert OFF >= W + 1               # vertical taps must land in the zero pad
    HWP = 2 * OFF + HWp

    NS, NG = _choose_tiling(N, HWp, HWP)
    Nb = NS * NG
    Npad = _round_up(N, Nb)

    # Channel-major layout: (C, N, H*W) = batch on sublanes, spatial on lanes.
    x_cm = jnp.transpose(x_nchw.reshape(N, Cc, HW), (1, 0, 2))
    if Npad != N or HWp != HW:
        x_cm = jnp.pad(x_cm, ((0, 0), (0, Npad - N), (0, HWp - HW)))

    w1f = w1.reshape(-1).astype(jnp.float32)         # flattened OIHW order
    b1f = b1.astype(jnp.float32)
    w2f = w2.reshape(-1).astype(jnp.float32)
    b2f = b2.astype(jnp.float32)

    kernel = functools.partial(_resblock_kernel, W=W, HW=HW, HWp=HWp, OFF=OFF,
                               NS=NS, NG=NG)
    smem = pl.BlockSpec(memory_space=pltpu.MemorySpace.SMEM)

    out_cm = pl.pallas_call(
        kernel,
        out_shape=jax.ShapeDtypeStruct((C, Npad, HWp), jnp.float32),
        grid=(Npad // Nb,),
        in_specs=[
            pl.BlockSpec((C, Nb, HWp), lambda n: (0, n, 0)),     # x (VMEM)
            smem, smem, smem, smem,                              # w1, b1, w2, b2
        ],
        out_specs=pl.BlockSpec((C, Nb, HWp), lambda n: (0, n, 0)),
        scratch_shapes=[pltpu.VMEM((C, NS, HWP), jnp.float32)],
        compiler_params=pltpu.CompilerParams(
            dimension_semantics=("parallel",),
            vmem_limit_bytes=32 * 1024 * 1024),
    )(x_cm, w1f, b1f, w2f, b2f)

    out = out_cm[:, :N, :HW]
    return jnp.transpose(out, (1, 0, 2)).reshape(N, Cc, H, W)


def _reference(x_nchw, w1, b1, w2, b2):
    """Pure-JAX reference matching the PyTorch forward (NCHW / OIHW)."""
    def conv(x, w, b):
        y = jax.lax.conv_general_dilated(
            x, w, window_strides=(1, 1), padding="SAME",
            dimension_numbers=("NCHW", "OIHW", "NCHW"),
            precision=jax.lax.Precision.HIGHEST)
        return y + b.reshape(1, -1, 1, 1)
    h = jnp.maximum(conv(x_nchw, w1, b1), 0.0)
    h = conv(h, w2, b2)
    return jnp.maximum(h, 0.0) + x_nchw


if __name__ == "__main__":
    key = jax.random.PRNGKey(0)
    kx, kw1, kb1, kw2, kb2 = jax.random.split(key, 5)

    N, Cc, H, W = 2, 3, 16, 16
    x = jax.random.normal(kx, (N, Cc, H, W), dtype=jnp.float32)

    # PyTorch Conv2d default init scale: U(-k, k), k = 1/sqrt(fan_in)
    fan_in = Cc * KH * KW
    k = 1.0 / float(fan_in) ** 0.5
    w1 = jax.random.uniform(kw1, (C, C, KH, KW), jnp.float32, -k, k)
    b1 = jax.random.uniform(kb1, (C,), jnp.float32, -k, k)
    w2 = jax.random.uniform(kw2, (C, C, KH, KW), jnp.float32, -k, k)
    b2 = jax.random.uniform(kb2, (C,), jnp.float32, -k, k)

    fn = jax.jit(simple_residual_block)
    out = jax.block_until_ready(fn(x, w1, b1, w2, b2))
    ref = _reference(x, w1, b1, w2, b2)
    assert out.shape == (N, Cc, H, W), out.shape
    assert jnp.allclose(out, ref, atol=1e-5, rtol=1e-5), float(
        jnp.max(jnp.abs(out - ref)))

    # Second config: exercises batch padding, full 8-sublane packing and the
    # HW -> multiple-of-128 padding path (H*W = 64).
    N2, H2, W2 = 10, 8, 8
    x2 = jax.random.normal(jax.random.PRNGKey(1), (N2, Cc, H2, W2), jnp.float32)
    out2 = jax.block_until_ready(fn(x2, w1, b1, w2, b2))
    ref2 = _reference(x2, w1, b1, w2, b2)
    assert out2.shape == (N2, Cc, H2, W2), out2.shape
    assert jnp.allclose(out2, ref2, atol=1e-5, rtol=1e-5), float(
        jnp.max(jnp.abs(out2 - ref2)))

    print("KERNEL_OK")
</pallas_src>

<mosaic_0001>
module attributes {stable_mosaic.version = 11 : i64} {
  func.func @_resblock_kernel(%arg0: i32, %arg1: memref<3x2x256xf32, #tpu.memory_space<vmem>>, %arg2: memref<81xf32, #tpu.memory_space<smem>>, %arg3: memref<3xf32, #tpu.memory_space<smem>>, %arg4: memref<81xf32, #tpu.memory_space<smem>>, %arg5: memref<3xf32, #tpu.memory_space<smem>>, %arg6: memref<3x2x256xf32, #tpu.memory_space<vmem>>, %arg7: memref<3x2x512xf32, #tpu.memory_space<vmem>>) attributes {dimension_semantics = [#tpu.dimension_semantics<parallel>], iteration_bounds = array<i64: 1>, scalar_prefetch = 0 : i64, scratch_operands = 1 : i64, tpu.core_type = #tpu.core_type<tc>, window_params = [{transform_indices = @transform_0, window_bounds = array<i64: 3, 2, 256>}, {transform_indices = @transform_1, window_bounds = array<i64: 81>}, {transform_indices = @transform_2, window_bounds = array<i64: 3>}, {transform_indices = @transform_3, window_bounds = array<i64: 81>}, {transform_indices = @transform_4, window_bounds = array<i64: 3>}, {transform_indices = @transform_5, window_bounds = array<i64: 3, 2, 256>}]} {
    %0 = tpu.iota {dimensions = array<i32: 1>} : vector<2x256xi32>
    %c16_i32 = arith.constant 16 : i32
    %c0_i32 = arith.constant 0 : i32
    %1 = arith.cmpi eq, %c16_i32, %c0_i32 : i32
    %c1_i32 = arith.constant 1 : i32
    %2 = arith.select %1, %c1_i32, %c16_i32 : i32
    %3 = vector.broadcast %2 : i32 to vector<2x256xi32>
    %4 = arith.remsi %0, %3 : vector<2x256xi32>
    %c0_i32_0 = arith.constant 0 : i32
    %5 = vector.broadcast %c0_i32_0 : i32 to vector<2x256xi32>
    %6 = arith.cmpi ne, %4, %5 : vector<2x256xi32>
    %c0_i32_1 = arith.constant 0 : i32
    %7 = vector.broadcast %c0_i32_1 : i32 to vector<2x256xi32>
    %8 = arith.cmpi slt, %4, %7 : vector<2x256xi32>
    %c0_i32_2 = arith.constant 0 : i32
    %9 = arith.cmpi slt, %2, %c0_i32_2 : i32
    %10 = vector.broadcast %9 : i1 to vector<2x256xi1>
    %11 = vector.broadcast %10 : vector<2x256xi1> to vector<2x256xi1>
    %12 = arith.xori %8, %11 : vector<2x256xi1>
    %13 = arith.andi %12, %6 : vector<2x256xi1>
    %14 = vector.broadcast %2 : i32 to vector<2x256xi32>
    %15 = arith.addi %4, %14 : vector<2x256xi32>
    %16 = arith.select %13, %15, %4 : vector<2x256xi1>, vector<2x256xi32>
    %c15_i32 = arith.constant 15 : i32
    %17 = vector.broadcast %c15_i32 : i32 to vector<2x256xi32>
    %18 = arith.cmpi slt, %16, %17 : vector<2x256xi32>
    %19 = arith.extui %18 : vector<2x256xi1> to vector<2x256xi32>
    %20 = arith.sitofp %19 : vector<2x256xi32> to vector<2x256xf32>
    %c0_i32_3 = arith.constant 0 : i32
    %21 = vector.broadcast %c0_i32_3 : i32 to vector<2x256xi32>
    %22 = arith.cmpi sgt, %16, %21 : vector<2x256xi32>
    %23 = arith.extui %22 : vector<2x256xi1> to vector<2x256xi32>
    %24 = arith.sitofp %23 : vector<2x256xi32> to vector<2x256xf32>
    %cst = arith.constant 0.000000e+00 : f32
    %25 = vector.broadcast %cst : f32 to vector<2x128xf32>
    %c0 = arith.constant 0 : index
    %c0_4 = arith.constant 0 : index
    %c0_5 = arith.constant 0 : index
    %26 = vector.load %arg7[%c0, %c0_4, %c0_5] : memref<3x2x512xf32, #tpu.memory_space<vmem>>, vector<1x2x128xf32>
    %27 = vector.shape_cast %26 : vector<1x2x128xf32> to vector<2x128xf32>
    %28 = vector.shape_cast %25 : vector<2x128xf32> to vector<1x2x128xf32>
    tpu.vector_store %arg7[%c0, %c0_4, %c0_5], %28 {strides = array<i32>} : memref<3x2x512xf32, #tpu.memory_space<vmem>>, vector<1x2x128xf32>,
    %c0_6 = arith.constant 0 : index
    %c0_7 = arith.constant 0 : index
    %c384 = arith.constant 384 : index
    %29 = vector.load %arg7[%c0_6, %c0_7, %c384] : memref<3x2x512xf32, #tpu.memory_space<vmem>>, vector<1x2x128xf32>
    %30 = vector.shape_cast %29 : vector<1x2x128xf32> to vector<2x128xf32>
    %31 = vector.shape_cast %25 : vector<2x128xf32> to vector<1x2x128xf32>
    tpu.vector_store %arg7[%c0_6, %c0_7, %c384], %31 {strides = array<i32>} : memref<3x2x512xf32, #tpu.memory_space<vmem>>, vector<1x2x128xf32>,
    %c1 = arith.constant 1 : index
    %c0_8 = arith.constant 0 : index
    %c0_9 = arith.constant 0 : index
    %32 = vector.load %arg7[%c1, %c0_8, %c0_9] : memref<3x2x512xf32, #tpu.memory_space<vmem>>, vector<1x2x128xf32>
    %33 = vector.shape_cast %32 : vector<1x2x128xf32> to vector<2x128xf32>
    %34 = vector.shape_cast %25 : vector<2x128xf32> to vector<1x2x128xf32>
    tpu.vector_store %arg7[%c1, %c0_8, %c0_9], %34 {strides = array<i32>} : memref<3x2x512xf32, #tpu.memory_space<vmem>>, vector<1x2x128xf32>,
    %c1_10 = arith.constant 1 : index
    %c0_11 = arith.constant 0 : index
    %c384_12 = arith.constant 384 : index
    %35 = vector.load %arg7[%c1_10, %c0_11, %c384_12] : memref<3x2x512xf32, #tpu.memory_space<vmem>>, vector<1x2x128xf32>
    %36 = vector.shape_cast %35 : vector<1x2x128xf32> to vector<2x128xf32>
    %37 = vector.shape_cast %25 : vector<2x128xf32> to vector<1x2x128xf32>
    tpu.vector_store %arg7[%c1_10, %c0_11, %c384_12], %37 {strides = array<i32>} : memref<3x2x512xf32, #tpu.memory_space<vmem>>, vector<1x2x128xf32>,
    %c2 = arith.constant 2 : index
    %c0_13 = arith.constant 0 : index
    %c0_14 = arith.constant 0 : index
    %38 = vector.load %arg7[%c2, %c0_13, %c0_14] : memref<3x2x512xf32, #tpu.memory_space<vmem>>, vector<1x2x128xf32>
    %39 = vector.shape_cast %38 : vector<1x2x128xf32> to vector<2x128xf32>
    %40 = vector.shape_cast %25 : vector<2x128xf32> to vector<1x2x128xf32>
    tpu.vector_store %arg7[%c2, %c0_13, %c0_14], %40 {strides = array<i32>} : memref<3x2x512xf32, #tpu.memory_space<vmem>>, vector<1x2x128xf32>,
    %c2_15 = arith.constant 2 : index
    %c0_16 = arith.constant 0 : index
    %c384_17 = arith.constant 384 : index
    %41 = vector.load %arg7[%c2_15, %c0_16, %c384_17] : memref<3x2x512xf32, #tpu.memory_space<vmem>>, vector<1x2x128xf32>
    %42 = vector.shape_cast %41 : vector<1x2x128xf32> to vector<2x128xf32>
    %43 = vector.shape_cast %25 : vector<2x128xf32> to vector<1x2x128xf32>
    tpu.vector_store %arg7[%c2_15, %c0_16, %c384_17], %43 {strides = array<i32>} : memref<3x2x512xf32, #tpu.memory_space<vmem>>, vector<1x2x128xf32>,
    %c0_18 = arith.constant 0 : index
    %c0_19 = arith.constant 0 : index
    %c0_20 = arith.constant 0 : index
    %44 = vector.load %arg1[%c0_18, %c0_19, %c0_20] : memref<3x2x256xf32, #tpu.memory_space<vmem>>, vector<1x2x256xf32>
    %45 = vector.shape_cast %44 : vector<1x2x256xf32> to vector<2x256xf32>
    %c0_21 = arith.constant 0 : index
    %c0_22 = arith.constant 0 : index
    %c128 = arith.constant 128 : index
    %46 = vector.load %arg7[%c0_21, %c0_22, %c128] : memref<3x2x512xf32, #tpu.memory_space<vmem>>, vector<1x2x256xf32>
    %47 = vector.shape_cast %46 : vector<1x2x256xf32> to vector<2x256xf32>
    %48 = vector.shape_cast %45 : vector<2x256xf32> to vector<1x2x256xf32>
    tpu.vector_store %arg7[%c0_21, %c0_22, %c128], %48 {strides = array<i32>} : memref<3x2x512xf32, #tpu.memory_space<vmem>>, vector<1x2x256xf32>,
    %c1_23 = arith.constant 1 : index
    %c0_24 = arith.constant 0 : index
    %c0_25 = arith.constant 0 : index
    %49 = vector.load %arg1[%c1_23, %c0_24, %c0_25] : memref<3x2x256xf32, #tpu.memory_space<vmem>>, vector<1x2x256xf32>
    %50 = vector.shape_cast %49 : vector<1x2x256xf32> to vector<2x256xf32>
    %c1_26 = arith.constant 1 : index
    %c0_27 = arith.constant 0 : index
    %c128_28 = arith.constant 128 : index
    %51 = vector.load %arg7[%c1_26, %c0_27, %c128_28] : memref<3x2x512xf32, #tpu.memory_space<vmem>>, vector<1x2x256xf32>
    %52 = vector.shape_cast %51 : vector<1x2x256xf32> to vector<2x256xf32>
    %53 = vector.shape_cast %50 : vector<2x256xf32> to vector<1x2x256xf32>
    tpu.vector_store %arg7[%c1_26, %c0_27, %c128_28], %53 {strides = array<i32>} : memref<3x2x512xf32, #tpu.memory_space<vmem>>, vector<1x2x256xf32>,
    %c2_29 = arith.constant 2 : index
    %c0_30 = arith.constant 0 : index
    %c0_31 = arith.constant 0 : index
    %54 = vector.load %arg1[%c2_29, %c0_30, %c0_31] : memref<3x2x256xf32, #tpu.memory_space<vmem>>, vector<1x2x256xf32>
    %55 = vector.shape_cast %54 : vector<1x2x256xf32> to vector<2x256xf32>
    %c2_32 = arith.constant 2 : index
    %c0_33 = arith.constant 0 : index
    %c128_34 = arith.constant 128 : index
    %56 = vector.load %arg7[%c2_32, %c0_33, %c128_34] : memref<3x2x512xf32, #tpu.memory_space<vmem>>, vector<1x2x256xf32>
    %57 = vector.shape_cast %56 : vector<1x2x256xf32> to vector<2x256xf32>
    %58 = vector.shape_cast %55 : vector<2x256xf32> to vector<1x2x256xf32>
    tpu.vector_store %arg7[%c2_32, %c0_33, %c128_34], %58 {strides = array<i32>} : memref<3x2x512xf32, #tpu.memory_space<vmem>>, vector<1x2x256xf32>,
    %c0_35 = arith.constant 0 : index
    %59 = memref.load %arg3[%c0_35] : memref<3xf32, #tpu.memory_space<smem>>
    %60 = vector.broadcast %59 : f32 to vector<2x256xf32>
    %c1_36 = arith.constant 1 : index
    %61 = memref.load %arg3[%c1_36] : memref<3xf32, #tpu.memory_space<smem>>
    %62 = vector.broadcast %61 : f32 to vector<2x256xf32>
    %c2_37 = arith.constant 2 : index
    %63 = memref.load %arg3[%c2_37] : memref<3xf32, #tpu.memory_space<smem>>
    %64 = vector.broadcast %63 : f32 to vector<2x256xf32>
    %cst_38 = arith.constant 0.000000e+00 : f32
    %65 = vector.broadcast %cst_38 : f32 to vector<2x256xf32>
    %cst_39 = arith.constant 0.000000e+00 : f32
    %66 = vector.broadcast %cst_39 : f32 to vector<2x256xf32>
    %cst_40 = arith.constant 0.000000e+00 : f32
    %67 = vector.broadcast %cst_40 : f32 to vector<2x256xf32>
    %c0_41 = arith.constant 0 : index
    %c0_42 = arith.constant 0 : index
    %c111 = arith.constant 111 : index
    %68 = vector.load %arg7[%c0_41, %c0_42, %c111] : memref<3x2x512xf32, #tpu.memory_space<vmem>>, vector<1x2x256xf32>
    %69 = vector.shape_cast %68 : vector<1x2x256xf32> to vector<2x256xf32>
    %c0_43 = arith.constant 0 : index
    %70 = memref.load %arg2[%c0_43] : memref<81xf32, #tpu.memory_space<smem>>
    %71 = vector.broadcast %70 : f32 to vector<2x256xf32>
    %72 = arith.mulf %71, %69 : vector<2x256xf32>
    %73 = arith.addf %65, %72 : vector<2x256xf32>
    %c27 = arith.constant 27 : index
    %74 = memref.load %arg2[%c27] : memref<81xf32, #tpu.memory_space<smem>>
    %75 = vector.broadcast %74 : f32 to vector<2x256xf32>
    %76 = arith.mulf %75, %69 : vector<2x256xf32>
    %77 = arith.addf %66, %76 : vector<2x256xf32>
    %c54 = arith.constant 54 : index
    %78 = memref.load %arg2[%c54] : memref<81xf32, #tpu.memory_space<smem>>
    %79 = vector.broadcast %78 : f32 to vector<2x256xf32>
    %80 = arith.mulf %79, %69 : vector<2x256xf32>
    %81 = arith.addf %67, %80 : vector<2x256xf32>
    %c0_44 = arith.constant 0 : index
    %c0_45 = arith.constant 0 : index
    %c127 = arith.constant 127 : index
    %82 = vector.load %arg7[%c0_44, %c0_45, %c127] : memref<3x2x512xf32, #tpu.memory_space<vmem>>, vector<1x2x256xf32>
    %83 = vector.shape_cast %82 : vector<1x2x256xf32> to vector<2x256xf32>
    %c3 = arith.constant 3 : index
    %84 = memref.load %arg2[%c3] : memref<81xf32, #tpu.memory_space<smem>>
    %85 = vector.broadcast %84 : f32 to vector<2x256xf32>
    %86 = arith.mulf %85, %83 : vector<2x256xf32>
    %87 = arith.addf %73, %86 : vector<2x256xf32>
    %c30 = arith.constant 30 : index
    %88 = memref.load %arg2[%c30] : memref<81xf32, #tpu.memory_space<smem>>
    %89 = vector.broadcast %88 : f32 to vector<2x256xf32>
    %90 = arith.mulf %89, %83 : vector<2x256xf32>
    %91 = arith.addf %77, %90 : vector<2x256xf32>
    %c57 = arith.constant 57 : index
    %92 = memref.load %arg2[%c57] : memref<81xf32, #tpu.memory_space<smem>>
    %93 = vector.broadcast %92 : f32 to vector<2x256xf32>
    %94 = arith.mulf %93, %83 : vector<2x256xf32>
    %95 = arith.addf %81, %94 : vector<2x256xf32>
    %c0_46 = arith.constant 0 : index
    %c0_47 = arith.constant 0 : index
    %c143 = arith.constant 143 : index
    %96 = vector.load %arg7[%c0_46, %c0_47, %c143] : memref<3x2x512xf32, #tpu.memory_space<vmem>>, vector<1x2x256xf32>
    %97 = vector.shape_cast %96 : vector<1x2x256xf32> to vector<2x256xf32>
    %c6 = arith.constant 6 : index
    %98 = memref.load %arg2[%c6] : memref<81xf32, #tpu.memory_space<smem>>
    %99 = vector.broadcast %98 : f32 to vector<2x256xf32>
    %100 = arith.mulf %99, %97 : vector<2x256xf32>
    %101 = arith.addf %87, %100 : vector<2x256xf32>
    %c33 = arith.constant 33 : index
    %102 = memref.load %arg2[%c33] : memref<81xf32, #tpu.memory_space<smem>>
    %103 = vector.broadcast %102 : f32 to vector<2x256xf32>
    %104 = arith.mulf %103, %97 : vector<2x256xf32>
    %105 = arith.addf %91, %104 : vector<2x256xf32>
    %c60 = arith.constant 60 : index
    %106 = memref.load %arg2[%c60] : memref<81xf32, #tpu.memory_space<smem>>
    %107 = vector.broadcast %106 : f32 to vector<2x256xf32>
    %108 = arith.mulf %107, %97 : vector<2x256xf32>
    %109 = arith.addf %95, %108 : vector<2x256xf32>
    %c1_48 = arith.constant 1 : index
    %c0_49 = arith.constant 0 : index
    %c111_50 = arith.constant 111 : index
    %110 = vector.load %arg7[%c1_48, %c0_49, %c111_50] : memref<3x2x512xf32, #tpu.memory_space<vmem>>, vector<1x2x256xf32>
    %111 = vector.shape_cast %110 : vector<1x2x256xf32> to vector<2x256xf32>
    %c9 = arith.constant 9 : index
    %112 = memref.load %arg2[%c9] : memref<81xf32, #tpu.memory_space<smem>>
    %113 = vector.broadcast %112 : f32 to vector<2x256xf32>
    %114 = arith.mulf %113, %111 : vector<2x256xf32>
    %115 = arith.addf %101, %114 : vector<2x256xf32>
    %c36 = arith.constant 36 : index
    %116 = memref.load %arg2[%c36] : memref<81xf32, #tpu.memory_space<smem>>
    %117 = vector.broadcast %116 : f32 to vector<2x256xf32>
    %118 = arith.mulf %117, %111 : vector<2x256xf32>
    %119 = arith.addf %105, %118 : vector<2x256xf32>
    %c63 = arith.constant 63 : index
    %120 = memref.load %arg2[%c63] : memref<81xf32, #tpu.memory_space<smem>>
    %121 = vector.broadcast %120 : f32 to vector<2x256xf32>
    %122 = arith.mulf %121, %111 : vector<2x256xf32>
    %123 = arith.addf %109, %122 : vector<2x256xf32>
    %c1_51 = arith.constant 1 : index
    %c0_52 = arith.constant 0 : index
    %c127_53 = arith.constant 127 : index
    %124 = vector.load %arg7[%c1_51, %c0_52, %c127_53] : memref<3x2x512xf32, #tpu.memory_space<vmem>>, vector<1x2x256xf32>
    %125 = vector.shape_cast %124 : vector<1x2x256xf32> to vector<2x256xf32>
    %c12 = arith.constant 12 : index
    %126 = memref.load %arg2[%c12] : memref<81xf32, #tpu.memory_space<smem>>
    %127 = vector.broadcast %126 : f32 to vector<2x256xf32>
    %128 = arith.mulf %127, %125 : vector<2x256xf32>
    %129 = arith.addf %115, %128 : vector<2x256xf32>
    %c39 = arith.constant 39 : index
    %130 = memref.load %arg2[%c39] : memref<81xf32, #tpu.memory_space<smem>>
    %131 = vector.broadcast %130 : f32 to vector<2x256xf32>
    %132 = arith.mulf %131, %125 : vector<2x256xf32>
    %133 = arith.addf %119, %132 : vector<2x256xf32>
    %c66 = arith.constant 66 : index
    %134 = memref.load %arg2[%c66] : memref<81xf32, #tpu.memory_space<smem>>
    %135 = vector.broadcast %134 : f32 to vector<2x256xf32>
    %136 = arith.mulf %135, %125 : vector<2x256xf32>
    %137 = arith.addf %123, %136 : vector<2x256xf32>
    %c1_54 = arith.constant 1 : index
    %c0_55 = arith.constant 0 : index
    %c143_56 = arith.constant 143 : index
    %138 = vector.load %arg7[%c1_54, %c0_55, %c143_56] : memref<3x2x512xf32, #tpu.memory_space<vmem>>, vector<1x2x256xf32>
    %139 = vector.shape_cast %138 : vector<1x2x256xf32> to vector<2x256xf32>
    %c15 = arith.constant 15 : index
    %140 = memref.load %arg2[%c15] : memref<81xf32, #tpu.memory_space<smem>>
    %141 = vector.broadcast %140 : f32 to vector<2x256xf32>
    %142 = arith.mulf %141, %139 : vector<2x256xf32>
    %143 = arith.addf %129, %142 : vector<2x256xf32>
    %c42 = arith.constant 42 : index
    %144 = memref.load %arg2[%c42] : memref<81xf32, #tpu.memory_space<smem>>
    %145 = vector.broadcast %144 : f32 to vector<2x256xf32>
    %146 = arith.mulf %145, %139 : vector<2x256xf32>
    %147 = arith.addf %133, %146 : vector<2x256xf32>
    %c69 = arith.constant 69 : index
    %148 = memref.load %arg2[%c69] : memref<81xf32, #tpu.memory_space<smem>>
    %149 = vector.broadcast %148 : f32 to vector<2x256xf32>
    %150 = arith.mulf %149, %139 : vector<2x256xf32>
    %151 = arith.addf %137, %150 : vector<2x256xf32>
    %c2_57 = arith.constant 2 : index
    %c0_58 = arith.constant 0 : index
    %c111_59 = arith.constant 111 : index
    %152 = vector.load %arg7[%c2_57, %c0_58, %c111_59] : memref<3x2x512xf32, #tpu.memory_space<vmem>>, vector<1x2x256xf32>
    %153 = vector.shape_cast %152 : vector<1x2x256xf32> to vector<2x256xf32>
    %c18 = arith.constant 18 : index
    %154 = memref.load %arg2[%c18] : memref<81xf32, #tpu.memory_space<smem>>
    %155 = vector.broadcast %154 : f32 to vector<2x256xf32>
    %156 = arith.mulf %155, %153 : vector<2x256xf32>
    %157 = arith.addf %143, %156 : vector<2x256xf32>
    %c45 = arith.constant 45 : index
    %158 = memref.load %arg2[%c45] : memref<81xf32, #tpu.memory_space<smem>>
    %159 = vector.broadcast %158 : f32 to vector<2x256xf32>
    %160 = arith.mulf %159, %153 : vector<2x256xf32>
    %161 = arith.addf %147, %160 : vector<2x256xf32>
    %c72 = arith.constant 72 : index
    %162 = memref.load %arg2[%c72] : memref<81xf32, #tpu.memory_space<smem>>
    %163 = vector.broadcast %162 : f32 to vector<2x256xf32>
    %164 = arith.mulf %163, %153 : vector<2x256xf32>
    %165 = arith.addf %151, %164 : vector<2x256xf32>
    %c2_60 = arith.constant 2 : index
    %c0_61 = arith.constant 0 : index
    %c127_62 = arith.constant 127 : index
    %166 = vector.load %arg7[%c2_60, %c0_61, %c127_62] : memref<3x2x512xf32, #tpu.memory_space<vmem>>, vector<1x2x256xf32>
    %167 = vector.shape_cast %166 : vector<1x2x256xf32> to vector<2x256xf32>
    %c21 = arith.constant 21 : index
    %168 = memref.load %arg2[%c21] : memref<81xf32, #tpu.memory_space<smem>>
    %169 = vector.broadcast %168 : f32 to vector<2x256xf32>
    %170 = arith.mulf %169, %167 : vector<2x256xf32>
    %171 = arith.addf %157, %170 : vector<2x256xf32>
    %c48 = arith.constant 48 : index
    %172 = memref.load %arg2[%c48] : memref<81xf32, #tpu.memory_space<smem>>
    %173 = vector.broadcast %172 : f32 to vector<2x256xf32>
    %174 = arith.mulf %173, %167 : vector<2x256xf32>
    %175 = arith.addf %161, %174 : vector<2x256xf32>
    %c75 = arith.constant 75 : index
    %176 = memref.load %arg2[%c75] : memref<81xf32, #tpu.memory_space<smem>>
    %177 = vector.broadcast %176 : f32 to vector<2x256xf32>
    %178 = arith.mulf %177, %167 : vector<2x256xf32>
    %179 = arith.addf %165, %178 : vector<2x256xf32>
    %c2_63 = arith.constant 2 : index
    %c0_64 = arith.constant 0 : index
    %c143_65 = arith.constant 143 : index
    %180 = vector.load %arg7[%c2_63, %c0_64, %c143_65] : memref<3x2x512xf32, #tpu.memory_space<vmem>>, vector<1x2x256xf32>
    %181 = vector.shape_cast %180 : vector<1x2x256xf32> to vector<2x256xf32>
    %c24 = arith.constant 24 : index
    %182 = memref.load %arg2[%c24] : memref<81xf32, #tpu.memory_space<smem>>
    %183 = vector.broadcast %182 : f32 to vector<2x256xf32>
    %184 = arith.mulf %183, %181 : vector<2x256xf32>
    %185 = arith.addf %171, %184 : vector<2x256xf32>
    %c51 = arith.constant 51 : index
    %186 = memref.load %arg2[%c51] : memref<81xf32, #tpu.memory_space<smem>>
    %187 = vector.broadcast %186 : f32 to vector<2x256xf32>
    %188 = arith.mulf %187, %181 : vector<2x256xf32>
    %189 = arith.addf %175, %188 : vector<2x256xf32>
    %c78 = arith.constant 78 : index
    %190 = memref.load %arg2[%c78] : memref<81xf32, #tpu.memory_space<smem>>
    %191 = vector.broadcast %190 : f32 to vector<2x256xf32>
    %192 = arith.mulf %191, %181 : vector<2x256xf32>
    %193 = arith.addf %179, %192 : vector<2x256xf32>
    %194 = arith.mulf %24, %185 : vector<2x256xf32>
    %195 = arith.addf %60, %194 : vector<2x256xf32>
    %196 = arith.mulf %24, %189 : vector<2x256xf32>
    %197 = arith.addf %62, %196 : vector<2x256xf32>
    %198 = arith.mulf %24, %193 : vector<2x256xf32>
    %199 = arith.addf %64, %198 : vector<2x256xf32>
    %c0_66 = arith.constant 0 : index
    %c0_67 = arith.constant 0 : index
    %c112 = arith.constant 112 : index
    %200 = vector.load %arg7[%c0_66, %c0_67, %c112] : memref<3x2x512xf32, #tpu.memory_space<vmem>>, vector<1x2x256xf32>
    %201 = vector.shape_cast %200 : vector<1x2x256xf32> to vector<2x256xf32>
    %c1_68 = arith.constant 1 : index
    %202 = memref.load %arg2[%c1_68] : memref<81xf32, #tpu.memory_space<smem>>
    %203 = vector.broadcast %202 : f32 to vector<2x256xf32>
    %204 = arith.mulf %203, %201 : vector<2x256xf32>
    %205 = arith.addf %195, %204 : vector<2x256xf32>
    %c28 = arith.constant 28 : index
    %206 = memref.load %arg2[%c28] : memref<81xf32, #tpu.memory_space<smem>>
    %207 = vector.broadcast %206 : f32 to vector<2x256xf32>
    %208 = arith.mulf %207, %201 : vector<2x256xf32>
    %209 = arith.addf %197, %208 : vector<2x256xf32>
    %c55 = arith.constant 55 : index
    %210 = memref.load %arg2[%c55] : memref<81xf32, #tpu.memory_space<smem>>
    %211 = vector.broadcast %210 : f32 to vector<2x256xf32>
    %212 = arith.mulf %211, %201 : vector<2x256xf32>
    %213 = arith.addf %199, %212 : vector<2x256xf32>
    %c0_69 = arith.constant 0 : index
    %c0_70 = arith.constant 0 : index
    %c128_71 = arith.constant 128 : index
    %214 = vector.load %arg7[%c0_69, %c0_70, %c128_71] : memref<3x2x512xf32, #tpu.memory_space<vmem>>, vector<1x2x256xf32>
    %215 = vector.shape_cast %214 : vector<1x2x256xf32> to vector<2x256xf32>
    %c4 = arith.constant 4 : index
    %216 = memref.load %arg2[%c4] : memref<81xf32, #tpu.memory_space<smem>>
    %217 = vector.broadcast %216 : f32 to vector<2x256xf32>
    %218 = arith.mulf %217, %215 : vector<2x256xf32>
    %219 = arith.addf %205, %218 : vector<2x256xf32>
    %c31 = arith.constant 31 : index
    %220 = memref.load %arg2[%c31] : memref<81xf32, #tpu.memory_space<smem>>
    %221 = vector.broadcast %220 : f32 to vector<2x256xf32>
    %222 = arith.mulf %221, %215 : vector<2x256xf32>
    %223 = arith.addf %209, %222 : vector<2x256xf32>
    %c58 = arith.constant 58 : index
    %224 = memref.load %arg2[%c58] : memref<81xf32, #tpu.memory_space<smem>>
    %225 = vector.broadcast %224 : f32 to vector<2x256xf32>
    %226 = arith.mulf %225, %215 : vector<2x256xf32>
    %227 = arith.addf %213, %226 : vector<2x256xf32>
    %c0_72 = arith.constant 0 : index
    %c0_73 = arith.constant 0 : index
    %c144 = arith.constant 144 : index
    %228 = vector.load %arg7[%c0_72, %c0_73, %c144] : memref<3x2x512xf32, #tpu.memory_space<vmem>>, vector<1x2x256xf32>
    %229 = vector.shape_cast %228 : vector<1x2x256xf32> to vector<2x256xf32>
    %c7 = arith.constant 7 : index
    %230 = memref.load %arg2[%c7] : memref<81xf32, #tpu.memory_space<smem>>
    %231 = vector.broadcast %230 : f32 to vector<2x256xf32>
    %232 = arith.mulf %231, %229 : vector<2x256xf32>
    %233 = arith.addf %219, %232 : vector<2x256xf32>
    %c34 = arith.constant 34 : index
    %234 = memref.load %arg2[%c34] : memref<81xf32, #tpu.memory_space<smem>>
    %235 = vector.broadcast %234 : f32 to vector<2x256xf32>
    %236 = arith.mulf %235, %229 : vector<2x256xf32>
    %237 = arith.addf %223, %236 : vector<2x256xf32>
    %c61 = arith.constant 61 : index
    %238 = memref.load %arg2[%c61] : memref<81xf32, #tpu.memory_space<smem>>
    %239 = vector.broadcast %238 : f32 to vector<2x256xf32>
    %240 = arith.mulf %239, %229 : vector<2x256xf32>
    %241 = arith.addf %227, %240 : vector<2x256xf32>
    %c1_74 = arith.constant 1 : index
    %c0_75 = arith.constant 0 : index
    %c112_76 = arith.constant 112 : index
    %242 = vector.load %arg7[%c1_74, %c0_75, %c112_76] : memref<3x2x512xf32, #tpu.memory_space<vmem>>, vector<1x2x256xf32>
    %243 = vector.shape_cast %242 : vector<1x2x256xf32> to vector<2x256xf32>
    %c10 = arith.constant 10 : index
    %244 = memref.load %arg2[%c10] : memref<81xf32, #tpu.memory_space<smem>>
    %245 = vector.broadcast %244 : f32 to vector<2x256xf32>
    %246 = arith.mulf %245, %243 : vector<2x256xf32>
    %247 = arith.addf %233, %246 : vector<2x256xf32>
    %c37 = arith.constant 37 : index
    %248 = memref.load %arg2[%c37] : memref<81xf32, #tpu.memory_space<smem>>
    %249 = vector.broadcast %248 : f32 to vector<2x256xf32>
    %250 = arith.mulf %249, %243 : vector<2x256xf32>
    %251 = arith.addf %237, %250 : vector<2x256xf32>
    %c64 = arith.constant 64 : index
    %252 = memref.load %arg2[%c64] : memref<81xf32, #tpu.memory_space<smem>>
    %253 = vector.broadcast %252 : f32 to vector<2x256xf32>
    %254 = arith.mulf %253, %243 : vector<2x256xf32>
    %255 = arith.addf %241, %254 : vector<2x256xf32>
    %c1_77 = arith.constant 1 : index
    %c0_78 = arith.constant 0 : index
    %c128_79 = arith.constant 128 : index
    %256 = vector.load %arg7[%c1_77, %c0_78, %c128_79] : memref<3x2x512xf32, #tpu.memory_space<vmem>>, vector<1x2x256xf32>
    %257 = vector.shape_cast %256 : vector<1x2x256xf32> to vector<2x256xf32>
    %c13 = arith.constant 13 : index
    %258 = memref.load %arg2[%c13] : memref<81xf32, #tpu.memory_space<smem>>
    %259 = vector.broadcast %258 : f32 to vector<2x256xf32>
    %260 = arith.mulf %259, %257 : vector<2x256xf32>
    %261 = arith.addf %247, %260 : vector<2x256xf32>
    %c40 = arith.constant 40 : index
    %262 = memref.load %arg2[%c40] : memref<81xf32, #tpu.memory_space<smem>>
    %263 = vector.broadcast %262 : f32 to vector<2x256xf32>
    %264 = arith.mulf %263, %257 : vector<2x256xf32>
    %265 = arith.addf %251, %264 : vector<2x256xf32>
    %c67 = arith.constant 67 : index
    %266 = memref.load %arg2[%c67] : memref<81xf32, #tpu.memory_space<smem>>
    %267 = vector.broadcast %266 : f32 to vector<2x256xf32>
    %268 = arith.mulf %267, %257 : vector<2x256xf32>
    %269 = arith.addf %255, %268 : vector<2x256xf32>
    %c1_80 = arith.constant 1 : index
    %c0_81 = arith.constant 0 : index
    %c144_82 = arith.constant 144 : index
    %270 = vector.load %arg7[%c1_80, %c0_81, %c144_82] : memref<3x2x512xf32, #tpu.memory_space<vmem>>, vector<1x2x256xf32>
    %271 = vector.shape_cast %270 : vector<1x2x256xf32> to vector<2x256xf32>
    %c16 = arith.constant 16 : index
    %272 = memref.load %arg2[%c16] : memref<81xf32, #tpu.memory_space<smem>>
    %273 = vector.broadcast %272 : f32 to vector<2x256xf32>
    %274 = arith.mulf %273, %271 : vector<2x256xf32>
    %275 = arith.addf %261, %274 : vector<2x256xf32>
    %c43 = arith.constant 43 : index
    %276 = memref.load %arg2[%c43] : memref<81xf32, #tpu.memory_space<smem>>
    %277 = vector.broadcast %276 : f32 to vector<2x256xf32>
    %278 = arith.mulf %277, %271 : vector<2x256xf32>
    %279 = arith.addf %265, %278 : vector<2x256xf32>
    %c70 = arith.constant 70 : index
    %280 = memref.load %arg2[%c70] : memref<81xf32, #tpu.memory_space<smem>>
    %281 = vector.broadcast %280 : f32 to vector<2x256xf32>
    %282 = arith.mulf %281, %271 : vector<2x256xf32>
    %283 = arith.addf %269, %282 : vector<2x256xf32>
    %c2_83 = arith.constant 2 : index
    %c0_84 = arith.constant 0 : index
    %c112_85 = arith.constant 112 : index
    %284 = vector.load %arg7[%c2_83, %c0_84, %c112_85] : memref<3x2x512xf32, #tpu.memory_space<vmem>>, vector<1x2x256xf32>
    %285 = vector.shape_cast %284 : vector<1x2x256xf32> to vector<2x256xf32>
    %c19 = arith.constant 19 : index
    %286 = memref.load %arg2[%c19] : memref<81xf32, #tpu.memory_space<smem>>
    %287 = vector.broadcast %286 : f32 to vector<2x256xf32>
    %288 = arith.mulf %287, %285 : vector<2x256xf32>
    %289 = arith.addf %275, %288 : vector<2x256xf32>
    %c46 = arith.constant 46 : index
    %290 = memref.load %arg2[%c46] : memref<81xf32, #tpu.memory_space<smem>>
    %291 = vector.broadcast %290 : f32 to vector<2x256xf32>
    %292 = arith.mulf %291, %285 : vector<2x256xf32>
    %293 = arith.addf %279, %292 : vector<2x256xf32>
    %c73 = arith.constant 73 : index
    %294 = memref.load %arg2[%c73] : memref<81xf32, #tpu.memory_space<smem>>
    %295 = vector.broadcast %294 : f32 to vector<2x256xf32>
    %296 = arith.mulf %295, %285 : vector<2x256xf32>
    %297 = arith.addf %283, %296 : vector<2x256xf32>
    %c2_86 = arith.constant 2 : index
    %c0_87 = arith.constant 0 : index
    %c128_88 = arith.constant 128 : index
    %298 = vector.load %arg7[%c2_86, %c0_87, %c128_88] : memref<3x2x512xf32, #tpu.memory_space<vmem>>, vector<1x2x256xf32>
    %299 = vector.shape_cast %298 : vector<1x2x256xf32> to vector<2x256xf32>
    %c22 = arith.constant 22 : index
    %300 = memref.load %arg2[%c22] : memref<81xf32, #tpu.memory_space<smem>>
    %301 = vector.broadcast %300 : f32 to vector<2x256xf32>
    %302 = arith.mulf %301, %299 : vector<2x256xf32>
    %303 = arith.addf %289, %302 : vector<2x256xf32>
    %c49 = arith.constant 49 : index
    %304 = memref.load %arg2[%c49] : memref<81xf32, #tpu.memory_space<smem>>
    %305 = vector.broadcast %304 : f32 to vector<2x256xf32>
    %306 = arith.mulf %305, %299 : vector<2x256xf32>
    %307 = arith.addf %293, %306 : vector<2x256xf32>
    %c76 = arith.constant 76 : index
    %308 = memref.load %arg2[%c76] : memref<81xf32, #tpu.memory_space<smem>>
    %309 = vector.broadcast %308 : f32 to vector<2x256xf32>
    %310 = arith.mulf %309, %299 : vector<2x256xf32>
    %311 = arith.addf %297, %310 : vector<2x256xf32>
    %c2_89 = arith.constant 2 : index
    %c0_90 = arith.constant 0 : index
    %c144_91 = arith.constant 144 : index
    %312 = vector.load %arg7[%c2_89, %c0_90, %c144_91] : memref<3x2x512xf32, #tpu.memory_space<vmem>>, vector<1x2x256xf32>
    %313 = vector.shape_cast %312 : vector<1x2x256xf32> to vector<2x256xf32>
    %c25 = arith.constant 25 : index
    %314 = memref.load %arg2[%c25] : memref<81xf32, #tpu.memory_space<smem>>
    %315 = vector.broadcast %314 : f32 to vector<2x256xf32>
    %316 = arith.mulf %315, %313 : vector<2x256xf32>
    %317 = arith.addf %303, %316 : vector<2x256xf32>
    %c52 = arith.constant 52 : index
    %318 = memref.load %arg2[%c52] : memref<81xf32, #tpu.memory_space<smem>>
    %319 = vector.broadcast %318 : f32 to vector<2x256xf32>
    %320 = arith.mulf %319, %313 : vector<2x256xf32>
    %321 = arith.addf %307, %320 : vector<2x256xf32>
    %c79 = arith.constant 79 : index
    %322 = memref.load %arg2[%c79] : memref<81xf32, #tpu.memory_space<smem>>
    %323 = vector.broadcast %322 : f32 to vector<2x256xf32>
    %324 = arith.mulf %323, %313 : vector<2x256xf32>
    %325 = arith.addf %311, %324 : vector<2x256xf32>
    %cst_92 = arith.constant 0.000000e+00 : f32
    %326 = vector.broadcast %cst_92 : f32 to vector<2x256xf32>
    %cst_93 = arith.constant 0.000000e+00 : f32
    %327 = vector.broadcast %cst_93 : f32 to vector<2x256xf32>
    %cst_94 = arith.constant 0.000000e+00 : f32
    %328 = vector.broadcast %cst_94 : f32 to vector<2x256xf32>
    %c0_95 = arith.constant 0 : index
    %c0_96 = arith.constant 0 : index
    %c113 = arith.constant 113 : index
    %329 = vector.load %arg7[%c0_95, %c0_96, %c113] : memref<3x2x512xf32, #tpu.memory_space<vmem>>, vector<1x2x256xf32>
    %330 = vector.shape_cast %329 : vector<1x2x256xf32> to vector<2x256xf32>
    %c2_97 = arith.constant 2 : index
    %331 = memref.load %arg2[%c2_97] : memref<81xf32, #tpu.memory_space<smem>>
    %332 = vector.broadcast %331 : f32 to vector<2x256xf32>
    %333 = arith.mulf %332, %330 : vector<2x256xf32>
    %334 = arith.addf %326, %333 : vector<2x256xf32>
    %c29 = arith.constant 29 : index
    %335 = memref.load %arg2[%c29] : memref<81xf32, #tpu.memory_space<smem>>
    %336 = vector.broadcast %335 : f32 to vector<2x256xf32>
    %337 = arith.mulf %336, %330 : vector<2x256xf32>
    %338 = arith.addf %327, %337 : vector<2x256xf32>
    %c56 = arith.constant 56 : index
    %339 = memref.load %arg2[%c56] : memref<81xf32, #tpu.memory_space<smem>>
    %340 = vector.broadcast %339 : f32 to vector<2x256xf32>
    %341 = arith.mulf %340, %330 : vector<2x256xf32>
    %342 = arith.addf %328, %341 : vector<2x256xf32>
    %c0_98 = arith.constant 0 : index
    %c0_99 = arith.constant 0 : index
    %c129 = arith.constant 129 : index
    %343 = vector.load %arg7[%c0_98, %c0_99, %c129] : memref<3x2x512xf32, #tpu.memory_space<vmem>>, vector<1x2x256xf32>
    %344 = vector.shape_cast %343 : vector<1x2x256xf32> to vector<2x256xf32>
    %c5 = arith.constant 5 : index
    %345 = memref.load %arg2[%c5] : memref<81xf32, #tpu.memory_space<smem>>
    %346 = vector.broadcast %345 : f32 to vector<2x256xf32>
    %347 = arith.mulf %346, %344 : vector<2x256xf32>
    %348 = arith.addf %334, %347 : vector<2x256xf32>
    %c32 = arith.constant 32 : index
    %349 = memref.load %arg2[%c32] : memref<81xf32, #tpu.memory_space<smem>>
    %350 = vector.broadcast %349 : f32 to vector<2x256xf32>
    %351 = arith.mulf %350, %344 : vector<2x256xf32>
    %352 = arith.addf %338, %351 : vector<2x256xf32>
    %c59 = arith.constant 59 : index
    %353 = memref.load %arg2[%c59] : memref<81xf32, #tpu.memory_space<smem>>
    %354 = vector.broadcast %353 : f32 to vector<2x256xf32>
    %355 = arith.mulf %354, %344 : vector<2x256xf32>
    %356 = arith.addf %342, %355 : vector<2x256xf32>
    %c0_100 = arith.constant 0 : index
    %c0_101 = arith.constant 0 : index
    %c145 = arith.constant 145 : index
    %357 = vector.load %arg7[%c0_100, %c0_101, %c145] : memref<3x2x512xf32, #tpu.memory_space<vmem>>, vector<1x2x256xf32>
    %358 = vector.shape_cast %357 : vector<1x2x256xf32> to vector<2x256xf32>
    %c8 = arith.constant 8 : index
    %359 = memref.load %arg2[%c8] : memref<81xf32, #tpu.memory_space<smem>>
    %360 = vector.broadcast %359 : f32 to vector<2x256xf32>
    %361 = arith.mulf %360, %358 : vector<2x256xf32>
    %362 = arith.addf %348, %361 : vector<2x256xf32>
    %c35 = arith.constant 35 : index
    %363 = memref.load %arg2[%c35] : memref<81xf32, #tpu.memory_space<smem>>
    %364 = vector.broadcast %363 : f32 to vector<2x256xf32>
    %365 = arith.mulf %364, %358 : vector<2x256xf32>
    %366 = arith.addf %352, %365 : vector<2x256xf32>
    %c62 = arith.constant 62 : index
    %367 = memref.load %arg2[%c62] : memref<81xf32, #tpu.memory_space<smem>>
    %368 = vector.broadcast %367 : f32 to vector<2x256xf32>
    %369 = arith.mulf %368, %358 : vector<2x256xf32>
    %370 = arith.addf %356, %369 : vector<2x256xf32>
    %c1_102 = arith.constant 1 : index
    %c0_103 = arith.constant 0 : index
    %c113_104 = arith.constant 113 : index
    %371 = vector.load %arg7[%c1_102, %c0_103, %c113_104] : memref<3x2x512xf32, #tpu.memory_space<vmem>>, vector<1x2x256xf32>
    %372 = vector.shape_cast %371 : vector<1x2x256xf32> to vector<2x256xf32>
    %c11 = arith.constant 11 : index
    %373 = memref.load %arg2[%c11] : memref<81xf32, #tpu.memory_space<smem>>
    %374 = vector.broadcast %373 : f32 to vector<2x256xf32>
    %375 = arith.mulf %374, %372 : vector<2x256xf32>
    %376 = arith.addf %362, %375 : vector<2x256xf32>
    %c38 = arith.constant 38 : index
    %377 = memref.load %arg2[%c38] : memref<81xf32, #tpu.memory_space<smem>>
    %378 = vector.broadcast %377 : f32 to vector<2x256xf32>
    %379 = arith.mulf %378, %372 : vector<2x256xf32>
    %380 = arith.addf %366, %379 : vector<2x256xf32>
    %c65 = arith.constant 65 : index
    %381 = memref.load %arg2[%c65] : memref<81xf32, #tpu.memory_space<smem>>
    %382 = vector.broadcast %381 : f32 to vector<2x256xf32>
    %383 = arith.mulf %382, %372 : vector<2x256xf32>
    %384 = arith.addf %370, %383 : vector<2x256xf32>
    %c1_105 = arith.constant 1 : index
    %c0_106 = arith.constant 0 : index
    %c129_107 = arith.constant 129 : index
    %385 = vector.load %arg7[%c1_105, %c0_106, %c129_107] : memref<3x2x512xf32, #tpu.memory_space<vmem>>, vector<1x2x256xf32>
    %386 = vector.shape_cast %385 : vector<1x2x256xf32> to vector<2x256xf32>
    %c14 = arith.constant 14 : index
    %387 = memref.load %arg2[%c14] : memref<81xf32, #tpu.memory_space<smem>>
    %388 = vector.broadcast %387 : f32 to vector<2x256xf32>
    %389 = arith.mulf %388, %386 : vector<2x256xf32>
    %390 = arith.addf %376, %389 : vector<2x256xf32>
    %c41 = arith.constant 41 : index
    %391 = memref.load %arg2[%c41] : memref<81xf32, #tpu.memory_space<smem>>
    %392 = vector.broadcast %391 : f32 to vector<2x256xf32>
    %393 = arith.mulf %392, %386 : vector<2x256xf32>
    %394 = arith.addf %380, %393 : vector<2x256xf32>
    %c68 = arith.constant 68 : index
    %395 = memref.load %arg2[%c68] : memref<81xf32, #tpu.memory_space<smem>>
    %396 = vector.broadcast %395 : f32 to vector<2x256xf32>
    %397 = arith.mulf %396, %386 : vector<2x256xf32>
    %398 = arith.addf %384, %397 : vector<2x256xf32>
    %c1_108 = arith.constant 1 : index
    %c0_109 = arith.constant 0 : index
    %c145_110 = arith.constant 145 : index
    %399 = vector.load %arg7[%c1_108, %c0_109, %c145_110] : memref<3x2x512xf32, #tpu.memory_space<vmem>>, vector<1x2x256xf32>
    %400 = vector.shape_cast %399 : vector<1x2x256xf32> to vector<2x256xf32>
    %c17 = arith.constant 17 : index
    %401 = memref.load %arg2[%c17] : memref<81xf32, #tpu.memory_space<smem>>
    %402 = vector.broadcast %401 : f32 to vector<2x256xf32>
    %403 = arith.mulf %402, %400 : vector<2x256xf32>
    %404 = arith.addf %390, %403 : vector<2x256xf32>
    %c44 = arith.constant 44 : index
    %405 = memref.load %arg2[%c44] : memref<81xf32, #tpu.memory_space<smem>>
    %406 = vector.broadcast %405 : f32 to vector<2x256xf32>
    %407 = arith.mulf %406, %400 : vector<2x256xf32>
    %408 = arith.addf %394, %407 : vector<2x256xf32>
    %c71 = arith.constant 71 : index
    %409 = memref.load %arg2[%c71] : memref<81xf32, #tpu.memory_space<smem>>
    %410 = vector.broadcast %409 : f32 to vector<2x256xf32>
    %411 = arith.mulf %410, %400 : vector<2x256xf32>
    %412 = arith.addf %398, %411 : vector<2x256xf32>
    %c2_111 = arith.constant 2 : index
    %c0_112 = arith.constant 0 : index
    %c113_113 = arith.constant 113 : index
    %413 = vector.load %arg7[%c2_111, %c0_112, %c113_113] : memref<3x2x512xf32, #tpu.memory_space<vmem>>, vector<1x2x256xf32>
    %414 = vector.shape_cast %413 : vector<1x2x256xf32> to vector<2x256xf32>
    %c20 = arith.constant 20 : index
    %415 = memref.load %arg2[%c20] : memref<81xf32, #tpu.memory_space<smem>>
    %416 = vector.broadcast %415 : f32 to vector<2x256xf32>
    %417 = arith.mulf %416, %414 : vector<2x256xf32>
    %418 = arith.addf %404, %417 : vector<2x256xf32>
    %c47 = arith.constant 47 : index
    %419 = memref.load %arg2[%c47] : memref<81xf32, #tpu.memory_space<smem>>
    %420 = vector.broadcast %419 : f32 to vector<2x256xf32>
    %421 = arith.mulf %420, %414 : vector<2x256xf32>
    %422 = arith.addf %408, %421 : vector<2x256xf32>
    %c74 = arith.constant 74 : index
    %423 = memref.load %arg2[%c74] : memref<81xf32, #tpu.memory_space<smem>>
    %424 = vector.broadcast %423 : f32 to vector<2x256xf32>
    %425 = arith.mulf %424, %414 : vector<2x256xf32>
    %426 = arith.addf %412, %425 : vector<2x256xf32>
    %c2_114 = arith.constant 2 : index
    %c0_115 = arith.constant 0 : index
    %c129_116 = arith.constant 129 : index
    %427 = vector.load %arg7[%c2_114, %c0_115, %c129_116] : memref<3x2x512xf32, #tpu.memory_space<vmem>>, vector<1x2x256xf32>
    %428 = vector.shape_cast %427 : vector<1x2x256xf32> to vector<2x256xf32>
    %c23 = arith.constant 23 : index
    %429 = memref.load %arg2[%c23] : memref<81xf32, #tpu.memory_space<smem>>
    %430 = vector.broadcast %429 : f32 to vector<2x256xf32>
    %431 = arith.mulf %430, %428 : vector<2x256xf32>
    %432 = arith.addf %418, %431 : vector<2x256xf32>
    %c50 = arith.constant 50 : index
    %433 = memref.load %arg2[%c50] : memref<81xf32, #tpu.memory_space<smem>>
    %434 = vector.broadcast %433 : f32 to vector<2x256xf32>
    %435 = arith.mulf %434, %428 : vector<2x256xf32>
    %436 = arith.addf %422, %435 : vector<2x256xf32>
    %c77 = arith.constant 77 : index
    %437 = memref.load %arg2[%c77] : memref<81xf32, #tpu.memory_space<smem>>
    %438 = vector.broadcast %437 : f32 to vector<2x256xf32>
    %439 = arith.mulf %438, %428 : vector<2x256xf32>
    %440 = arith.addf %426, %439 : vector<2x256xf32>
    %c2_117 = arith.constant 2 : index
    %c0_118 = arith.constant 0 : index
    %c145_119 = arith.constant 145 : index
    %441 = vector.load %arg7[%c2_117, %c0_118, %c145_119] : memref<3x2x512xf32, #tpu.memory_space<vmem>>, vector<1x2x256xf32>
    %442 = vector.shape_cast %441 : vector<1x2x256xf32> to vector<2x256xf32>
    %c26 = arith.constant 26 : index
    %443 = memref.load %arg2[%c26] : memref<81xf32, #tpu.memory_space<smem>>
    %444 = vector.broadcast %443 : f32 to vector<2x256xf32>
    %445 = arith.mulf %444, %442 : vector<2x256xf32>
    %446 = arith.addf %432, %445 : vector<2x256xf32>
    %c53 = arith.constant 53 : index
    %447 = memref.load %arg2[%c53] : memref<81xf32, #tpu.memory_space<smem>>
    %448 = vector.broadcast %447 : f32 to vector<2x256xf32>
    %449 = arith.mulf %448, %442 : vector<2x256xf32>
    %450 = arith.addf %436, %449 : vector<2x256xf32>
    %c80 = arith.constant 80 : index
    %451 = memref.load %arg2[%c80] : memref<81xf32, #tpu.memory_space<smem>>
    %452 = vector.broadcast %451 : f32 to vector<2x256xf32>
    %453 = arith.mulf %452, %442 : vector<2x256xf32>
    %454 = arith.addf %440, %453 : vector<2x256xf32>
    %455 = arith.mulf %20, %446 : vector<2x256xf32>
    %456 = arith.addf %317, %455 : vector<2x256xf32>
    %457 = arith.mulf %20, %450 : vector<2x256xf32>
    %458 = arith.addf %321, %457 : vector<2x256xf32>
    %459 = arith.mulf %20, %454 : vector<2x256xf32>
    %460 = arith.addf %325, %459 : vector<2x256xf32>
    %cst_120 = arith.constant 0.000000e+00 : f32
    %461 = vector.broadcast %cst_120 : f32 to vector<2x256xf32>
    %462 = arith.maximumf %456, %461 : vector<2x256xf32>
    %c0_121 = arith.constant 0 : index
    %c0_122 = arith.constant 0 : index
    %c128_123 = arith.constant 128 : index
    %463 = vector.load %arg7[%c0_121, %c0_122, %c128_123] : memref<3x2x512xf32, #tpu.memory_space<vmem>>, vector<1x2x256xf32>
    %464 = vector.shape_cast %463 : vector<1x2x256xf32> to vector<2x256xf32>
    %465 = vector.shape_cast %462 : vector<2x256xf32> to vector<1x2x256xf32>
    tpu.vector_store %arg7[%c0_121, %c0_122, %c128_123], %465 {strides = array<i32>} : memref<3x2x512xf32, #tpu.memory_space<vmem>>, vector<1x2x256xf32>,
    %cst_124 = arith.constant 0.000000e+00 : f32
    %466 = vector.broadcast %cst_124 : f32 to vector<2x256xf32>
    %467 = arith.maximumf %458, %466 : vector<2x256xf32>
    %c1_125 = arith.constant 1 : index
    %c0_126 = arith.constant 0 : index
    %c128_127 = arith.constant 128 : index
    %468 = vector.load %arg7[%c1_125, %c0_126, %c128_127] : memref<3x2x512xf32, #tpu.memory_space<vmem>>, vector<1x2x256xf32>
    %469 = vector.shape_cast %468 : vector<1x2x256xf32> to vector<2x256xf32>
    %470 = vector.shape_cast %467 : vector<2x256xf32> to vector<1x2x256xf32>
    tpu.vector_store %arg7[%c1_125, %c0_126, %c128_127], %470 {strides = array<i32>} : memref<3x2x512xf32, #tpu.memory_space<vmem>>, vector<1x2x256xf32>,
    %cst_128 = arith.constant 0.000000e+00 : f32
    %471 = vector.broadcast %cst_128 : f32 to vector<2x256xf32>
    %472 = arith.maximumf %460, %471 : vector<2x256xf32>
    %c2_129 = arith.constant 2 : index
    %c0_130 = arith.constant 0 : index
    %c128_131 = arith.constant 128 : index
    %473 = vector.load %arg7[%c2_129, %c0_130, %c128_131] : memref<3x2x512xf32, #tpu.memory_space<vmem>>, vector<1x2x256xf32>
    %474 = vector.shape_cast %473 : vector<1x2x256xf32> to vector<2x256xf32>
    %475 = vector.shape_cast %472 : vector<2x256xf32> to vector<1x2x256xf32>
    tpu.vector_store %arg7[%c2_129, %c0_130, %c128_131], %475 {strides = array<i32>} : memref<3x2x512xf32, #tpu.memory_space<vmem>>, vector<1x2x256xf32>,
    %c0_132 = arith.constant 0 : index
    %476 = memref.load %arg5[%c0_132] : memref<3xf32, #tpu.memory_space<smem>>
    %477 = vector.broadcast %476 : f32 to vector<2x256xf32>
    %c1_133 = arith.constant 1 : index
    %478 = memref.load %arg5[%c1_133] : memref<3xf32, #tpu.memory_space<smem>>
    %479 = vector.broadcast %478 : f32 to vector<2x256xf32>
    %c2_134 = arith.constant 2 : index
    %480 = memref.load %arg5[%c2_134] : memref<3xf32, #tpu.memory_space<smem>>
    %481 = vector.broadcast %480 : f32 to vector<2x256xf32>
    %cst_135 = arith.constant 0.000000e+00 : f32
    %482 = vector.broadcast %cst_135 : f32 to vector<2x256xf32>
    %cst_136 = arith.constant 0.000000e+00 : f32
    %483 = vector.broadcast %cst_136 : f32 to vector<2x256xf32>
    %cst_137 = arith.constant 0.000000e+00 : f32
    %484 = vector.broadcast %cst_137 : f32 to vector<2x256xf32>
    %c0_138 = arith.constant 0 : index
    %c0_139 = arith.constant 0 : index
    %c111_140 = arith.constant 111 : index
    %485 = vector.load %arg7[%c0_138, %c0_139, %c111_140] : memref<3x2x512xf32, #tpu.memory_space<vmem>>, vector<1x2x256xf32>
    %486 = vector.shape_cast %485 : vector<1x2x256xf32> to vector<2x256xf32>
    %c0_141 = arith.constant 0 : index
    %487 = memref.load %arg4[%c0_141] : memref<81xf32, #tpu.memory_space<smem>>
    %488 = vector.broadcast %487 : f32 to vector<2x256xf32>
    %489 = arith.mulf %488, %486 : vector<2x256xf32>
    %490 = arith.addf %482, %489 : vector<2x256xf32>
    %c27_142 = arith.constant 27 : index
    %491 = memref.load %arg4[%c27_142] : memref<81xf32, #tpu.memory_space<smem>>
    %492 = vector.broadcast %491 : f32 to vector<2x256xf32>
    %493 = arith.mulf %492, %486 : vector<2x256xf32>
    %494 = arith.addf %483, %493 : vector<2x256xf32>
    %c54_143 = arith.constant 54 : index
    %495 = memref.load %arg4[%c54_143] : memref<81xf32, #tpu.memory_space<smem>>
    %496 = vector.broadcast %495 : f32 to vector<2x256xf32>
    %497 = arith.mulf %496, %486 : vector<2x256xf32>
    %498 = arith.addf %484, %497 : vector<2x256xf32>
    %c0_144 = arith.constant 0 : index
    %c0_145 = arith.constant 0 : index
    %c127_146 = arith.constant 127 : index
    %499 = vector.load %arg7[%c0_144, %c0_145, %c127_146] : memref<3x2x512xf32, #tpu.memory_space<vmem>>, vector<1x2x256xf32>
    %500 = vector.shape_cast %499 : vector<1x2x256xf32> to vector<2x256xf32>
    %c3_147 = arith.constant 3 : index
    %501 = memref.load %arg4[%c3_147] : memref<81xf32, #tpu.memory_space<smem>>
    %502 = vector.broadcast %501 : f32 to vector<2x256xf32>
    %503 = arith.mulf %502, %500 : vector<2x256xf32>
    %504 = arith.addf %490, %503 : vector<2x256xf32>
    %c30_148 = arith.constant 30 : index
    %505 = memref.load %arg4[%c30_148] : memref<81xf32, #tpu.memory_space<smem>>
    %506 = vector.broadcast %505 : f32 to vector<2x256xf32>
    %507 = arith.mulf %506, %500 : vector<2x256xf32>
    %508 = arith.addf %494, %507 : vector<2x256xf32>
    %c57_149 = arith.constant 57 : index
    %509 = memref.load %arg4[%c57_149] : memref<81xf32, #tpu.memory_space<smem>>
    %510 = vector.broadcast %509 : f32 to vector<2x256xf32>
    %511 = arith.mulf %510, %500 : vector<2x256xf32>
    %512 = arith.addf %498, %511 : vector<2x256xf32>
    %c0_150 = arith.constant 0 : index
    %c0_151 = arith.constant 0 : index
    %c143_152 = arith.constant 143 : index
    %513 = vector.load %arg7[%c0_150, %c0_151, %c143_152] : memref<3x2x512xf32, #tpu.memory_space<vmem>>, vector<1x2x256xf32>
    %514 = vector.shape_cast %513 : vector<1x2x256xf32> to vector<2x256xf32>
    %c6_153 = arith.constant 6 : index
    %515 = memref.load %arg4[%c6_153] : memref<81xf32, #tpu.memory_space<smem>>
    %516 = vector.broadcast %515 : f32 to vector<2x256xf32>
    %517 = arith.mulf %516, %514 : vector<2x256xf32>
    %518 = arith.addf %504, %517 : vector<2x256xf32>
    %c33_154 = arith.constant 33 : index
    %519 = memref.load %arg4[%c33_154] : memref<81xf32, #tpu.memory_space<smem>>
    %520 = vector.broadcast %519 : f32 to vector<2x256xf32>
    %521 = arith.mulf %520, %514 : vector<2x256xf32>
    %522 = arith.addf %508, %521 : vector<2x256xf32>
    %c60_155 = arith.constant 60 : index
    %523 = memref.load %arg4[%c60_155] : memref<81xf32, #tpu.memory_space<smem>>
    %524 = vector.broadcast %523 : f32 to vector<2x256xf32>
    %525 = arith.mulf %524, %514 : vector<2x256xf32>
    %526 = arith.addf %512, %525 : vector<2x256xf32>
    %c1_156 = arith.constant 1 : index
    %c0_157 = arith.constant 0 : index
    %c111_158 = arith.constant 111 : index
    %527 = vector.load %arg7[%c1_156, %c0_157, %c111_158] : memref<3x2x512xf32, #tpu.memory_space<vmem>>, vector<1x2x256xf32>
    %528 = vector.shape_cast %527 : vector<1x2x256xf32> to vector<2x256xf32>
    %c9_159 = arith.constant 9 : index
    %529 = memref.load %arg4[%c9_159] : memref<81xf32, #tpu.memory_space<smem>>
    %530 = vector.broadcast %529 : f32 to vector<2x256xf32>
    %531 = arith.mulf %530, %528 : vector<2x256xf32>
    %532 = arith.addf %518, %531 : vector<2x256xf32>
    %c36_160 = arith.constant 36 : index
    %533 = memref.load %arg4[%c36_160] : memref<81xf32, #tpu.memory_space<smem>>
    %534 = vector.broadcast %533 : f32 to vector<2x256xf32>
    %535 = arith.mulf %534, %528 : vector<2x256xf32>
    %536 = arith.addf %522, %535 : vector<2x256xf32>
    %c63_161 = arith.constant 63 : index
    %537 = memref.load %arg4[%c63_161] : memref<81xf32, #tpu.memory_space<smem>>
    %538 = vector.broadcast %537 : f32 to vector<2x256xf32>
    %539 = arith.mulf %538, %528 : vector<2x256xf32>
    %540 = arith.addf %526, %539 : vector<2x256xf32>
    %c1_162 = arith.constant 1 : index
    %c0_163 = arith.constant 0 : index
    %c127_164 = arith.constant 127 : index
    %541 = vector.load %arg7[%c1_162, %c0_163, %c127_164] : memref<3x2x512xf32, #tpu.memory_space<vmem>>, vector<1x2x256xf32>
    %542 = vector.shape_cast %541 : vector<1x2x256xf32> to vector<2x256xf32>
    %c12_165 = arith.constant 12 : index
    %543 = memref.load %arg4[%c12_165] : memref<81xf32, #tpu.memory_space<smem>>
    %544 = vector.broadcast %543 : f32 to vector<2x256xf32>
    %545 = arith.mulf %544, %542 : vector<2x256xf32>
    %546 = arith.addf %532, %545 : vector<2x256xf32>
    %c39_166 = arith.constant 39 : index
    %547 = memref.load %arg4[%c39_166] : memref<81xf32, #tpu.memory_space<smem>>
    %548 = vector.broadcast %547 : f32 to vector<2x256xf32>
    %549 = arith.mulf %548, %542 : vector<2x256xf32>
    %550 = arith.addf %536, %549 : vector<2x256xf32>
    %c66_167 = arith.constant 66 : index
    %551 = memref.load %arg4[%c66_167] : memref<81xf32, #tpu.memory_space<smem>>
    %552 = vector.broadcast %551 : f32 to vector<2x256xf32>
    %553 = arith.mulf %552, %542 : vector<2x256xf32>
    %554 = arith.addf %540, %553 : vector<2x256xf32>
    %c1_168 = arith.constant 1 : index
    %c0_169 = arith.constant 0 : index
    %c143_170 = arith.constant 143 : index
    %555 = vector.load %arg7[%c1_168, %c0_169, %c143_170] : memref<3x2x512xf32, #tpu.memory_space<vmem>>, vector<1x2x256xf32>
    %556 = vector.shape_cast %555 : vector<1x2x256xf32> to vector<2x256xf32>
    %c15_171 = arith.constant 15 : index
    %557 = memref.load %arg4[%c15_171] : memref<81xf32, #tpu.memory_space<smem>>
    %558 = vector.broadcast %557 : f32 to vector<2x256xf32>
    %559 = arith.mulf %558, %556 : vector<2x256xf32>
    %560 = arith.addf %546, %559 : vector<2x256xf32>
    %c42_172 = arith.constant 42 : index
    %561 = memref.load %arg4[%c42_172] : memref<81xf32, #tpu.memory_space<smem>>
    %562 = vector.broadcast %561 : f32 to vector<2x256xf32>
    %563 = arith.mulf %562, %556 : vector<2x256xf32>
    %564 = arith.addf %550, %563 : vector<2x256xf32>
    %c69_173 = arith.constant 69 : index
    %565 = memref.load %arg4[%c69_173] : memref<81xf32, #tpu.memory_space<smem>>
    %566 = vector.broadcast %565 : f32 to vector<2x256xf32>
    %567 = arith.mulf %566, %556 : vector<2x256xf32>
    %568 = arith.addf %554, %567 : vector<2x256xf32>
    %c2_174 = arith.constant 2 : index
    %c0_175 = arith.constant 0 : index
    %c111_176 = arith.constant 111 : index
    %569 = vector.load %arg7[%c2_174, %c0_175, %c111_176] : memref<3x2x512xf32, #tpu.memory_space<vmem>>, vector<1x2x256xf32>
    %570 = vector.shape_cast %569 : vector<1x2x256xf32> to vector<2x256xf32>
    %c18_177 = arith.constant 18 : index
    %571 = memref.load %arg4[%c18_177] : memref<81xf32, #tpu.memory_space<smem>>
    %572 = vector.broadcast %571 : f32 to vector<2x256xf32>
    %573 = arith.mulf %572, %570 : vector<2x256xf32>
    %574 = arith.addf %560, %573 : vector<2x256xf32>
    %c45_178 = arith.constant 45 : index
    %575 = memref.load %arg4[%c45_178] : memref<81xf32, #tpu.memory_space<smem>>
    %576 = vector.broadcast %575 : f32 to vector<2x256xf32>
    %577 = arith.mulf %576, %570 : vector<2x256xf32>
    %578 = arith.addf %564, %577 : vector<2x256xf32>
    %c72_179 = arith.constant 72 : index
    %579 = memref.load %arg4[%c72_179] : memref<81xf32, #tpu.memory_space<smem>>
    %580 = vector.broadcast %579 : f32 to vector<2x256xf32>
    %581 = arith.mulf %580, %570 : vector<2x256xf32>
    %582 = arith.addf %568, %581 : vector<2x256xf32>
    %c2_180 = arith.constant 2 : index
    %c0_181 = arith.constant 0 : index
    %c127_182 = arith.constant 127 : index
    %583 = vector.load %arg7[%c2_180, %c0_181, %c127_182] : memref<3x2x512xf32, #tpu.memory_space<vmem>>, vector<1x2x256xf32>
    %584 = vector.shape_cast %583 : vector<1x2x256xf32> to vector<2x256xf32>
    %c21_183 = arith.constant 21 : index
    %585 = memref.load %arg4[%c21_183] : memref<81xf32, #tpu.memory_space<smem>>
    %586 = vector.broadcast %585 : f32 to vector<2x256xf32>
    %587 = arith.mulf %586, %584 : vector<2x256xf32>
    %588 = arith.addf %574, %587 : vector<2x256xf32>
    %c48_184 = arith.constant 48 : index
    %589 = memref.load %arg4[%c48_184] : memref<81xf32, #tpu.memory_space<smem>>
    %590 = vector.broadcast %589 : f32 to vector<2x256xf32>
    %591 = arith.mulf %590, %584 : vector<2x256xf32>
    %592 = arith.addf %578, %591 : vector<2x256xf32>
    %c75_185 = arith.constant 75 : index
    %593 = memref.load %arg4[%c75_185] : memref<81xf32, #tpu.memory_space<smem>>
    %594 = vector.broadcast %593 : f32 to vector<2x256xf32>
    %595 = arith.mulf %594, %584 : vector<2x256xf32>
    %596 = arith.addf %582, %595 : vector<2x256xf32>
    %c2_186 = arith.constant 2 : index
    %c0_187 = arith.constant 0 : index
    %c143_188 = arith.constant 143 : index
    %597 = vector.load %arg7[%c2_186, %c0_187, %c143_188] : memref<3x2x512xf32, #tpu.memory_space<vmem>>, vector<1x2x256xf32>
    %598 = vector.shape_cast %597 : vector<1x2x256xf32> to vector<2x256xf32>
    %c24_189 = arith.constant 24 : index
    %599 = memref.load %arg4[%c24_189] : memref<81xf32, #tpu.memory_space<smem>>
    %600 = vector.broadcast %599 : f32 to vector<2x256xf32>
    %601 = arith.mulf %600, %598 : vector<2x256xf32>
    %602 = arith.addf %588, %601 : vector<2x256xf32>
    %c51_190 = arith.constant 51 : index
    %603 = memref.load %arg4[%c51_190] : memref<81xf32, #tpu.memory_space<smem>>
    %604 = vector.broadcast %603 : f32 to vector<2x256xf32>
    %605 = arith.mulf %604, %598 : vector<2x256xf32>
    %606 = arith.addf %592, %605 : vector<2x256xf32>
    %c78_191 = arith.constant 78 : index
    %607 = memref.load %arg4[%c78_191] : memref<81xf32, #tpu.memory_space<smem>>
    %608 = vector.broadcast %607 : f32 to vector<2x256xf32>
    %609 = arith.mulf %608, %598 : vector<2x256xf32>
    %610 = arith.addf %596, %609 : vector<2x256xf32>
    %611 = arith.mulf %24, %602 : vector<2x256xf32>
    %612 = arith.addf %477, %611 : vector<2x256xf32>
    %613 = arith.mulf %24, %606 : vector<2x256xf32>
    %614 = arith.addf %479, %613 : vector<2x256xf32>
    %615 = arith.mulf %24, %610 : vector<2x256xf32>
    %616 = arith.addf %481, %615 : vector<2x256xf32>
    %c0_192 = arith.constant 0 : index
    %c0_193 = arith.constant 0 : index
    %c112_194 = arith.constant 112 : index
    %617 = vector.load %arg7[%c0_192, %c0_193, %c112_194] : memref<3x2x512xf32, #tpu.memory_space<vmem>>, vector<1x2x256xf32>
    %618 = vector.shape_cast %617 : vector<1x2x256xf32> to vector<2x256xf32>
    %c1_195 = arith.constant 1 : index
    %619 = memref.load %arg4[%c1_195] : memref<81xf32, #tpu.memory_space<smem>>
    %620 = vector.broadcast %619 : f32 to vector<2x256xf32>
    %621 = arith.mulf %620, %618 : vector<2x256xf32>
    %622 = arith.addf %612, %621 : vector<2x256xf32>
    %c28_196 = arith.constant 28 : index
    %623 = memref.load %arg4[%c28_196] : memref<81xf32, #tpu.memory_space<smem>>
    %624 = vector.broadcast %623 : f32 to vector<2x256xf32>
    %625 = arith.mulf %624, %618 : vector<2x256xf32>
    %626 = arith.addf %614, %625 : vector<2x256xf32>
    %c55_197 = arith.constant 55 : index
    %627 = memref.load %arg4[%c55_197] : memref<81xf32, #tpu.memory_space<smem>>
    %628 = vector.broadcast %627 : f32 to vector<2x256xf32>
    %629 = arith.mulf %628, %618 : vector<2x256xf32>
    %630 = arith.addf %616, %629 : vector<2x256xf32>
    %c0_198 = arith.constant 0 : index
    %c0_199 = arith.constant 0 : index
    %c128_200 = arith.constant 128 : index
    %631 = vector.load %arg7[%c0_198, %c0_199, %c128_200] : memref<3x2x512xf32, #tpu.memory_space<vmem>>, vector<1x2x256xf32>
    %632 = vector.shape_cast %631 : vector<1x2x256xf32> to vector<2x256xf32>
    %c4_201 = arith.constant 4 : index
    %633 = memref.load %arg4[%c4_201] : memref<81xf32, #tpu.memory_space<smem>>
    %634 = vector.broadcast %633 : f32 to vector<2x256xf32>
    %635 = arith.mulf %634, %632 : vector<2x256xf32>
    %636 = arith.addf %622, %635 : vector<2x256xf32>
    %c31_202 = arith.constant 31 : index
    %637 = memref.load %arg4[%c31_202] : memref<81xf32, #tpu.memory_space<smem>>
    %638 = vector.broadcast %637 : f32 to vector<2x256xf32>
    %639 = arith.mulf %638, %632 : vector<2x256xf32>
    %640 = arith.addf %626, %639 : vector<2x256xf32>
    %c58_203 = arith.constant 58 : index
    %641 = memref.load %arg4[%c58_203] : memref<81xf32, #tpu.memory_space<smem>>
    %642 = vector.broadcast %641 : f32 to vector<2x256xf32>
    %643 = arith.mulf %642, %632 : vector<2x256xf32>
    %644 = arith.addf %630, %643 : vector<2x256xf32>
    %c0_204 = arith.constant 0 : index
    %c0_205 = arith.constant 0 : index
    %c144_206 = arith.constant 144 : index
    %645 = vector.load %arg7[%c0_204, %c0_205, %c144_206] : memref<3x2x512xf32, #tpu.memory_space<vmem>>, vector<1x2x256xf32>
    %646 = vector.shape_cast %645 : vector<1x2x256xf32> to vector<2x256xf32>
    %c7_207 = arith.constant 7 : index
    %647 = memref.load %arg4[%c7_207] : memref<81xf32, #tpu.memory_space<smem>>
    %648 = vector.broadcast %647 : f32 to vector<2x256xf32>
    %649 = arith.mulf %648, %646 : vector<2x256xf32>
    %650 = arith.addf %636, %649 : vector<2x256xf32>
    %c34_208 = arith.constant 34 : index
    %651 = memref.load %arg4[%c34_208] : memref<81xf32, #tpu.memory_space<smem>>
    %652 = vector.broadcast %651 : f32 to vector<2x256xf32>
    %653 = arith.mulf %652, %646 : vector<2x256xf32>
    %654 = arith.addf %640, %653 : vector<2x256xf32>
    %c61_209 = arith.constant 61 : index
    %655 = memref.load %arg4[%c61_209] : memref<81xf32, #tpu.memory_space<smem>>
    %656 = vector.broadcast %655 : f32 to vector<2x256xf32>
    %657 = arith.mulf %656, %646 : vector<2x256xf32>
    %658 = arith.addf %644, %657 : vector<2x256xf32>
    %c1_210 = arith.constant 1 : index
    %c0_211 = arith.constant 0 : index
    %c112_212 = arith.constant 112 : index
    %659 = vector.load %arg7[%c1_210, %c0_211, %c112_212] : memref<3x2x512xf32, #tpu.memory_space<vmem>>, vector<1x2x256xf32>
    %660 = vector.shape_cast %659 : vector<1x2x256xf32> to vector<2x256xf32>
    %c10_213 = arith.constant 10 : index
    %661 = memref.load %arg4[%c10_213] : memref<81xf32, #tpu.memory_space<smem>>
    %662 = vector.broadcast %661 : f32 to vector<2x256xf32>
    %663 = arith.mulf %662, %660 : vector<2x256xf32>
    %664 = arith.addf %650, %663 : vector<2x256xf32>
    %c37_214 = arith.constant 37 : index
    %665 = memref.load %arg4[%c37_214] : memref<81xf32, #tpu.memory_space<smem>>
    %666 = vector.broadcast %665 : f32 to vector<2x256xf32>
    %667 = arith.mulf %666, %660 : vector<2x256xf32>
    %668 = arith.addf %654, %667 : vector<2x256xf32>
    %c64_215 = arith.constant 64 : index
    %669 = memref.load %arg4[%c64_215] : memref<81xf32, #tpu.memory_space<smem>>
    %670 = vector.broadcast %669 : f32 to vector<2x256xf32>
    %671 = arith.mulf %670, %660 : vector<2x256xf32>
    %672 = arith.addf %658, %671 : vector<2x256xf32>
    %c1_216 = arith.constant 1 : index
    %c0_217 = arith.constant 0 : index
    %c128_218 = arith.constant 128 : index
    %673 = vector.load %arg7[%c1_216, %c0_217, %c128_218] : memref<3x2x512xf32, #tpu.memory_space<vmem>>, vector<1x2x256xf32>
    %674 = vector.shape_cast %673 : vector<1x2x256xf32> to vector<2x256xf32>
    %c13_219 = arith.constant 13 : index
    %675 = memref.load %arg4[%c13_219] : memref<81xf32, #tpu.memory_space<smem>>
    %676 = vector.broadcast %675 : f32 to vector<2x256xf32>
    %677 = arith.mulf %676, %674 : vector<2x256xf32>
    %678 = arith.addf %664, %677 : vector<2x256xf32>
    %c40_220 = arith.constant 40 : index
    %679 = memref.load %arg4[%c40_220] : memref<81xf32, #tpu.memory_space<smem>>
    %680 = vector.broadcast %679 : f32 to vector<2x256xf32>
    %681 = arith.mulf %680, %674 : vector<2x256xf32>
    %682 = arith.addf %668, %681 : vector<2x256xf32>
    %c67_221 = arith.constant 67 : index
    %683 = memref.load %arg4[%c67_221] : memref<81xf32, #tpu.memory_space<smem>>
    %684 = vector.broadcast %683 : f32 to vector<2x256xf32>
    %685 = arith.mulf %684, %674 : vector<2x256xf32>
    %686 = arith.addf %672, %685 : vector<2x256xf32>
    %c1_222 = arith.constant 1 : index
    %c0_223 = arith.constant 0 : index
    %c144_224 = arith.constant 144 : index
    %687 = vector.load %arg7[%c1_222, %c0_223, %c144_224] : memref<3x2x512xf32, #tpu.memory_space<vmem>>, vector<1x2x256xf32>
    %688 = vector.shape_cast %687 : vector<1x2x256xf32> to vector<2x256xf32>
    %c16_225 = arith.constant 16 : index
    %689 = memref.load %arg4[%c16_225] : memref<81xf32, #tpu.memory_space<smem>>
    %690 = vector.broadcast %689 : f32 to vector<2x256xf32>
    %691 = arith.mulf %690, %688 : vector<2x256xf32>
    %692 = arith.addf %678, %691 : vector<2x256xf32>
    %c43_226 = arith.constant 43 : index
    %693 = memref.load %arg4[%c43_226] : memref<81xf32, #tpu.memory_space<smem>>
    %694 = vector.broadcast %693 : f32 to vector<2x256xf32>
    %695 = arith.mulf %694, %688 : vector<2x256xf32>
    %696 = arith.addf %682, %695 : vector<2x256xf32>
    %c70_227 = arith.constant 70 : index
    %697 = memref.load %arg4[%c70_227] : memref<81xf32, #tpu.memory_space<smem>>
    %698 = vector.broadcast %697 : f32 to vector<2x256xf32>
    %699 = arith.mulf %698, %688 : vector<2x256xf32>
    %700 = arith.addf %686, %699 : vector<2x256xf32>
    %c2_228 = arith.constant 2 : index
    %c0_229 = arith.constant 0 : index
    %c112_230 = arith.constant 112 : index
    %701 = vector.load %arg7[%c2_228, %c0_229, %c112_230] : memref<3x2x512xf32, #tpu.memory_space<vmem>>, vector<1x2x256xf32>
    %702 = vector.shape_cast %701 : vector<1x2x256xf32> to vector<2x256xf32>
    %c19_231 = arith.constant 19 : index
    %703 = memref.load %arg4[%c19_231] : memref<81xf32, #tpu.memory_space<smem>>
    %704 = vector.broadcast %703 : f32 to vector<2x256xf32>
    %705 = arith.mulf %704, %702 : vector<2x256xf32>
    %706 = arith.addf %692, %705 : vector<2x256xf32>
    %c46_232 = arith.constant 46 : index
    %707 = memref.load %arg4[%c46_232] : memref<81xf32, #tpu.memory_space<smem>>
    %708 = vector.broadcast %707 : f32 to vector<2x256xf32>
    %709 = arith.mulf %708, %702 : vector<2x256xf32>
    %710 = arith.addf %696, %709 : vector<2x256xf32>
    %c73_233 = arith.constant 73 : index
    %711 = memref.load %arg4[%c73_233] : memref<81xf32, #tpu.memory_space<smem>>
    %712 = vector.broadcast %711 : f32 to vector<2x256xf32>
    %713 = arith.mulf %712, %702 : vector<2x256xf32>
    %714 = arith.addf %700, %713 : vector<2x256xf32>
    %c2_234 = arith.constant 2 : index
    %c0_235 = arith.constant 0 : index
    %c128_236 = arith.constant 128 : index
    %715 = vector.load %arg7[%c2_234, %c0_235, %c128_236] : memref<3x2x512xf32, #tpu.memory_space<vmem>>, vector<1x2x256xf32>
    %716 = vector.shape_cast %715 : vector<1x2x256xf32> to vector<2x256xf32>
    %c22_237 = arith.constant 22 : index
    %717 = memref.load %arg4[%c22_237] : memref<81xf32, #tpu.memory_space<smem>>
    %718 = vector.broadcast %717 : f32 to vector<2x256xf32>
    %719 = arith.mulf %718, %716 : vector<2x256xf32>
    %720 = arith.addf %706, %719 : vector<2x256xf32>
    %c49_238 = arith.constant 49 : index
    %721 = memref.load %arg4[%c49_238] : memref<81xf32, #tpu.memory_space<smem>>
    %722 = vector.broadcast %721 : f32 to vector<2x256xf32>
    %723 = arith.mulf %722, %716 : vector<2x256xf32>
    %724 = arith.addf %710, %723 : vector<2x256xf32>
    %c76_239 = arith.constant 76 : index
    %725 = memref.load %arg4[%c76_239] : memref<81xf32, #tpu.memory_space<smem>>
    %726 = vector.broadcast %725 : f32 to vector<2x256xf32>
    %727 = arith.mulf %726, %716 : vector<2x256xf32>
    %728 = arith.addf %714, %727 : vector<2x256xf32>
    %c2_240 = arith.constant 2 : index
    %c0_241 = arith.constant 0 : index
    %c144_242 = arith.constant 144 : index
    %729 = vector.load %arg7[%c2_240, %c0_241, %c144_242] : memref<3x2x512xf32, #tpu.memory_space<vmem>>, vector<1x2x256xf32>
    %730 = vector.shape_cast %729 : vector<1x2x256xf32> to vector<2x256xf32>
    %c25_243 = arith.constant 25 : index
    %731 = memref.load %arg4[%c25_243] : memref<81xf32, #tpu.memory_space<smem>>
    %732 = vector.broadcast %731 : f32 to vector<2x256xf32>
    %733 = arith.mulf %732, %730 : vector<2x256xf32>
    %734 = arith.addf %720, %733 : vector<2x256xf32>
    %c52_244 = arith.constant 52 : index
    %735 = memref.load %arg4[%c52_244] : memref<81xf32, #tpu.memory_space<smem>>
    %736 = vector.broadcast %735 : f32 to vector<2x256xf32>
    %737 = arith.mulf %736, %730 : vector<2x256xf32>
    %738 = arith.addf %724, %737 : vector<2x256xf32>
    %c79_245 = arith.constant 79 : index
    %739 = memref.load %arg4[%c79_245] : memref<81xf32, #tpu.memory_space<smem>>
    %740 = vector.broadcast %739 : f32 to vector<2x256xf32>
    %741 = arith.mulf %740, %730 : vector<2x256xf32>
    %742 = arith.addf %728, %741 : vector<2x256xf32>
    %cst_246 = arith.constant 0.000000e+00 : f32
    %743 = vector.broadcast %cst_246 : f32 to vector<2x256xf32>
    %cst_247 = arith.constant 0.000000e+00 : f32
    %744 = vector.broadcast %cst_247 : f32 to vector<2x256xf32>
    %cst_248 = arith.constant 0.000000e+00 : f32
    %745 = vector.broadcast %cst_248 : f32 to vector<2x256xf32>
    %c0_249 = arith.constant 0 : index
    %c0_250 = arith.constant 0 : index
    %c113_251 = arith.constant 113 : index
    %746 = vector.load %arg7[%c0_249, %c0_250, %c113_251] : memref<3x2x512xf32, #tpu.memory_space<vmem>>, vector<1x2x256xf32>
    %747 = vector.shape_cast %746 : vector<1x2x256xf32> to vector<2x256xf32>
    %c2_252 = arith.constant 2 : index
    %748 = memref.load %arg4[%c2_252] : memref<81xf32, #tpu.memory_space<smem>>
    %749 = vector.broadcast %748 : f32 to vector<2x256xf32>
    %750 = arith.mulf %749, %747 : vector<2x256xf32>
    %751 = arith.addf %743, %750 : vector<2x256xf32>
    %c29_253 = arith.constant 29 : index
    %752 = memref.load %arg4[%c29_253] : memref<81xf32, #tpu.memory_space<smem>>
    %753 = vector.broadcast %752 : f32 to vector<2x256xf32>
    %754 = arith.mulf %753, %747 : vector<2x256xf32>
    %755 = arith.addf %744, %754 : vector<2x256xf32>
    %c56_254 = arith.constant 56 : index
    %756 = memref.load %arg4[%c56_254] : memref<81xf32, #tpu.memory_space<smem>>
    %757 = vector.broadcast %756 : f32 to vector<2x256xf32>
    %758 = arith.mulf %757, %747 : vector<2x256xf32>
    %759 = arith.addf %745, %758 : vector<2x256xf32>
    %c0_255 = arith.constant 0 : index
    %c0_256 = arith.constant 0 : index
    %c129_257 = arith.constant 129 : index
    %760 = vector.load %arg7[%c0_255, %c0_256, %c129_257] : memref<3x2x512xf32, #tpu.memory_space<vmem>>, vector<1x2x256xf32>
    %761 = vector.shape_cast %760 : vector<1x2x256xf32> to vector<2x256xf32>
    %c5_258 = arith.constant 5 : index
    %762 = memref.load %arg4[%c5_258] : memref<81xf32, #tpu.memory_space<smem>>
    %763 = vector.broadcast %762 : f32 to vector<2x256xf32>
    %764 = arith.mulf %763, %761 : vector<2x256xf32>
    %765 = arith.addf %751, %764 : vector<2x256xf32>
    %c32_259 = arith.constant 32 : index
    %766 = memref.load %arg4[%c32_259] : memref<81xf32, #tpu.memory_space<smem>>
    %767 = vector.broadcast %766 : f32 to vector<2x256xf32>
    %768 = arith.mulf %767, %761 : vector<2x256xf32>
    %769 = arith.addf %755, %768 : vector<2x256xf32>
    %c59_260 = arith.constant 59 : index
    %770 = memref.load %arg4[%c59_260] : memref<81xf32, #tpu.memory_space<smem>>
    %771 = vector.broadcast %770 : f32 to vector<2x256xf32>
    %772 = arith.mulf %771, %761 : vector<2x256xf32>
    %773 = arith.addf %759, %772 : vector<2x256xf32>
    %c0_261 = arith.constant 0 : index
    %c0_262 = arith.constant 0 : index
    %c145_263 = arith.constant 145 : index
    %774 = vector.load %arg7[%c0_261, %c0_262, %c145_263] : memref<3x2x512xf32, #tpu.memory_space<vmem>>, vector<1x2x256xf32>
    %775 = vector.shape_cast %774 : vector<1x2x256xf32> to vector<2x256xf32>
    %c8_264 = arith.constant 8 : index
    %776 = memref.load %arg4[%c8_264] : memref<81xf32, #tpu.memory_space<smem>>
    %777 = vector.broadcast %776 : f32 to vector<2x256xf32>
    %778 = arith.mulf %777, %775 : vector<2x256xf32>
    %779 = arith.addf %765, %778 : vector<2x256xf32>
    %c35_265 = arith.constant 35 : index
    %780 = memref.load %arg4[%c35_265] : memref<81xf32, #tpu.memory_space<smem>>
    %781 = vector.broadcast %780 : f32 to vector<2x256xf32>
    %782 = arith.mulf %781, %775 : vector<2x256xf32>
    %783 = arith.addf %769, %782 : vector<2x256xf32>
    %c62_266 = arith.constant 62 : index
    %784 = memref.load %arg4[%c62_266] : memref<81xf32, #tpu.memory_space<smem>>
    %785 = vector.broadcast %784 : f32 to vector<2x256xf32>
    %786 = arith.mulf %785, %775 : vector<2x256xf32>
    %787 = arith.addf %773, %786 : vector<2x256xf32>
    %c1_267 = arith.constant 1 : index
    %c0_268 = arith.constant 0 : index
    %c113_269 = arith.constant 113 : index
    %788 = vector.load %arg7[%c1_267, %c0_268, %c113_269] : memref<3x2x512xf32, #tpu.memory_space<vmem>>, vector<1x2x256xf32>
    %789 = vector.shape_cast %788 : vector<1x2x256xf32> to vector<2x256xf32>
    %c11_270 = arith.constant 11 : index
    %790 = memref.load %arg4[%c11_270] : memref<81xf32, #tpu.memory_space<smem>>
    %791 = vector.broadcast %790 : f32 to vector<2x256xf32>
    %792 = arith.mulf %791, %789 : vector<2x256xf32>
    %793 = arith.addf %779, %792 : vector<2x256xf32>
    %c38_271 = arith.constant 38 : index
    %794 = memref.load %arg4[%c38_271] : memref<81xf32, #tpu.memory_space<smem>>
    %795 = vector.broadcast %794 : f32 to vector<2x256xf32>
    %796 = arith.mulf %795, %789 : vector<2x256xf32>
    %797 = arith.addf %783, %796 : vector<2x256xf32>
    %c65_272 = arith.constant 65 : index
    %798 = memref.load %arg4[%c65_272] : memref<81xf32, #tpu.memory_space<smem>>
    %799 = vector.broadcast %798 : f32 to vector<2x256xf32>
    %800 = arith.mulf %799, %789 : vector<2x256xf32>
    %801 = arith.addf %787, %800 : vector<2x256xf32>
    %c1_273 = arith.constant 1 : index
    %c0_274 = arith.constant 0 : index
    %c129_275 = arith.constant 129 : index
    %802 = vector.load %arg7[%c1_273, %c0_274, %c129_275] : memref<3x2x512xf32, #tpu.memory_space<vmem>>, vector<1x2x256xf32>
    %803 = vector.shape_cast %802 : vector<1x2x256xf32> to vector<2x256xf32>
    %c14_276 = arith.constant 14 : index
    %804 = memref.load %arg4[%c14_276] : memref<81xf32, #tpu.memory_space<smem>>
    %805 = vector.broadcast %804 : f32 to vector<2x256xf32>
    %806 = arith.mulf %805, %803 : vector<2x256xf32>
    %807 = arith.addf %793, %806 : vector<2x256xf32>
    %c41_277 = arith.constant 41 : index
    %808 = memref.load %arg4[%c41_277] : memref<81xf32, #tpu.memory_space<smem>>
    %809 = vector.broadcast %808 : f32 to vector<2x256xf32>
    %810 = arith.mulf %809, %803 : vector<2x256xf32>
    %811 = arith.addf %797, %810 : vector<2x256xf32>
    %c68_278 = arith.constant 68 : index
    %812 = memref.load %arg4[%c68_278] : memref<81xf32, #tpu.memory_space<smem>>
    %813 = vector.broadcast %812 : f32 to vector<2x256xf32>
    %814 = arith.mulf %813, %803 : vector<2x256xf32>
    %815 = arith.addf %801, %814 : vector<2x256xf32>
    %c1_279 = arith.constant 1 : index
    %c0_280 = arith.constant 0 : index
    %c145_281 = arith.constant 145 : index
    %816 = vector.load %arg7[%c1_279, %c0_280, %c145_281] : memref<3x2x512xf32, #tpu.memory_space<vmem>>, vector<1x2x256xf32>
    %817 = vector.shape_cast %816 : vector<1x2x256xf32> to vector<2x256xf32>
    %c17_282 = arith.constant 17 : index
    %818 = memref.load %arg4[%c17_282] : memref<81xf32, #tpu.memory_space<smem>>
    %819 = vector.broadcast %818 : f32 to vector<2x256xf32>
    %820 = arith.mulf %819, %817 : vector<2x256xf32>
    %821 = arith.addf %807, %820 : vector<2x256xf32>
    %c44_283 = arith.constant 44 : index
    %822 = memref.load %arg4[%c44_283] : memref<81xf32, #tpu.memory_space<smem>>
    %823 = vector.broadcast %822 : f32 to vector<2x256xf32>
    %824 = arith.mulf %823, %817 : vector<2x256xf32>
    %825 = arith.addf %811, %824 : vector<2x256xf32>
    %c71_284 = arith.constant 71 : index
    %826 = memref.load %arg4[%c71_284] : memref<81xf32, #tpu.memory_space<smem>>
    %827 = vector.broadcast %826 : f32 to vector<2x256xf32>
    %828 = arith.mulf %827, %817 : vector<2x256xf32>
    %829 = arith.addf %815, %828 : vector<2x256xf32>
    %c2_285 = arith.constant 2 : index
    %c0_286 = arith.constant 0 : index
    %c113_287 = arith.constant 113 : index
    %830 = vector.load %arg7[%c2_285, %c0_286, %c113_287] : memref<3x2x512xf32, #tpu.memory_space<vmem>>, vector<1x2x256xf32>
    %831 = vector.shape_cast %830 : vector<1x2x256xf32> to vector<2x256xf32>
    %c20_288 = arith.constant 20 : index
    %832 = memref.load %arg4[%c20_288] : memref<81xf32, #tpu.memory_space<smem>>
    %833 = vector.broadcast %832 : f32 to vector<2x256xf32>
    %834 = arith.mulf %833, %831 : vector<2x256xf32>
    %835 = arith.addf %821, %834 : vector<2x256xf32>
    %c47_289 = arith.constant 47 : index
    %836 = memref.load %arg4[%c47_289] : memref<81xf32, #tpu.memory_space<smem>>
    %837 = vector.broadcast %836 : f32 to vector<2x256xf32>
    %838 = arith.mulf %837, %831 : vector<2x256xf32>
    %839 = arith.addf %825, %838 : vector<2x256xf32>
    %c74_290 = arith.constant 74 : index
    %840 = memref.load %arg4[%c74_290] : memref<81xf32, #tpu.memory_space<smem>>
    %841 = vector.broadcast %840 : f32 to vector<2x256xf32>
    %842 = arith.mulf %841, %831 : vector<2x256xf32>
    %843 = arith.addf %829, %842 : vector<2x256xf32>
    %c2_291 = arith.constant 2 : index
    %c0_292 = arith.constant 0 : index
    %c129_293 = arith.constant 129 : index
    %844 = vector.load %arg7[%c2_291, %c0_292, %c129_293] : memref<3x2x512xf32, #tpu.memory_space<vmem>>, vector<1x2x256xf32>
    %845 = vector.shape_cast %844 : vector<1x2x256xf32> to vector<2x256xf32>
    %c23_294 = arith.constant 23 : index
    %846 = memref.load %arg4[%c23_294] : memref<81xf32, #tpu.memory_space<smem>>
    %847 = vector.broadcast %846 : f32 to vector<2x256xf32>
    %848 = arith.mulf %847, %845 : vector<2x256xf32>
    %849 = arith.addf %835, %848 : vector<2x256xf32>
    %c50_295 = arith.constant 50 : index
    %850 = memref.load %arg4[%c50_295] : memref<81xf32, #tpu.memory_space<smem>>
    %851 = vector.broadcast %850 : f32 to vector<2x256xf32>
    %852 = arith.mulf %851, %845 : vector<2x256xf32>
    %853 = arith.addf %839, %852 : vector<2x256xf32>
    %c77_296 = arith.constant 77 : index
    %854 = memref.load %arg4[%c77_296] : memref<81xf32, #tpu.memory_space<smem>>
    %855 = vector.broadcast %854 : f32 to vector<2x256xf32>
    %856 = arith.mulf %855, %845 : vector<2x256xf32>
    %857 = arith.addf %843, %856 : vector<2x256xf32>
    %c2_297 = arith.constant 2 : index
    %c0_298 = arith.constant 0 : index
    %c145_299 = arith.constant 145 : index
    %858 = vector.load %arg7[%c2_297, %c0_298, %c145_299] : memref<3x2x512xf32, #tpu.memory_space<vmem>>, vector<1x2x256xf32>
    %859 = vector.shape_cast %858 : vector<1x2x256xf32> to vector<2x256xf32>
    %c26_300 = arith.constant 26 : index
    %860 = memref.load %arg4[%c26_300] : memref<81xf32, #tpu.memory_space<smem>>
    %861 = vector.broadcast %860 : f32 to vector<2x256xf32>
    %862 = arith.mulf %861, %859 : vector<2x256xf32>
    %863 = arith.addf %849, %862 : vector<2x256xf32>
    %c53_301 = arith.constant 53 : index
    %864 = memref.load %arg4[%c53_301] : memref<81xf32, #tpu.memory_space<smem>>
    %865 = vector.broadcast %864 : f32 to vector<2x256xf32>
    %866 = arith.mulf %865, %859 : vector<2x256xf32>
    %867 = arith.addf %853, %866 : vector<2x256xf32>
    %c80_302 = arith.constant 80 : index
    %868 = memref.load %arg4[%c80_302] : memref<81xf32, #tpu.memory_space<smem>>
    %869 = vector.broadcast %868 : f32 to vector<2x256xf32>
    %870 = arith.mulf %869, %859 : vector<2x256xf32>
    %871 = arith.addf %857, %870 : vector<2x256xf32>
    %872 = arith.mulf %20, %863 : vector<2x256xf32>
    %873 = arith.addf %734, %872 : vector<2x256xf32>
    %874 = arith.mulf %20, %867 : vector<2x256xf32>
    %875 = arith.addf %738, %874 : vector<2x256xf32>
    %876 = arith.mulf %20, %871 : vector<2x256xf32>
    %877 = arith.addf %742, %876 : vector<2x256xf32>
    %cst_303 = arith.constant 0.000000e+00 : f32
    %878 = vector.broadcast %cst_303 : f32 to vector<2x256xf32>
    %879 = arith.maximumf %873, %878 : vector<2x256xf32>
    %c0_304 = arith.constant 0 : index
    %c0_305 = arith.constant 0 : index
    %c0_306 = arith.constant 0 : index
    %880 = vector.load %arg1[%c0_304, %c0_305, %c0_306] : memref<3x2x256xf32, #tpu.memory_space<vmem>>, vector<1x2x256xf32>
    %881 = vector.shape_cast %880 : vector<1x2x256xf32> to vector<2x256xf32>
    %882 = arith.addf %879, %881 : vector<2x256xf32>
    %c0_307 = arith.constant 0 : index
    %c0_308 = arith.constant 0 : index
    %c0_309 = arith.constant 0 : index
    %883 = vector.load %arg6[%c0_307, %c0_308, %c0_309] : memref<3x2x256xf32, #tpu.memory_space<vmem>>, vector<1x2x256xf32>
    %884 = vector.shape_cast %883 : vector<1x2x256xf32> to vector<2x256xf32>
    %885 = vector.shape_cast %882 : vector<2x256xf32> to vector<1x2x256xf32>
    tpu.vector_store %arg6[%c0_307, %c0_308, %c0_309], %885 {strides = array<i32>} : memref<3x2x256xf32, #tpu.memory_space<vmem>>, vector<1x2x256xf32>,
    %cst_310 = arith.constant 0.000000e+00 : f32
    %886 = vector.broadcast %cst_310 : f32 to vector<2x256xf32>
    %887 = arith.maximumf %875, %886 : vector<2x256xf32>
    %c1_311 = arith.constant 1 : index
    %c0_312 = arith.constant 0 : index
    %c0_313 = arith.constant 0 : index
    %888 = vector.load %arg1[%c1_311, %c0_312, %c0_313] : memref<3x2x256xf32, #tpu.memory_space<vmem>>, vector<1x2x256xf32>
    %889 = vector.shape_cast %888 : vector<1x2x256xf32> to vector<2x256xf32>
    %890 = arith.addf %887, %889 : vector<2x256xf32>
    %c1_314 = arith.constant 1 : index
    %c0_315 = arith.constant 0 : index
    %c0_316 = arith.constant 0 : index
    %891 = vector.load %arg6[%c1_314, %c0_315, %c0_316] : memref<3x2x256xf32, #tpu.memory_space<vmem>>, vector<1x2x256xf32>
    %892 = vector.shape_cast %891 : vector<1x2x256xf32> to vector<2x256xf32>
    %893 = vector.shape_cast %890 : vector<2x256xf32> to vector<1x2x256xf32>
    tpu.vector_store %arg6[%c1_314, %c0_315, %c0_316], %893 {strides = array<i32>} : memref<3x2x256xf32, #tpu.memory_space<vmem>>, vector<1x2x256xf32>,
    %cst_317 = arith.constant 0.000000e+00 : f32
    %894 = vector.broadcast %cst_317 : f32 to vector<2x256xf32>
    %895 = arith.maximumf %877, %894 : vector<2x256xf32>
    %c2_318 = arith.constant 2 : index
    %c0_319 = arith.constant 0 : index
    %c0_320 = arith.constant 0 : index
    %896 = vector.load %arg1[%c2_318, %c0_319, %c0_320] : memref<3x2x256xf32, #tpu.memory_space<vmem>>, vector<1x2x256xf32>
    %897 = vector.shape_cast %896 : vector<1x2x256xf32> to vector<2x256xf32>
    %898 = arith.addf %895, %897 : vector<2x256xf32>
    %c2_321 = arith.constant 2 : index
    %c0_322 = arith.constant 0 : index
    %c0_323 = arith.constant 0 : index
    %899 = vector.load %arg6[%c2_321, %c0_322, %c0_323] : memref<3x2x256xf32, #tpu.memory_space<vmem>>, vector<1x2x256xf32>
    %900 = vector.shape_cast %899 : vector<1x2x256xf32> to vector<2x256xf32>
    %901 = vector.shape_cast %898 : vector<2x256xf32> to vector<1x2x256xf32>
    tpu.vector_store %arg6[%c2_321, %c0_322, %c0_323], %901 {strides = array<i32>} : memref<3x2x256xf32, #tpu.memory_space<vmem>>, vector<1x2x256xf32>,
    return
  }
  func.func @transform_0(%arg0: i32) -> (i32, i32, i32) {
    %c0_i32 = arith.constant 0 : i32
    %c0_i32_0 = arith.constant 0 : i32
    %c0_i32_1 = arith.constant 0 : i32
    return %c0_i32, %arg0, %c0_i32_0 : i32, i32, i32
  }
  func.func @transform_1(%arg0: i32) -> i32 {
    %c0_i32 = arith.constant 0 : i32
    %c0_i32_0 = arith.constant 0 : i32
    return %c0_i32 : i32
  }
  func.func @transform_2(%arg0: i32) -> i32 {
    %c0_i32 = arith.constant 0 : i32
    %c0_i32_0 = arith.constant 0 : i32
    return %c0_i32 : i32
  }
  func.func @transform_3(%arg0: i32) -> i32 {
    %c0_i32 = arith.constant 0 : i32
    %c0_i32_0 = arith.constant 0 : i32
    return %c0_i32 : i32
  }
  func.func @transform_4(%arg0: i32) -> i32 {
    %c0_i32 = arith.constant 0 : i32
    %c0_i32_0 = arith.constant 0 : i32
    return %c0_i32 : i32
  }
  func.func @transform_5(%arg0: i32) -> (i32, i32, i32) {
    %c0_i32 = arith.constant 0 : i32
    %c0_i32_0 = arith.constant 0 : i32
    %c0_i32_1 = arith.constant 0 : i32
    return %c0_i32, %arg0, %c0_i32_0 : i32, i32, i32
  }
}

</mosaic_0001>

<bundles_post_ra>
// kernel: simple_residual_block.1
= control target key start
LH: loop header
LB: loop body
LE: loop exit
PB: predicated region body
PF: predicated region fallthrough
CT: control target
= control target key end

     0   :  { %10 = vsyncpa [#allocation4], 0  ;;  %s3669_s0 = inlined_call_operand.vmem [shape: f32[3,2,256], index: 0, kind: input, shape index: {}]   ;;  %s3670_s1 = inlined_call_operand.vmem [shape: f32[81], index: 1, kind: input, shape index: {}]   ;;  %s3671_s2 = inlined_call_operand.vmem [shape: f32[3], index: 2, kind: input, shape index: {}]   ;;  %s3672_s3 = inlined_call_operand.vmem [shape: f32[81], index: 3, kind: input, shape index: {}]   ;;  %s3673_s4 = inlined_call_operand.vmem [shape: f32[3], index: 4, kind: input, shape index: {}]   ;;  %s3674_s5 = inlined_call_operand.vmem [shape: f32[3,2,256], index: 5, kind: output, shape index: {}]  }
   0x1   :  { %11 = vsyncpa [#allocation6], 0  ;;  %s29_s20 = sshll.u32 %s3671_s2, 4  ;;  %s30_s20 = int_to_ptr.vmem [resolvable:$true] %s29_s20 }
   0x2   :  { %12 = vsyncpa [#allocation9], 0  ;;  %s20_s23 = sshll.u32 %s3670_s1, 4  ;;  %s2515_s24 = smov [#allocation5]   ;;  %s21_s23 = int_to_ptr.vmem [resolvable:$true] %s20_s23 }
   0x3   :  { %32 = dma.vmem_to_smem %s30_s20, 16, %s2515_s24, [#allocation6]  }
   0x4   :  { %s2516_s25 = smov [#allocation3]   ;;  %s38_s28 = sshll.u32 %s3672_s3, 4  ;;  %s39_s28 = int_to_ptr.vmem [resolvable:$true] %s38_s28 }
   0x5   :  { %23 = dma.vmem_to_smem %s21_s23, 16, %s2516_s25, [#allocation4]  }
   0x6   :  { %s47_s2 = sshll.u32 %s3673_s4, 4  ;;  %s2517_s6 = smov [#allocation7]   ;;  %s48_s2 = int_to_ptr.vmem [resolvable:$true] %s47_s2 }
   0x7   :  { %41 = dma.vmem_to_smem %s39_s28, 16, %s2517_s6, [#allocation6]  }
   0x8   :  { %s2518_s7 = smov [#allocation8]  }
   0x9   :  { %50 = dma.vmem_to_smem %s48_s2, 16, %s2518_s7, [#allocation9]  }
   0xa   :  { %2509 = dma.done.wait [#allocation4], 16  }
   0xb   :  { %2510 = vsyncadd [#allocation4], 4294967280 }
   0xc   :  { %2511 = dma.done.wait [#allocation6], 32  }
   0xd   :  { %2512 = vsyncadd [#allocation6], 4294967264 }
   0xe   :  { %2513 = dma.done.wait [#allocation9], 16  }
   0xf   :  { %2514 = vsyncadd [#allocation9], 4294967280 }
  0x10   :  { %67 = sfence }
  0x11   :  { %v2281_v0 = vld [vmem:[%s3669_s0 + $0x4] sm:$0xf]  ;;  %s2296_s3 = sld [smem:[#allocation3 + $0xc]]  ;;  %v3675_v1 = vmov 0.0   ;;  %v115_v2 = vld [vmem:[%s3669_s0] sm:$0xf] }
  0x12   :  { %110 = vst [vmem:[#allocation2 + $0x8] sm:$0x3] %v3675_v1  ;;  %s2287_s10 = sld [smem:[#allocation3 + $0x3]]  ;;  %v2282_v4 = vld [vmem:[%s3669_s0 + $0x8] sm:$0xf]  ;;  %s2520_s13 = smov 112  }
  0x13   :  { %119 = vst [vmem:[#allocation2 + $0xa] sm:$0xf] %v2281_v0  ;;  %s2288_s14 = sld [smem:[#allocation3 + $0x1e]]  ;;  %s2521_s18 = smov 96   ;;  %vm149_vm0 = vcmask 916480   ;;  %vm181_vm1 = vcmask 785408  }
  0x14   :  { %107 = vst [vmem:[#allocation2] sm:$0x3] %v3675_v1  ;;  %s2290_s15 = sld [smem:[#allocation3 + $0x6]]  ;;  %vm426_vm2 = vcmask 130048   ;;  %vm364_vm4 = vcmask 138240   ;;  %vm1113_vm6 = vcmask 121856  }
  0x15   :  { %108 = vst [vmem:[#allocation2 + $0x6] sm:$0x3] %v3675_v1  ;;  %s2297_s16 = sld [smem:[#allocation3 + $0x27]]  ;;  %vm1165_vm9 = vcmask 1041408  }
  0x16   :  { %111 = vst [vmem:[#allocation2 + $0xe] sm:$0x3] %v3675_v1  ;;  %s2305_s17 = sld [smem:[#allocation3 + $0x15]] }
  0x17   :  { %113 = vst [vmem:[#allocation2 + $0x10] sm:$0x3] %v3675_v1  ;;  %v219_v3 = vstv %s2296_s3  ;;  %s2300_s19 = sld [smem:[#allocation3 + $0x2a]] }
  0x18   :  { %114 = vst [vmem:[#allocation2 + $0x16] sm:$0x3] %v3675_v1  ;;  %v143_v7 = vstv %s2287_s10  ;;  %s2289_s20 = sld [smem:[#allocation3 + $0x39]] }
  0x19   :  { %116 = vst [vmem:[#allocation2 + $0x2] sm:$0xf] %v115_v2  ;;  %v154_v11 = vstv %s2288_s14  ;;  %s2299_s21 = sld [smem:[#allocation3 + $0xf]] }
  0x1a   :  { %v2582_v5 = vld [vmem:[#allocation2 + $0x8] sm:$0x3f]  ;;  %122 = vst [vmem:[#allocation2 + $0x12] sm:$0xf] %v2282_v4  ;;  %v175_v13 = vstv %s2290_s15  ;;  %s2298_s22 = sld [smem:[#allocation3 + $0x42]] }
  0x1b   :  { %v220_v6 = vmul.f32 %v219_v3, %v2582_v5  ;;  %v229_v15 = vstv %s2297_s16  ;;  %s2306_s23 = sld [smem:[#allocation3 + $0x30]] }
  0x1c   :  { %v293_v17 = vstv %s2305_s17  ;;  %v230_v18 = vmul.f32 %v229_v15, %v2582_v5  ;;  %s2291_s24 = sld [smem:[#allocation3 + $0x21]] }
  0x1d   :  { %222 = vrot.lane.b32.xlu1 %v220_v6, %s2520_s13  ;;  %v248_v20 = vld [vmem:[#allocation2 + $0xa] sm:$0x3f]  ;;  %v260_v21 = vstv %s2300_s19  ;;  %s2301_s25 = sld [smem:[#allocation3 + $0x45]] }
  0x1e   :  { %v261_v22 = vmul.f32 %v260_v21, %v248_v20  ;;  %v164_v23 = vstv %s2289_s20  ;;  %s2307_s26 = sld [smem:[#allocation3 + $0x4b]]  ;;  %v2616_v42 = vld [vmem:[#allocation2 + $0xa] sm:$0x3f] }
  0x1f   :  { %v250_v25 = vstv %s2299_s21  ;;  %s2308_s27 = sld [smem:[#allocation3 + $0x18]] }
  0x20   :  { %v2586_v8 = vld [vmem:[#allocation2] sm:$0x3f]  ;;  %v251_v26 = vmul.f32 %v250_v25, %v248_v20  ;;  %v239_v27 = vstv %s2298_s22  ;;  %s2341_s28 = sld [smem:[#allocation3 + $0x5]] }
  0x21   :  { %v144_v9 = vmul.f32 %v143_v7, %v2586_v8  ;;  %v2590_v10 = vld [vmem:[#allocation2 + $0x2] sm:$0x3f]  ;;  %v155_v12 = vmul.f32 %v154_v11, %v2586_v8  ;;  %v2596_v16 = vld [vmem:[#allocation2 + $0x10] sm:$0x3f]  ;;  %v165_v24 = vmul.f32 %v164_v23, %v2586_v8  ;;  %v303_v28 = vstv %s2306_s23  ;;  %s2350_s29 = sld [smem:[#allocation3 + $0xe]] }
  0x22   :  { %v176_v14 = vmul.f32 %v175_v13, %v2590_v10  ;;  %v294_v19 = vmul.f32 %v293_v17, %v2596_v16  ;;  %253 = vrot.lane.b32.xlu2 %v251_v26, %s2521_s18  ;;  %v186_v29 = vstv %s2291_s24  ;;  %v240_v30 = vmul.f32 %v239_v27, %v2582_v5  ;;  %v322_v35 = vld [vmem:[#allocation2 + $0x12] sm:$0x3f]  ;;  %s2292_s30 = sld [smem:[#allocation3 + $0x3c]]  ;;  %v893_v40 = vld [vmem:[#allocation2 + $0x2] sm:$0x3f] }
  0x23   :  { %146 = vrot.lane.b32.xlu0 %v144_v9, %s2520_s13  ;;  %v304_v31 = vmul.f32 %v303_v28, %v2596_v16  ;;  %v187_v32 = vmul.f32 %v186_v29, %v2590_v10  ;;  %v270_v34 = vstv %s2301_s25  ;;  %s2342_s2 = sld [smem:[#allocation3 + $0x20]]  ;;  %v1041_v60 = vld [vmem:[#allocation2 + $0x12] sm:$0x3f] }
  0x24   :  { %v313_v33 = vstv %s2307_s26  ;;  %v271_v38 = vmul.f32 %v270_v34, %v248_v20  ;;  %s2345_s6 = sld [smem:[#allocation3 + $0x23]] }
  0x25   :  { %157 = vrot.lane.b32.xlu1 %v155_v12, %s2520_s13  ;;  %v324_v36 = vstv %s2308_s27  ;;  %v314_v37 = vmul.f32 %v313_v33, %v2596_v16  ;;  %s2309_s7 = sld [smem:[#allocation3 + $0x33]] }
  0x26   :  { %v325_v39 = vmul.f32 %v324_v36, %v322_v35  ;;  %v895_v41 = vstv %s2341_s28  ;;  %s2310_s1 = sld [smem:[#allocation3 + $0x4e]] }
  0x27   :  { %v969_v43 = vstv %s2350_s29  ;;  %v896_v45 = vmul.f32 %v895_v41, %v893_v40  ;;  %s2344_s8 = sld [smem:[#allocation3 + $0x8]] }
  0x28   :  { %v196_v44 = vstv %s2292_s30  ;;  %v970_v46 = vmul.f32 %v969_v43, %v2616_v42  ;;  %s2353_s3 = sld [smem:[#allocation3 + $0x11]] }
  0x29   :  { %v197_v47 = vmul.f32 %v196_v44, %v2590_v10  ;;  %v905_v48 = vstv %s2342_s2  ;;  %s2359_s4 = sld [smem:[#allocation3 + $0x17]]  ;;  %s2522_s2 = smov 17  }
  0x2a   :  { %189 = vrot.lane.b32.xlu2 %v187_v32, %s2521_s18  ;;  %v935_v49 = vstv %s2345_s6  ;;  %v906_v51 = vmul.f32 %v905_v48, %v893_v40  ;;  %s2362_s9 = sld [smem:[#allocation3 + $0x1a]] }
  0x2b   :  { %178 = vrot.lane.b32.xlu0 %v176_v14, %s2521_s18  ;;  %v334_v50 = vstv %s2309_s7  ;;  %v936_v52 = vmul.f32 %v935_v49, %v893_v40  ;;  %s2351_s10 = sld [smem:[#allocation3 + $0x29]] }
  0x2c   :  { %v335_v53 = vmul.f32 %v334_v50, %v322_v35  ;;  %v344_v54 = vstv %s2310_s1  ;;  %s2343_s11 = sld [smem:[#allocation3 + $0x3b]] }
  0x2d   :  { %232 = vrot.lane.b32.xlu1 %v230_v18, %s2520_s13  ;;  %v345_v55 = vmul.f32 %v344_v54, %v322_v35  ;;  %v925_v56 = vstv %s2344_s8  ;;  %s2346_s12 = sld [smem:[#allocation3 + $0x3e]]  ;;  %s2523_s8 = smov 16  }
  0x2e   :  { %v926_v57 = vmul.f32 %v925_v56, %v893_v40  ;;  %v999_v58 = vstv %s2353_s3  ;;  %s2354_s14 = sld [smem:[#allocation3 + $0x2c]] }
  0x2f   :  { %v1000_v59 = vmul.f32 %v999_v58, %v2616_v42  ;;  %v1043_v61 = vstv %s2359_s4  ;;  %s2352_s15 = sld [smem:[#allocation3 + $0x44]] }
  0x30   :  { %v1073_v62 = vstv %s2362_s9  ;;  %v1044_v0 = vmul.f32 %v1043_v61, %v1041_v60  ;;  %s2360_s16 = sld [smem:[#allocation3 + $0x32]] }
  0x31   :  { %v979_v63 = vstv %s2351_s10  ;;  %v1074_v2 = vmul.f32 %v1073_v62, %v1041_v60  ;;  %s2363_s17 = sld [smem:[#allocation3 + $0x35]] }
  0x32   :  { %327 = vrot.lane.b32.xlu2 %v325_v39, %s2521_s18  ;;  %v980_v3 = vmul.f32 %v979_v63, %v2616_v42  ;;  %v915_v4 = vstv %s2343_s11  ;;  %s2361_s19 = sld [smem:[#allocation3 + $0x4d]] }
  0x33   :  { %296 = vrot.lane.b32.xlu0 %v294_v19, %s2520_s13  ;;  %v945_v6 = vstv %s2346_s12  ;;  %v916_v9 = vmul.f32 %v915_v4, %v893_v40  ;;  %s2355_s20 = sld [smem:[#allocation3 + $0x47]] }
  0x34   :  { %v1009_v7 = vstv %s2354_s14  ;;  %v946_v10 = vmul.f32 %v945_v6, %v893_v40  ;;  %s2364_s21 = sld [smem:[#allocation3 + $0x50]] }
  0x35   :  { %263 = vrot.lane.b32.xlu1 %v261_v22, %s2521_s18  ;;  %v1010_v11 = vmul.f32 %v1009_v7, %v2616_v42  ;;  %v989_v12 = vstv %s2352_s15  ;;  %s130_s22 = sld [smem:[#allocation3]] }
  0x36   :  { %v1053_v13 = vstv %s2360_s16  ;;  %v990_v18 = vmul.f32 %v989_v12, %v2616_v42  ;;  %s2293_s23 = sld [smem:[#allocation3 + $0x9]] }
  0x37   :  { %v1083_v14 = vstv %s2363_s17  ;;  %v1054_v15 = vmul.f32 %v1053_v13, %v1041_v60  ;;  %s2285_s24 = sld [smem:[#allocation3 + $0x1b]] }
  0x38   :  { %v1084_v17 = vmul.f32 %v1083_v14, %v1041_v60  ;;  %v1063_v19 = vstv %s2361_s19  ;;  %s2302_s25 = sld [smem:[#allocation3 + $0x12]] }
  0x39   :  { %v1019_v20 = vstv %s2355_s20  ;;  %s2294_s26 = sld [smem:[#allocation3 + $0x24]] }
  0x3a   :  { %199 = vrot.lane.b32.xlu2 %v197_v47, %s2521_s18  ;;  %v1093_v21 = vstv %s2364_s21  ;;  %v1020_v22 = vmul.f32 %v1019_v20, %v2616_v42  ;;  %s2286_s27 = sld [smem:[#allocation3 + $0x36]] }
  0x3b   :  { %167 = vrot.lane.b32.xlu0 %v165_v24, %s2520_s13  ;;  %v1094_v23 = vmul.f32 %v1093_v21, %v1041_v60  ;;  %v1064_v24 = vmul.f32 %v1063_v19, %v1041_v60  ;;  %v131_v28 = vstv %s130_s22  ;;  %s2303_s28 = sld [smem:[#allocation3 + $0x2d]] }
  0x3c   :  { %v207_v33 = vstv %s2293_s23  ;;  %s2295_s29 = sld [smem:[#allocation3 + $0x3f]] }
  0x3d   :  { %242 = vrot.lane.b32.xlu1 %v240_v30, %s2520_s13  ;;  %v132_v30 = vmul.f32 %v131_v28, %v2586_v8  ;;  %v208_v40 = vmul.f32 %v207_v33, %v2582_v5  ;;  %s2664_s30 = sld [smem:[#allocation3 + $0x48]] }
  0x3e   :  { %s2311_s6 = sld [smem:[#allocation3 + $0x1]] }
  0x3f   :  { %v211_v60 = vstv %s2294_s26  ;;  %s2312_s7 = sld [smem:[#allocation3 + $0x1c]] }
  0x40   :  { %v139_v14 = vstv %s2286_s27  ;;  %s2313_s1 = sld [smem:[#allocation3 + $0x37]] }
  0x41   :  { %v140_v20 = vmul.f32 %v139_v14, %v2586_v8  ;;  %v285_v21 = vstv %s2303_s28  ;;  %s2314_s3 = sld [smem:[#allocation3 + $0x4]] }
  0x42   :  { %337 = vrot.lane.b32.xlu2 %v335_v53, %s2521_s18  ;;  %v215_v33 = vstv %s2295_s29  ;;  %s2315_s4 = sld [smem:[#allocation3 + $0x1f]] }
  0x43   :  { %306 = vrot.lane.b32.xlu0 %v304_v31, %s2520_s13  ;;  %s2316_s9 = sld [smem:[#allocation3 + $0x3a]] }
  0x44   :  { %s2317_s10 = sld [smem:[#allocation3 + $0x7]] }
  0x45   :  { %316 = vrot.lane.b32.xlu1 %v314_v37, %s2520_s13  ;;  %s2318_s11 = sld [smem:[#allocation3 + $0x22]] }
  0x46   :  { %v454_v14 = vstv %s2313_s1  ;;  %s2319_s12 = sld [smem:[#allocation3 + $0x3d]] }
  0x47   :  { %s2320_s14 = sld [smem:[#allocation3 + $0xa]] }
  0x48   :  { %s2321_s15 = sld [smem:[#allocation3 + $0x25]] }
  0x49   :  { %s2322_s16 = sld [smem:[#allocation3 + $0x40]] }
  0x4a   :  { %347 = vrot.lane.b32.xlu2 %v345_v55, %s2521_s18  ;;  %s2323_s17 = sld [smem:[#allocation3 + $0xd]] }
  0x4b   :  { %273 = vrot.lane.b32.xlu0 %v271_v38, %s2521_s18  ;;  %v135_v38 = vstv %s2285_s24  ;;  %s2324_s19 = sld [smem:[#allocation3 + $0x28]] }
  0x4c   :  { %s2325_s20 = sld [smem:[#allocation3 + $0x43]] }
  0x4d   :  { %898 = vrot.lane.b32.xlu1 %v896_v45, %s2520_s13  ;;  %v136_v45 = vmul.f32 %v135_v38, %v2586_v8  ;;  %s2326_s21 = sld [smem:[#allocation3 + $0x10]] }
  0x4e   :  { %s2327_s22 = sld [smem:[#allocation3 + $0x2b]] }
  0x4f   :  { %s2328_s23 = sld [smem:[#allocation3 + $0x46]] }
  0x50   :  { %s2329_s24 = sld [smem:[#allocation3 + $0x13]] }
  0x51   :  { %s2331_s26 = sld [smem:[#allocation3 + $0x49]] }
  0x52   :  { %928 = vrot.lane.b32.xlu2 %v926_v57, %s2521_s18  ;;  %s2332_s27 = sld [smem:[#allocation3 + $0x16]] }
  0x53   :  { %972 = vrot.lane.b32.xlu0 %v970_v46, %s2520_s13  ;;  %v281_v46 = vstv %s2302_s25  ;;  %s2330_s25 = sld [smem:[#allocation3 + $0x2e]] }
  0x54   :  { %v282_v53 = vmul.f32 %v281_v46, %v2596_v16  ;;  %v289_v46 = vstv %s2664_s30  ;;  %s2333_s28 = sld [smem:[#allocation3 + $0x31]] }
  0x55   :  { %908 = vrot.lane.b32.xlu1 %v906_v51, %s2520_s13  ;;  %s2334_s29 = sld [smem:[#allocation3 + $0x4c]] }
  0x56   :  { %s2338_s30 = sld [smem:[#allocation3 + $0x2]] }
  0x57   :  { %s2339_s1 = sld [smem:[#allocation3 + $0x1d]] }
  0x5a   :  { %1002 = vrot.lane.b32.xlu2 %v1000_v59, %s2521_s18 }
  0x5b   :  { %938 = vrot.lane.b32.xlu0 %v936_v52, %s2521_s18 }
  0x5d   :  { %1046 = vrot.lane.b32.xlu1 %v1044_v0, %s2520_s13 }
  0x62   :  { %982 = vrot.lane.b32.xlu2 %v980_v3, %s2520_s13 }
  0x63   :  { %1076 = vrot.lane.b32.xlu0 %v1074_v2, %s2521_s18  ;;  %v212_v2 = vmul.f32 %v211_v60, %v2582_v5 }
  0x65   :  { %918 = vrot.lane.b32.xlu1 %v916_v9, %s2520_s13 }
  0x6a   :  { %1012 = vrot.lane.b32.xlu2 %v1010_v11, %s2521_s18 }
  0x6b   :  { %948 = vrot.lane.b32.xlu0 %v946_v10, %s2521_s18 }
  0x6d   :  { %1056 = vrot.lane.b32.xlu1 %v1054_v15, %s2520_s13 }
  0x72   :  { %992 = vrot.lane.b32.xlu2 %v990_v18, %s2520_s13 }
  0x73   :  { %1086 = vrot.lane.b32.xlu0 %v1084_v17, %s2521_s18 }
  0x75   :  { %1022 = vrot.lane.b32.xlu1 %v1020_v22, %s2521_s18 }
  0x7a   :  { %1066 = vrot.lane.b32.xlu2 %v1064_v24, %s2520_s13 }
  0x7b   :  { %1096 = vrot.lane.b32.xlu0 %v1094_v23, %s2521_s18 }
  0x7c   :  { %v254_v27 = vpop.permute.xlu2 %253 }
  0x7d   :  { %v255_v44 = vrot.slane %v254_v27, 6 }
  0x7f   :  { %v256_v55 = vsel %vm181_vm1, %v255_v44, %v254_v27 }
  0x84   :  { %v190_v36 = vpop.permute.xlu2 %189 }
  0x85   :  { %v191_v49 = vrot.slane %v190_v36, 6 }
  0x87   :  { %v192_v59 = vsel %vm181_vm1, %v191_v49, %v190_v36 }
  0x8c   :  { %v328_v58 = vpop.permute.xlu2 %327 }
  0x8d   :  { %v329_v62 = vrot.slane %v328_v58, 6 }
  0x8f   :  { %v223_v25 = vpop.permute.xlu1 %222  ;;  %v330_v4 = vsel %vm181_vm1, %v329_v62, %v328_v58 }
  0x90   :  { %v224_v41 = vrot.slane %v223_v25, 2 }
  0x92   :  { %v225_v50 = vsel %vm149_vm0, %v223_v25, %v224_v41 }
  0x94   :  { %v200_v17 = vpop.permute.xlu2 %199 }
  0x95   :  { %v147_v26 = vpop.permute.xlu0 %146  ;;  %v201_v24 = vrot.slane %v200_v17, 6 }
  0x96   :  { %v148_v29 = vrot.slane %v147_v26, 2 }
  0x97   :  { %v158_v32 = vpop.permute.xlu1 %157 }
  0x98   :  { %v150_v31 = vsel %vm149_vm0, %v147_v26, %v148_v29  ;;  %v159_v39 = vrot.slane %v158_v32, 2  ;;  %v286_v26 = vmul.f32 %v285_v21, %v2596_v16  ;;  %v475_v21 = vstv %s2314_s3  ;;  %s2336_s3 = sld [smem:[#allocation3 + $0x34]] }
  0x99   :  { %v152_v37 = vadd.f32 %v150_v31, %v132_v30 }
  0x9a   :  { %v160_v47 = vsel %vm149_vm0, %v158_v32, %v159_v39  ;;  %v202_v32 = vsel %vm181_vm1, %v201_v24, %v200_v17 }
  0x9b   :  { %v162_v56 = vadd.f32 %v160_v47, %v136_v45 }
  0x9d   :  { %v179_v34 = vpop.permute.xlu0 %178  ;;  %v194_v0 = vadd.f32 %v192_v59, %v162_v56 }
  0x9e   :  { %v180_v35 = vrot.slane %v179_v34, 6 }
  0x9f   :  { %v233_v51 = vpop.permute.xlu1 %232  ;;  %v213_v13 = vadd.f32 %v212_v2, %v194_v0  ;;  %v411_v0 = vld [vmem:[#allocation2] sm:$0x3f]  ;;  %v413_v2 = vstv %s2311_s6  ;;  %s2335_s6 = sld [smem:[#allocation3 + $0x19]] }
  0xa0   :  { %v182_v42 = vsel %vm181_vm1, %v180_v35, %v179_v34  ;;  %v234_v6 = vrot.slane %v233_v51, 2  ;;  %v338_v34 = vpop.permute.xlu2 %337 }
  0xa1   :  { %v184_v43 = vadd.f32 %v182_v42, %v152_v37  ;;  %v339_v36 = vrot.slane %v338_v34, 6 }
  0xa2   :  { %v235_v18 = vsel %vm149_vm0, %v233_v51, %v234_v6 }
  0xa3   :  { %v209_v48 = vadd.f32 %v208_v40, %v184_v43  ;;  %v237_v22 = vadd.f32 %v235_v18, %v213_v13  ;;  %v216_v40 = vmul.f32 %v215_v33, %v2582_v5  ;;  %v340_v42 = vsel %vm181_vm1, %v339_v36, %v338_v34  ;;  %v507_v34 = vld [vmem:[#allocation2 + $0x2] sm:$0x3f] }
  0xa5   :  { %v227_v52 = vadd.f32 %v225_v50, %v209_v48  ;;  %v297_v54 = vpop.permute.xlu0 %296 }
  0xa6   :  { %v298_v57 = vrot.slane %v297_v54, 2 }
  0xa7   :  { %v258_v61 = vadd.f32 %v256_v55, %v227_v52  ;;  %v264_v9 = vpop.permute.xlu1 %263  ;;  %v290_v52 = vmul.f32 %v289_v46, %v2596_v16  ;;  %v549_v46 = vstv %s2319_s12  ;;  %s2909_s12 = sld [smem:[#allocation3 + $0x41]] }
  0xa8   :  { %v299_v3 = vsel %vm149_vm0, %v297_v54, %v298_v57  ;;  %v265_v11 = vrot.slane %v264_v9, 6 }
  0xa9   :  { %v283_v63 = vadd.f32 %v282_v53, %v258_v61  ;;  %v348_v53 = vpop.permute.xlu2 %347 }
  0xaa   :  { %v266_v19 = vsel %vm181_vm1, %v265_v11, %v264_v9  ;;  %v349_v56 = vrot.slane %v348_v53, 6  ;;  %v434_v9 = vstv %s2312_s7  ;;  %s2847_s7 = sld [smem:[#allocation3 + $0xb]] }
  0xab   :  { %v301_v7 = vadd.f32 %v299_v3, %v283_v63  ;;  %v268_v25 = vadd.f32 %v266_v19, %v237_v22  ;;  %v414_v3 = vmul.f32 %v413_v2, %v411_v0 }
  0xac   :  { %v350_v63 = vsel %vm181_vm1, %v349_v56, %v348_v53 }
  0xad   :  { %v332_v10 = vadd.f32 %v330_v4, %v301_v7  ;;  %v168_v12 = vpop.permute.xlu0 %167  ;;  %v287_v38 = vadd.f32 %v286_v26, %v268_v25  ;;  %v486_v26 = vstv %s2315_s4  ;;  %s2876_s4 = sld [smem:[#allocation3 + $0x26]] }
  0xae   :  { %v169_v15 = vrot.slane %v168_v12, 2 }
  0xaf   :  { %354 = vst [vmem:[#allocation1] ss:$4 sm:$0xff] %v332_v10  ;;  %v243_v28 = vpop.permute.xlu1 %242  ;;  %v435_v10 = vmul.f32 %v434_v9, %v411_v0 }
  0xb0   :  { %v170_v23 = vsel %vm149_vm0, %v168_v12, %v169_v15  ;;  %v244_v37 = vrot.slane %v243_v28, 2  ;;  %v455_v15 = vmul.f32 %v454_v14, %v411_v0  ;;  %v629_v14 = vld [vmem:[#allocation2 + $0xa] sm:$0xf] }
  0xb1   :  { %v172_v27 = vadd.f32 %v170_v23, %v140_v20  ;;  %v473_v20 = vld [vmem:[#allocation2 + $0x2] sm:$0xf] }
  0xb2   :  { %v245_v44 = vsel %vm149_vm0, %v243_v28, %v244_v37  ;;  %v476_v22 = vmul.f32 %v475_v21, %v473_v20 }
  0xb3   :  { %v204_v39 = vadd.f32 %v202_v32, %v172_v27  ;;  %v487_v27 = vmul.f32 %v486_v26, %v473_v20 }
  0xb5   :  { %v307_v29 = vpop.permute.xlu0 %306  ;;  %v217_v47 = vadd.f32 %v216_v40, %v204_v39  ;;  %v2706_v39 = vpop.permute.xlu2 %928 }
  0xb6   :  { %v355_v30 = vld.sshfl [vmem:[#allocation1] sm:$0xff pattern:$0x73625140]  ;;  %v356_v31 = vld.sshfl [vmem:[#allocation1 + $0x8] sm:$0xff pattern:$0x73625140] }
  0xb7   :  { %v357_v8 = vld.sshfl [vmem:[#allocation1 + $0x10] sm:$0xff pattern:$0x73625140]  ;;  %v308_v35 = vrot.slane %v307_v29, 2  ;;  %360 = vrot.lane.b32.xlu1 %v356_v31, %s2522_s2  ;;  %358 = vrot.lane.b32.xlu0 %v355_v30, %s2522_s2  ;;  %v317_v49 = vpop.permute.xlu1 %316  ;;  %v247_v51 = vadd.f32 %v245_v44, %v217_v47  ;;  %v497_v30 = vstv %s2316_s9  ;;  %s2884_s9 = sld [smem:[#allocation3 + $0x38]] }
  0xb8   :  { %362 = vrot.lane.b32.xlu2 %v357_v8, %s2522_s2  ;;  %v318_v54 = vrot.slane %v317_v49, 2  ;;  %v498_v31 = vmul.f32 %v497_v30, %v473_v20  ;;  %v509_v8 = vstv %s2317_s10  ;;  %s2889_s10 = sld [smem:[#allocation3 + $0x14]] }
  0xb9   :  { %v309_v41 = vsel %vm149_vm0, %v307_v29, %v308_v35  ;;  %v510_v35 = vmul.f32 %v509_v8, %v507_v34 }
  0xba   :  { %v311_v43 = vadd.f32 %v309_v41, %v287_v38  ;;  %v319_v58 = vsel %vm149_vm0, %v317_v49, %v318_v54  ;;  %v529_v38 = vstv %s2318_s11  ;;  %v570_v54 = vstv %s2320_s14  ;;  %s2893_s11 = sld [smem:[#allocation3 + $0x4f]] }
  0xbb   :  { %v530_v40 = vmul.f32 %v529_v38, %v507_v34  ;;  %s2922_s14 = sld [smem:[#allocation3 + $0x2f]] }
  0xbc   :  { %v342_v45 = vadd.f32 %v340_v42, %v311_v43 }
  0xbd   :  { %v274_v48 = vpop.permute.xlu0 %273  ;;  %v2715_v47 = vpop.permute.xlu2 %1002 }
  0xbe   :  { %374 = vst [vmem:[#allocation1] ss:$4 sm:$0xff] %v342_v45  ;;  %v275_v50 = vrot.slane %v274_v48, 6 }
  0xbf   :  { %v2708_v44 = vpop.permute.xlu1 %898 }
  0xc0   :  { %v276_v5 = vsel %vm181_vm1, %v275_v50, %v274_v48  ;;  %v550_v48 = vmul.f32 %v549_v46, %v507_v34  ;;  %v653_v34 = vstv %s2325_s20  ;;  %v665_v46 = vstv %s2326_s21  ;;  %s3080_s20 = sld [smem:[#allocation5 + $0x1]] }
  0xc1   :  { %v278_v55 = vadd.f32 %v276_v5, %v247_v51  ;;  %v568_v5 = vld [vmem:[#allocation2 + $0x8] sm:$0x3f]  ;;  %s3184_s21 = sld [smem:[#allocation7 + $0x21]] }
  0xc3   :  { %v291_v57 = vadd.f32 %v290_v52, %v278_v55  ;;  %v571_v55 = vmul.f32 %v570_v54, %v568_v5 }
  0xc5   :  { %v375_v59 = vld.sshfl [vmem:[#allocation1] sm:$0xff pattern:$0x73625140]  ;;  %v376_v60 = vld.sshfl [vmem:[#allocation1 + $0x8] sm:$0xff pattern:$0x73625140]  ;;  %v321_v61 = vadd.f32 %v319_v58, %v291_v57  ;;  %v2710_v45 = vpop.permute.xlu0 %972  ;;  %v2724_v56 = vpop.permute.xlu2 %982 }
  0xc6   :  { %v377_v62 = vld.sshfl [vmem:[#allocation1 + $0x10] sm:$0xff pattern:$0x73625140]  ;;  %380 = vrot.lane.b32.xlu1 %v376_v60, %s2522_s2  ;;  %378 = vrot.lane.b32.xlu0 %v375_v59, %s2522_s2 }
  0xc7   :  { %v352_v16 = vadd.f32 %v350_v63, %v321_v61  ;;  %382 = vrot.lane.b32.xlu2 %v377_v62, %s2522_s2  ;;  %v2719_v52 = vpop.permute.xlu1 %908  ;;  %v590_v62 = vstv %s2321_s15  ;;  %s2358_s15 = sld [smem:[#allocation3 + $0x4a]] }
  0xc8   :  { %v591_v63 = vmul.f32 %v590_v62, %v568_v5 }
  0xc9   :  { %393 = vst [vmem:[#allocation1] ss:$4 sm:$0xff] %v352_v16 }
  0xcd   :  { %v2721_v53 = vpop.permute.xlu0 %938  ;;  %v2733_v16 = vpop.permute.xlu2 %1012 }
  0xcf   :  { %v2729_v60 = vpop.permute.xlu1 %1046 }
  0xd0   :  { %v394_v4 = vld.sshfl [vmem:[#allocation1] sm:$0xff pattern:$0x73625140]  ;;  %v395_v6 = vld.sshfl [vmem:[#allocation1 + $0x8] sm:$0xff pattern:$0x73625140] }
  0xd1   :  { %v396_v7 = vld.sshfl [vmem:[#allocation1 + $0x10] sm:$0xff pattern:$0x73625140]  ;;  %399 = vrot.lane.b32.xlu1 %v395_v6, %s2522_s2  ;;  %397 = vrot.lane.b32.xlu0 %v394_v4, %s2522_s2  ;;  %v610_v4 = vstv %s2322_s16  ;;  %s2524_s16 = smov 15  }
  0xd2   :  { %416 = vst [vmem:[#allocation1] ss:$4 sm:$0xff] %v414_v3  ;;  %401 = vrot.lane.b32.xlu2 %v396_v7, %s2522_s2  ;;  %v611_v9 = vmul.f32 %v610_v4, %v568_v5  ;;  %v705_v4 = vstv %s2328_s23  ;;  %s3189_s23 = sld [smem:[#allocation7 + $0x3]] }
  0xd5   :  { %v2731_v61 = vpop.permute.xlu0 %1076 }
  0xd7   :  { %v2738_v6 = vpop.permute.xlu1 %918 }
  0xd9   :  { %v417_v11 = vld.sshfl [vmem:[#allocation1] sm:$0xff pattern:$0x73625140]  ;;  %v418_v12 = vld.sshfl [vmem:[#allocation1 + $0x8] sm:$0xff pattern:$0x73625140] }
  0xda   :  { %v419_v13 = vld.sshfl [vmem:[#allocation1 + $0x10] sm:$0xff pattern:$0x73625140]  ;;  %422 = vrot.lane.b32.xlu1 %v418_v12, %s2523_s8  ;;  %420 = vrot.lane.b32.xlu0 %v417_v11, %s2523_s8 }
  0xdb   :  { %437 = vst [vmem:[#allocation1] ss:$4 sm:$0xff] %v435_v10  ;;  %424 = vrot.lane.b32.xlu2 %v419_v13, %s2523_s8  ;;  %v2742_v10 = vpop.permute.xlu2 %992 }
  0xdd   :  { %v2740_v7 = vpop.permute.xlu0 %948 }
  0xe2   :  { %v438_v17 = vld.sshfl [vmem:[#allocation1] sm:$0xff pattern:$0x73625140]  ;;  %v439_v18 = vld.sshfl [vmem:[#allocation1 + $0x8] sm:$0xff pattern:$0x73625140] }
  0xe3   :  { %v440_v19 = vld.sshfl [vmem:[#allocation1 + $0x10] sm:$0xff pattern:$0x73625140]  ;;  %443 = vrot.lane.b32.xlu1 %v439_v18, %s2523_s8  ;;  %441 = vrot.lane.b32.xlu0 %v438_v17, %s2523_s8  ;;  %v2747_v17 = vpop.permute.xlu1 %1056 }
  0xe4   :  { %457 = vst [vmem:[#allocation1] ss:$4 sm:$0xff] %v455_v15  ;;  %445 = vrot.lane.b32.xlu2 %v440_v19, %s2523_s8  ;;  %v631_v15 = vstv %s2323_s17  ;;  %s2984_s17 = sld [smem:[#allocation5 + $0x2]] }
  0xe5   :  { %v2749_v18 = vpop.permute.xlu0 %1086  ;;  %v632_v19 = vmul.f32 %v631_v15, %v629_v14 }
  0xeb   :  { %v458_v23 = vld.sshfl [vmem:[#allocation1] sm:$0xff pattern:$0x73625140]  ;;  %v459_v24 = vld.sshfl [vmem:[#allocation1 + $0x8] sm:$0xff pattern:$0x73625140]  ;;  %v2756_v26 = vpop.permute.xlu1 %1022 }
  0xec   :  { %v460_v25 = vld.sshfl [vmem:[#allocation1 + $0x10] sm:$0xff pattern:$0x73625140]  ;;  %463 = vrot.lane.b32.xlu1 %v459_v24, %s2523_s8  ;;  %461 = vrot.lane.b32.xlu0 %v458_v23, %s2523_s8  ;;  %v642_v24 = vstv %s2324_s19  ;;  %s123_s19 = sld [smem:[#allocation5]] }
  0xed   :  { %478 = vst [vmem:[#allocation1] ss:$4 sm:$0xff] %v476_v22  ;;  %465 = vrot.lane.b32.xlu2 %v460_v25, %s2523_s8  ;;  %v2751_v22 = vpop.permute.xlu2 %1066  ;;  %v643_v25 = vmul.f32 %v642_v24, %v629_v14 }
  0xf4   :  { %v2694_v28 = vld.sshfl [vmem:[#allocation1] sm:$0xff pattern:$0x73625140]  ;;  %v2696_v29 = vld.sshfl [vmem:[#allocation1 + $0x8] sm:$0xff pattern:$0x73625140] }
  0xf5   :  { %3681 = vst [vmem:[#allocation13_spill] sm:$0xff] %v2694_v28 }
  0xf6   :  { %489 = vst [vmem:[#allocation1] ss:$4 sm:$0xff] %v487_v27  ;;  %v2758_v27 = vpop.permute.xlu0 %1096 }
  0xfd   :  { %v2698_v32 = vld.sshfl [vmem:[#allocation1] sm:$0xff pattern:$0x73625140]  ;;  %v2700_v33 = vld.sshfl [vmem:[#allocation1 + $0x8] sm:$0xff pattern:$0x73625140] }
  0xfe   :  { %3682 = vst [vmem:[#allocation14_spill] sm:$0xff] %v2698_v32 }
  0xff   :  { %3683 = vst [vmem:[#allocation15_spill] sm:$0xff] %v2700_v33 }
 0x100   :  { %500 = vst [vmem:[#allocation1] ss:$4 sm:$0xff] %v498_v31 }
 0x107   :  { %v2702_v36 = vld.sshfl [vmem:[#allocation1] sm:$0xff pattern:$0x73625140]  ;;  %v2704_v37 = vld.sshfl [vmem:[#allocation1 + $0x8] sm:$0xff pattern:$0x73625140] }
 0x108   :  { %512 = vst [vmem:[#allocation1] ss:$4 sm:$0xff] %v510_v35  ;;  %v654_v35 = vmul.f32 %v653_v34, %v629_v14 }
 0x10f   :  { %v513_v41 = vld.sshfl [vmem:[#allocation1] sm:$0xff pattern:$0x73625140]  ;;  %v514_v42 = vld.sshfl [vmem:[#allocation1 + $0x8] sm:$0xff pattern:$0x73625140] }
 0x110   :  { %v515_v43 = vld.sshfl [vmem:[#allocation1 + $0x10] sm:$0xff pattern:$0x73625140]  ;;  %518 = vrot.lane.b32.xlu1 %v514_v42, %s2520_s13  ;;  %516 = vrot.lane.b32.xlu0 %v513_v41, %s2520_s13 }
 0x111   :  { %532 = vst [vmem:[#allocation1] ss:$4 sm:$0xff] %v530_v40  ;;  %520 = vrot.lane.b32.xlu2 %v515_v43, %s2520_s13  ;;  %v663_v43 = vld [vmem:[#allocation2 + $0xa] sm:$0x3f] }
 0x112   :  { %v2764_v8 = vpop.permute.xlu2 %362 }
 0x118   :  { %v534_v49 = vld.sshfl [vmem:[#allocation1 + $0x8] sm:$0xff pattern:$0x73625140]  ;;  %v535_v50 = vld.sshfl [vmem:[#allocation1 + $0x10] sm:$0xff pattern:$0x73625140] }
 0x119   :  { %538 = vrot.lane.b32.xlu1 %v534_v49, %s2520_s13  ;;  %v533_v51 = vld.sshfl [vmem:[#allocation1] sm:$0xff pattern:$0x73625140]  ;;  %540 = vrot.lane.b32.xlu2 %v535_v50, %s2520_s13  ;;  %v666_v49 = vmul.f32 %v665_v46, %v663_v43  ;;  %v746_v46 = vstv %s2330_s25  ;;  %s2370_s25 = sld [smem:[#allocation7 + $0x1e]] }
 0x11a   :  { %536 = vrot.lane.b32.xlu0 %v533_v51, %s2520_s13  ;;  %552 = vst [vmem:[#allocation1] ss:$4 sm:$0xff] %v550_v48 }
 0x121   :  { %v554_v57 = vld.sshfl [vmem:[#allocation1 + $0x8] sm:$0xff pattern:$0x73625140]  ;;  %v555_v58 = vld.sshfl [vmem:[#allocation1 + $0x10] sm:$0xff pattern:$0x73625140]  ;;  %v2774_v48 = vpop.permute.xlu2 %382 }
 0x122   :  { %558 = vrot.lane.b32.xlu1 %v554_v57, %s2520_s13  ;;  %v553_v59 = vld.sshfl [vmem:[#allocation1] sm:$0xff pattern:$0x73625140]  ;;  %560 = vrot.lane.b32.xlu2 %v555_v58, %s2520_s13  ;;  %v685_v57 = vstv %s2327_s22  ;;  %s3187_s22 = sld [smem:[#allocation7 + $0x6]] }
 0x123   :  { %556 = vrot.lane.b32.xlu0 %v553_v59, %s2520_s13  ;;  %573 = vst [vmem:[#allocation1] ss:$4 sm:$0xff] %v571_v55  ;;  %v686_v58 = vmul.f32 %v685_v57, %v663_v43 }
 0x129   :  { %v2766_v38 = vpop.permute.xlu1 %360  ;;  %v2768_v40 = vpop.permute.xlu0 %358 }
 0x12a   :  { %v575_v0 = vld.sshfl [vmem:[#allocation1 + $0x8] sm:$0xff pattern:$0x73625140]  ;;  %v576_v2 = vld.sshfl [vmem:[#allocation1 + $0x10] sm:$0xff pattern:$0x73625140] }
 0x12b   :  { %579 = vrot.lane.b32.xlu1 %v575_v0, %s2523_s8  ;;  %v574_v3 = vld.sshfl [vmem:[#allocation1] sm:$0xff pattern:$0x73625140]  ;;  %581 = vrot.lane.b32.xlu2 %v576_v2, %s2523_s8 }
 0x12c   :  { %577 = vrot.lane.b32.xlu0 %v574_v3, %s2523_s8  ;;  %593 = vst [vmem:[#allocation1] ss:$4 sm:$0xff] %v591_v63  ;;  %v2784_v55 = vpop.permute.xlu2 %401 }
 0x133   :  { %v595_v11 = vld.sshfl [vmem:[#allocation1 + $0x8] sm:$0xff pattern:$0x73625140]  ;;  %v596_v12 = vld.sshfl [vmem:[#allocation1 + $0x10] sm:$0xff pattern:$0x73625140] }
 0x134   :  { %599 = vrot.lane.b32.xlu1 %v595_v11, %s2523_s8  ;;  %v594_v13 = vld.sshfl [vmem:[#allocation1] sm:$0xff pattern:$0x73625140]  ;;  %601 = vrot.lane.b32.xlu2 %v596_v12, %s2523_s8 }
 0x135   :  { %597 = vrot.lane.b32.xlu0 %v594_v13, %s2523_s8  ;;  %613 = vst [vmem:[#allocation1] ss:$4 sm:$0xff] %v611_v9  ;;  %v2792_v3 = vpop.permute.xlu2 %424  ;;  %v706_v9 = vmul.f32 %v705_v4, %v663_v43 }
 0x138   :  { %v2776_v50 = vpop.permute.xlu1 %380  ;;  %v2778_v51 = vpop.permute.xlu0 %378 }
 0x13c   :  { %v615_v20 = vld.sshfl [vmem:[#allocation1 + $0x8] sm:$0xff pattern:$0x73625140]  ;;  %v616_v21 = vld.sshfl [vmem:[#allocation1 + $0x10] sm:$0xff pattern:$0x73625140] }
 0x13d   :  { %619 = vrot.lane.b32.xlu1 %v615_v20, %s2523_s8  ;;  %v614_v23 = vld.sshfl [vmem:[#allocation1] sm:$0xff pattern:$0x73625140]  ;;  %621 = vrot.lane.b32.xlu2 %v616_v21, %s2523_s8  ;;  %v724_v20 = vld [vmem:[#allocation2 + $0x10] sm:$0x3f]  ;;  %v726_v21 = vstv %s2329_s24  ;;  %s2374_s24 = sld [smem:[#allocation7 + $0x3c]] }
 0x13e   :  { %634 = vst [vmem:[#allocation1] ss:$4 sm:$0xff] %v632_v19  ;;  %617 = vrot.lane.b32.xlu0 %v614_v23, %s2523_s8  ;;  %v2802_v19 = vpop.permute.xlu2 %445  ;;  %v727_v23 = vmul.f32 %v726_v21, %v724_v20  ;;  %v747_v57 = vmul.f32 %v746_v46, %v724_v20  ;;  %v787_v46 = vstv %s2332_s27  ;;  %s2378_s27 = sld [smem:[#allocation7 + $0xc]] }
 0x13f   :  { %3688 = vst [vmem:[#allocation20_spill] sm:$0xff] %v2802_v19 }
 0x143   :  { %v2786_v59 = vpop.permute.xlu1 %399  ;;  %v2788_v62 = vpop.permute.xlu0 %397 }
 0x145   :  { %v2760_v30 = vld.sshfl [vmem:[#allocation1] sm:$0xff pattern:$0x73625140]  ;;  %v2762_v31 = vld.sshfl [vmem:[#allocation1 + $0x8] sm:$0xff pattern:$0x73625140] }
 0x146   :  { %3684 = vst [vmem:[#allocation16_spill] sm:$0xff] %v2760_v30  ;;  %v930_v30 = vrot.slane %v2706_v39, 6 }
 0x147   :  { %3685 = vst [vmem:[#allocation17_spill] sm:$0xff] %v2762_v31 }
 0x148   :  { %645 = vst [vmem:[#allocation1] ss:$4 sm:$0xff] %v643_v25 }
 0x14c   :  { %v2795_v11 = vpop.permute.xlu1 %422  ;;  %v2797_v12 = vpop.permute.xlu0 %420 }
 0x14f   :  { %v2770_v41 = vld.sshfl [vmem:[#allocation1] sm:$0xff pattern:$0x73625140]  ;;  %v2772_v42 = vld.sshfl [vmem:[#allocation1 + $0x8] sm:$0xff pattern:$0x73625140] }
 0x150   :  { %3686 = vst [vmem:[#allocation18_spill] sm:$0xff] %v2770_v41 }
 0x151   :  { %3687 = vst [vmem:[#allocation19_spill] sm:$0xff] %v2772_v42 }
 0x152   :  { %656 = vst [vmem:[#allocation1] ss:$4 sm:$0xff] %v654_v35 }
 0x155   :  { %v2804_v34 = vpop.permute.xlu1 %443  ;;  %v2806_v35 = vpop.permute.xlu0 %441 }
 0x156   :  { %3689 = vst [vmem:[#allocation21_spill] sm:$0xff] %v2804_v34 }
 0x157   :  { %3690 = vst [vmem:[#allocation22_spill] sm:$0xff] %v2806_v35  ;;  %v886_v35 = vstv %s2339_s1  ;;  %s2391_s1 = sld [smem:[#allocation7 + $0x33]] }
 0x159   :  { %v2780_v5 = vld.sshfl [vmem:[#allocation1] sm:$0xff pattern:$0x73625140]  ;;  %v2782_v54 = vld.sshfl [vmem:[#allocation1 + $0x8] sm:$0xff pattern:$0x73625140] }
 0x15a   :  { %668 = vst [vmem:[#allocation1] ss:$4 sm:$0xff] %v666_v49  ;;  %v2810_v49 = vpop.permute.xlu2 %465 }
 0x15e   :  { %v2817_v4 = vpop.permute.xlu0 %461 }
 0x161   :  { %v670_v63 = vld.sshfl [vmem:[#allocation1 + $0x8] sm:$0xff pattern:$0x73625140]  ;;  %v671_v0 = vld.sshfl [vmem:[#allocation1 + $0x10] sm:$0xff pattern:$0x73625140] }
 0x162   :  { %674 = vrot.lane.b32.xlu1 %v670_v63, %s2520_s13  ;;  %v669_v2 = vld.sshfl [vmem:[#allocation1] sm:$0xff pattern:$0x73625140]  ;;  %676 = vrot.lane.b32.xlu2 %v671_v0, %s2520_s13 }
 0x163   :  { %672 = vrot.lane.b32.xlu0 %v669_v2, %s2520_s13  ;;  %688 = vst [vmem:[#allocation1] ss:$4 sm:$0xff] %v686_v58  ;;  %v2815_v2 = vpop.permute.xlu1 %463 }
 0x16a   :  { %v690_v13 = vld.sshfl [vmem:[#allocation1 + $0x8] sm:$0xff pattern:$0x73625140]  ;;  %v691_v14 = vld.sshfl [vmem:[#allocation1 + $0x10] sm:$0xff pattern:$0x73625140] }
 0x16b   :  { %694 = vrot.lane.b32.xlu1 %v690_v13, %s2520_s13  ;;  %v689_v15 = vld.sshfl [vmem:[#allocation1] sm:$0xff pattern:$0x73625140]  ;;  %696 = vrot.lane.b32.xlu2 %v691_v14, %s2520_s13  ;;  %v766_v13 = vstv %s2331_s26  ;;  %s2381_s26 = sld [smem:[#allocation7 + $0xf]] }
 0x16c   :  { %692 = vrot.lane.b32.xlu0 %v689_v15, %s2520_s13  ;;  %708 = vst [vmem:[#allocation1] ss:$4 sm:$0xff] %v706_v9  ;;  %v2819_v9 = vpop.permute.xlu2 %520  ;;  %v767_v14 = vmul.f32 %v766_v13, %v724_v20 }
 0x173   :  { %v711_v24 = vld.sshfl [vmem:[#allocation1 + $0x10] sm:$0xff pattern:$0x73625140]  ;;  %v710_v25 = vld.sshfl [vmem:[#allocation1 + $0x8] sm:$0xff pattern:$0x73625140] }
 0x174   :  { %716 = vrot.lane.b32.xlu1 %v711_v24, %s2520_s13  ;;  %714 = vrot.lane.b32.xlu0 %v710_v25, %s2520_s13  ;;  %v709_v43 = vld.sshfl [vmem:[#allocation1] sm:$0xff pattern:$0x73625140] }
 0x175   :  { %729 = vst [vmem:[#allocation1] ss:$4 sm:$0xff] %v727_v23 }
 0x17c   :  { %712 = vrot.lane.b32.xlu0 %v709_v43, %s2520_s13  ;;  %v731_v58 = vld.sshfl [vmem:[#allocation1 + $0x8] sm:$0xff pattern:$0x73625140]  ;;  %v732_v63 = vld.sshfl [vmem:[#allocation1 + $0x10] sm:$0xff pattern:$0x73625140] }
 0x17d   :  { %735 = vrot.lane.b32.xlu1 %v731_v58, %s2523_s8  ;;  %737 = vrot.lane.b32.xlu2 %v732_v63, %s2523_s8  ;;  %v730_v0 = vld.sshfl [vmem:[#allocation1] sm:$0xff pattern:$0x73625140]  ;;  %v785_v43 = vld [vmem:[#allocation2 + $0x12] sm:$0xf] }
 0x17e   :  { %749 = vst [vmem:[#allocation1] ss:$4 sm:$0xff] %v747_v57  ;;  %v2828_v57 = vpop.permute.xlu2 %540  ;;  %v788_v20 = vmul.f32 %v787_v46, %v785_v43 }
 0x17f   :  { %3691 = vst [vmem:[#allocation23_spill] sm:$0xff] %v2828_v57  ;;  %v956_v57 = vstv %s2847_s7  ;;  %s2382_s7 = sld [smem:[#allocation7 + $0x2a]] }
 0x182   :  { %v2823_v24 = vpop.permute.xlu1 %518  ;;  %v2825_v25 = vpop.permute.xlu0 %516 }
 0x184   :  { %733 = vrot.lane.b32.xlu0 %v730_v0, %s2523_s8 }
 0x185   :  { %v751_v15 = vld.sshfl [vmem:[#allocation1 + $0x8] sm:$0xff pattern:$0x73625140]  ;;  %v750_v21 = vld.sshfl [vmem:[#allocation1] sm:$0xff pattern:$0x73625140] }
 0x186   :  { %755 = vrot.lane.b32.xlu1 %v751_v15, %s2523_s8  ;;  %v752_v23 = vld.sshfl [vmem:[#allocation1 + $0x10] sm:$0xff pattern:$0x73625140] }
 0x187   :  { %757 = vrot.lane.b32.xlu2 %v752_v23, %s2523_s8  ;;  %769 = vst [vmem:[#allocation1] ss:$4 sm:$0xff] %v767_v14  ;;  %v798_v23 = vstv %s2333_s28  ;;  %v2836_v14 = vpop.permute.xlu2 %560  ;;  %s2371_s28 = sld [smem:[#allocation7 + $0x39]] }
 0x188   :  { %v799_v1 = vmul.f32 %v798_v23, %v785_v43  ;;  %v2851_v23 = vld [vmem:[#allocation2] sm:$0x3f] }
 0x18b   :  { %v2832_v13 = vpop.permute.xlu1 %538 }
 0x18c   :  { %3692 = vst [vmem:[#allocation24_spill] sm:$0xff] %v2832_v13  ;;  %v2834_v15 = vpop.permute.xlu0 %536 }
 0x18d   :  { %3693 = vst [vmem:[#allocation25_spill] sm:$0xff] %v2834_v15  ;;  %v882_v15 = vstv %s2338_s30  ;;  %s2390_s30 = sld [smem:[#allocation7 + $0x18]] }
 0x18e   :  { %v771_v58 = vld.sshfl [vmem:[#allocation1 + $0x8] sm:$0xff pattern:$0x73625140]  ;;  %v772_v63 = vld.sshfl [vmem:[#allocation1 + $0x10] sm:$0xff pattern:$0x73625140] }
 0x18f   :  { %775 = vrot.lane.b32.xlu1 %v771_v58, %s2523_s8  ;;  %v770_v0 = vld.sshfl [vmem:[#allocation1] sm:$0xff pattern:$0x73625140]  ;;  %753 = vrot.lane.b32.xlu2 %v750_v21, %s2523_s8  ;;  %v809_v21 = vstv %s2334_s29  ;;  %v2849_v32 = vpop.permute.xlu2 %581  ;;  %s2379_s29 = sld [smem:[#allocation7 + $0x27]] }
 0x190   :  { %790 = vst [vmem:[#allocation1] ss:$4 sm:$0xff] %v788_v20  ;;  %v810_v42 = vmul.f32 %v809_v21, %v785_v43  ;;  %v821_v43 = vstv %s2335_s6  ;;  %v883_v21 = vmul.f32 %v882_v15, %v2851_v23  ;;  %v910_v15 = vrot.slane %v2719_v52, 6  ;;  %s2387_s6 = sld [smem:[#allocation7 + $0x15]] }
 0x191   :  { %3696 = vst [vmem:[#allocation28_spill] sm:$0xff] %v2849_v32  ;;  %v984_v32 = vrot.slane %v2724_v56, 6 }
 0x194   :  { %v2843_v58 = vpop.permute.xlu1 %558 }
 0x195   :  { %v2845_v20 = vpop.permute.xlu0 %556 }
 0x197   :  { %v2838_v41 = vld.sshfl [vmem:[#allocation1] sm:$0xff pattern:$0x73625140]  ;;  %v2840_v46 = vld.sshfl [vmem:[#allocation1 + $0x8] sm:$0xff pattern:$0x73625140]  ;;  %777 = vrot.lane.b32.xlu2 %v772_v63, %s2523_s8 }
 0x198   :  { %3694 = vst [vmem:[#allocation26_spill] sm:$0xff] %v2838_v41  ;;  %v900_v41 = vrot.slane %v2708_v44, 6 }
 0x199   :  { %3695 = vst [vmem:[#allocation27_spill] sm:$0xff] %v2840_v46  ;;  %v2859_v46 = vld [vmem:[#allocation2 + $0x12] sm:$0x3f] }
 0x19a   :  { %801 = vst [vmem:[#allocation1] ss:$4 sm:$0xff] %v799_v1  ;;  %v901_v31 = vsel %vm149_vm0, %v900_v41, %v2708_v44  ;;  %v2882_v44 = vpop.permute.xlu2 %601  ;;  %v974_v41 = vrot.slane %v2710_v45, 6 }
 0x19b   :  { %v903_v13 = vadd.f32 %v901_v31, %v883_v21  ;;  %3703 = vst [vmem:[#allocation35_spill] sm:$0xff] %v2882_v44 }
 0x19d   :  { %v2862_v33 = vpop.permute.xlu1 %579 }
 0x19e   :  { %3699 = vst [vmem:[#allocation31_spill] sm:$0xff] %v2862_v33 }
 0x19f   :  { %773 = vrot.lane.b32.xlu2 %v770_v0, %s2523_s8  ;;  %v2867_v0 = vpop.permute.xlu0 %577 }
 0x1a0   :  { %3700 = vst [vmem:[#allocation32_spill] sm:$0xff] %v2867_v0  ;;  %v960_v0 = vstv %s2876_s4  ;;  %s2380_s4 = sld [smem:[#allocation7 + $0x42]] }
 0x1a1   :  { %v2855_v1 = vld.sshfl [vmem:[#allocation1] sm:$0xff pattern:$0x73625140]  ;;  %v2857_v63 = vld.sshfl [vmem:[#allocation1 + $0x8] sm:$0xff pattern:$0x73625140] }
 0x1a2   :  { %3697 = vst [vmem:[#allocation29_spill] sm:$0xff] %v2855_v1  ;;  %v822_v1 = vmul.f32 %v821_v43, %v2859_v46  ;;  %v887_v43 = vmul.f32 %v886_v35, %v2851_v23  ;;  %v975_v35 = vsel %vm149_vm0, %v974_v41, %v2710_v45  ;;  %v2916_v41 = vld [vmem:[#allocation2 + $0x10] sm:$0x3f] }
 0x1a3   :  { %3698 = vst [vmem:[#allocation30_spill] sm:$0xff] %v2857_v63  ;;  %v2872_v63 = vld [vmem:[#allocation2 + $0x8] sm:$0x3f] }
 0x1a4   :  { %812 = vst [vmem:[#allocation1] ss:$4 sm:$0xff] %v810_v42  ;;  %v931_v42 = vsel %vm181_vm1, %v930_v30, %v2706_v39  ;;  %v957_v39 = vmul.f32 %v956_v57, %v2872_v63  ;;  %v841_v30 = vstv %s2336_s3  ;;  %s2388_s3 = sld [smem:[#allocation7 + $0x30]] }
 0x1a5   :  { %v933_v31 = vadd.f32 %v931_v42, %v903_v13  ;;  %v940_v13 = vrot.slane %v2721_v53, 6  ;;  %v842_v57 = vmul.f32 %v841_v30, %v2859_v46 }
 0x1a6   :  { %v2891_v21 = vpop.permute.xlu1 %599 }
 0x1a7   :  { %3704 = vst [vmem:[#allocation36_spill] sm:$0xff] %v2891_v21  ;;  %v958_v42 = vadd.f32 %v957_v39, %v933_v31  ;;  %v941_v21 = vsel %vm181_vm1, %v940_v13, %v2721_v53  ;;  %v961_v39 = vmul.f32 %v960_v0, %v2872_v63  ;;  %v861_v13 = vstv %s2893_s11  ;;  %s2389_s11 = sld [smem:[#allocation7 + $0x4b]] }
 0x1a9   :  { %v977_v45 = vadd.f32 %v975_v35, %v958_v42 }
 0x1ab   :  { %v2878_v34 = vld.sshfl [vmem:[#allocation1] sm:$0xff pattern:$0x73625140]  ;;  %v2880_v19 = vld.sshfl [vmem:[#allocation1 + $0x8] sm:$0xff pattern:$0x73625140] }
 0x1ac   :  { %3701 = vst [vmem:[#allocation33_spill] sm:$0xff] %v2878_v34  ;;  %v911_v34 = vsel %vm149_vm0, %v910_v15, %v2719_v52  ;;  %v890_v15 = vstv %s2884_s9  ;;  %s2392_s9 = sld [smem:[#allocation7 + $0x4e]] }
 0x1ad   :  { %3702 = vst [vmem:[#allocation34_spill] sm:$0xff] %v2880_v19  ;;  %v1004_v19 = vrot.slane %v2715_v47, 6  ;;  %v913_v44 = vadd.f32 %v911_v34, %v887_v43  ;;  %v622_v34 = vpop.permute.xlu2 %621  ;;  %v1030_v43 = vstv %s2889_s10  ;;  %s2383_s10 = sld [smem:[#allocation7 + $0x45]] }
 0x1ae   :  { %824 = vst [vmem:[#allocation1] ss:$4 sm:$0xff] %v822_v1  ;;  %v2898_v1 = vpop.permute.xlu0 %597 }
 0x1af   :  { %3705 = vst [vmem:[#allocation37_spill] sm:$0xff] %v2898_v1  ;;  %v920_v1 = vrot.slane %v2738_v6, 6  ;;  %v1005_v53 = vsel %vm181_vm1, %v1004_v19, %v2715_v47  ;;  %v943_v30 = vadd.f32 %v941_v21, %v913_v44  ;;  %v950_v47 = vrot.slane %v2740_v7, 6 }
 0x1b0   :  { %v1007_v44 = vadd.f32 %v1005_v53, %v977_v45  ;;  %v1031_v21 = vmul.f32 %v1030_v43, %v2916_v41 }
 0x1b1   :  { %v921_v42 = vsel %vm149_vm0, %v920_v1, %v2738_v6  ;;  %v985_v6 = vsel %vm149_vm0, %v984_v32, %v2724_v56  ;;  %v1014_v1 = vrot.slane %v2733_v16, 6  ;;  %v951_v45 = vsel %vm181_vm1, %v950_v47, %v2740_v7 }
 0x1b2   :  { %v1078_v32 = vrot.slane %v2731_v61, 6 }
 0x1b3   :  { %v1015_v56 = vsel %vm181_vm1, %v1014_v1, %v2733_v16 }
 0x1b4   :  { %v1079_v47 = vsel %vm181_vm1, %v1078_v32, %v2731_v61 }
 0x1b5   :  { %v827_v33 = vld.sshfl [vmem:[#allocation1 + $0x10] sm:$0xff pattern:$0x73625140]  ;;  %v826_v52 = vld.sshfl [vmem:[#allocation1 + $0x8] sm:$0xff pattern:$0x73625140] }
 0x1b6   :  { %832 = vrot.lane.b32.xlu1 %v827_v33, %s2520_s13  ;;  %830 = vrot.lane.b32.xlu0 %v826_v52, %s2520_s13  ;;  %v825_v31 = vld.sshfl [vmem:[#allocation1] sm:$0xff pattern:$0x73625140]  ;;  %v891_v33 = vmul.f32 %v890_v15, %v2851_v23  ;;  %v618_v0 = vpop.permute.xlu0 %617  ;;  %v862_v23 = vmul.f32 %v861_v13, %v2859_v46  ;;  %v962_v52 = vadd.f32 %v961_v39, %v943_v30  ;;  %v1048_v15 = vrot.slane %v2729_v60, 6 }
 0x1b7   :  { %844 = vst [vmem:[#allocation1] ss:$4 sm:$0xff] %v842_v57  ;;  %v620_v57 = vpop.permute.xlu1 %619 }
 0x1b8   :  { %v2928_v19 = vsel %vm426_vm2, %v620_v57, %v622_v34  ;;  %v2932_v35 = vsel %vm426_vm2, %v618_v0, %v620_v57  ;;  %v923_v28 = vadd.f32 %v921_v42, %v891_v33  ;;  %v964_v34 = vstv %s2909_s12  ;;  %s2426_s12 = sld [smem:[#allocation7 + $0x8]] }
 0x1b9   :  { %v1032_v57 = vadd.f32 %v1031_v21, %v1007_v44  ;;  %v987_v39 = vadd.f32 %v985_v6, %v962_v52  ;;  %v1049_v30 = vsel %vm149_vm0, %v1048_v15, %v2729_v60  ;;  %v965_v7 = vmul.f32 %v964_v34, %v2872_v63 }
 0x1ba   :  { %v953_v13 = vadd.f32 %v951_v45, %v923_v28  ;;  %v994_v33 = vrot.slane %v2742_v10, 6  ;;  %v1058_v21 = vrot.slane %v2747_v17, 6  ;;  %v1024_v28 = vrot.slane %v2756_v26, 6 }
 0x1bb   :  { %v1051_v42 = vadd.f32 %v1049_v30, %v1032_v57  ;;  %v1017_v0 = vadd.f32 %v1015_v56, %v987_v39  ;;  %v1088_v34 = vrot.slane %v2749_v18, 6 }
 0x1bc   :  { %v966_v44 = vadd.f32 %v965_v7, %v953_v13  ;;  %v995_v16 = vsel %vm149_vm0, %v994_v33, %v2742_v10  ;;  %v1059_v1 = vsel %vm149_vm0, %v1058_v21, %v2747_v17  ;;  %v1038_v10 = vstv %s2358_s15  ;;  %s2423_s15 = sld [smem:[#allocation7 + $0x5]] }
 0x1bd   :  { %v1081_v63 = vadd.f32 %v1079_v47, %v1051_v42  ;;  %v1089_v39 = vsel %vm181_vm1, %v1088_v34, %v2749_v18  ;;  %v1039_v30 = vmul.f32 %v1038_v10, %v2916_v41  ;;  %v1068_v17 = vrot.slane %v2751_v22, 6 }
 0x1be   :  { %828 = vrot.lane.b32.xlu0 %v825_v31, %s2520_s13  ;;  %v847_v53 = vld.sshfl [vmem:[#allocation1 + $0x10] sm:$0xff pattern:$0x73625140]  ;;  %v845_v43 = vld.sshfl [vmem:[#allocation1] sm:$0xff pattern:$0x73625140]  ;;  %v1034_v31 = vstv %s2922_s14  ;;  %v997_v45 = vadd.f32 %v995_v16, %v966_v44  ;;  %v2997_v16 = vpop.permute.xlu2 %676  ;;  %v468_v34 = vsel %vm426_vm2, %v2815_v2, %v2810_v49  ;;  %v403_v10 = vsel %vm364_vm4, %v2788_v62, %v2786_v59 }
 0x1bf   :  { %v846_v46 = vld.sshfl [vmem:[#allocation1 + $0x8] sm:$0xff pattern:$0x73625140]  ;;  %v1035_v60 = vmul.f32 %v1034_v31, %v2916_v41  ;;  %v1069_v41 = vsel %vm149_vm0, %v1068_v17, %v2751_v22  ;;  %v1098_v42 = vrot.slane %v2758_v27, 6  ;;  %v404_v22 = vsel %vm364_vm4, %v2786_v59, %v2784_v55  ;;  %s2432_s14 = sld [smem:[#allocation7 + $0xe]] }
 0x1c0   :  { %850 = vrot.lane.b32.xlu2 %v846_v46, %s2520_s13  ;;  %864 = vst [vmem:[#allocation1] ss:$4 sm:$0xff] %v862_v23  ;;  %v68_v23 = vlaneseq  ;;  %v128_v55 = vstv %s2984_s17  ;;  %v563_v49 = vsel %vm149_vm0, %v2843_v58, %v2836_v14  ;;  %s2435_s17 = sld [smem:[#allocation7 + $0x11]] }
 0x1c1   :  { %v1036_v6 = vadd.f32 %v1035_v60, %v1017_v0  ;;  %v1099_v47 = vsel %vm181_vm1, %v1098_v42, %v2758_v27  ;;  %v3706_v60 = vmov 0.0   ;;  %v562_v42 = vsel %vm149_vm0, %v2845_v20, %v2843_v58 }
 0x1c2   :  { %v2966_v57 = vand.u32 127, %v68_v23 }
 0x1c3   :  { %v1061_v46 = vadd.f32 %v1059_v1, %v1036_v6 }
 0x1c4   :  { %v2974_v56 = vadd.s32 128, %v2966_v57 }
 0x1c5   :  { %v1091_v7 = vadd.f32 %v1089_v39, %v1061_v46 }
 0x1c6   :  { %852 = vrot.lane.b32.xlu0 %v847_v53, %s2520_s13  ;;  %v1025_v53 = vsel %vm181_vm1, %v1024_v28, %v2756_v26  ;;  %v82_v26 = vand.u32 15, %v2974_v56  ;;  %v75_v28 = vand.u32 15, %v2966_v57 }
 0x1c7   :  { %v867_v52 = vld.sshfl [vmem:[#allocation1 + $0x10] sm:$0xff pattern:$0x73625140]  ;;  %v2960_v15 = vld.sshfl [vmem:[#allocation1] sm:$0xff pattern:$0x73625140]  ;;  %v1027_v32 = vadd.f32 %v1025_v53, %v997_v45 }
 0x1c8   :  { %872 = vrot.lane.b32.xlu1 %v867_v52, %s2520_s13  ;;  %v866_v61 = vld.sshfl [vmem:[#allocation1 + $0x8] sm:$0xff pattern:$0x73625140]  ;;  %vm102_vm3 = vcmp.gt.s32.totalorder %v82_v26, 0  ;;  %vm101_vm5 = vcmp.gt.s32.totalorder %v75_v28, 0  ;;  %vm95_vm7 = vcmp.lt.s32.totalorder %v75_v28, 15 }
 0x1c9   :  { %1103 = vst [vmem:[#allocation1] ss:$4 sm:$0xff] %v1081_v63  ;;  %v1040_v33 = vadd.f32 %v1039_v30, %v1027_v32  ;;  %v2995_v0 = vsel %vm102_vm3, 1.0, %v3706_v60  ;;  %v3020_v46 = vsel %vm101_vm5, 1.0, %v3706_v60  ;;  %vm96_vm8 = vcmp.lt.s32.totalorder %v82_v26, 15  ;;  %v3723_v28 = vld [vmem:[#allocation37_spill] sm:$0xff] }
 0x1ca   :  { %v408_v63 = vmul.f32 %v2995_v0, %v404_v22  ;;  %v407_v39 = vmul.f32 %v3020_v46, %v403_v10  ;;  %v366_v10 = vsel %vm364_vm4, %v2766_v38, %v2764_v8  ;;  %v427_v8 = vsel %vm426_vm2, %v2797_v12, %v2795_v11 }
 0x1cb   :  { %v126_v12 = vstv %s3080_s20  ;;  %v3158_v26 = vsel %vm96_vm8, 1.0, %v3706_v60  ;;  %s2424_s20 = sld [smem:[#allocation7 + $0x20]] }
 0x1cc   :  { %v410_v45 = vadd.f32 %v408_v63, %v128_v55 }
 0x1ce   :  { %848 = vrot.lane.b32.xlu0 %v845_v43, %s2520_s13  ;;  %v1071_v43 = vadd.f32 %v1069_v41, %v1040_v33  ;;  %v472_v53 = vadd.f32 %v468_v34, %v410_v45  ;;  %v409_v33 = vadd.f32 %v407_v39, %v128_v55  ;;  %v370_v39 = vmul.f32 %v2995_v0, %v366_v10 }
 0x1d0   :  { %v1105_v13 = vld.sshfl [vmem:[#allocation1 + $0x8] sm:$0xff pattern:$0x73625140]  ;;  %v1104_v31 = vld.sshfl [vmem:[#allocation1] sm:$0xff pattern:$0x73625140]  ;;  %v1101_v44 = vadd.f32 %v1099_v47, %v1071_v43  ;;  %v506_v17 = vadd.f32 %v2704_v37, %v472_v53  ;;  %v365_v53 = vsel %vm364_vm4, %v2768_v40, %v2766_v38 }
 0x1d1   :  { %1109 = vrot.lane.b32.xlu2 %v1105_v13, %s2524_s16  ;;  %1107 = vrot.lane.b32.xlu1 %v1104_v31, %s2524_s16  ;;  %v1106_v18 = vld.sshfl [vmem:[#allocation1 + $0x10] sm:$0xff pattern:$0x73625140] }
 0x1d2   :  { %1123 = vst [vmem:[#allocation1] ss:$4 sm:$0xff] %v1091_v7  ;;  %v467_v7 = vsel %vm426_vm2, %v2817_v4, %v2815_v2  ;;  %v567_v14 = vadd.f32 %v563_v49, %v506_v17  ;;  %v428_v17 = vsel %vm426_vm2, %v2795_v11, %v2792_v3  ;;  %v523_v3 = vsel %vm149_vm0, %v2823_v24, %v2819_v9 }
 0x1d3   :  { %v522_v11 = vsel %vm149_vm0, %v2825_v25, %v2823_v24  ;;  %v3712_v24 = vld [vmem:[#allocation21_spill] sm:$0xff] }
 0x1d4   :  { %v3003_v52 = vpop.permute.xlu1 %674  ;;  %v628_v41 = vadd.f32 %v2928_v19, %v567_v14 }
 0x1d5   :  { %v673_v6 = vpop.permute.xlu0 %672 }
 0x1d6   :  { %1111 = vrot.lane.b32.xlu0 %v1106_v18, %s2524_s16  ;;  %v3008_v1 = vsel %vm149_vm0, %v673_v6, %v3003_v52  ;;  %v471_v18 = vadd.f32 %v467_v7, %v409_v33  ;;  %v662_v47 = vadd.f32 %v2782_v54, %v628_v41  ;;  %v385_v7 = vsel %vm364_vm4, %v2776_v50, %v2774_v48  ;;  %v3707_v48 = vld [vmem:[#allocation13_spill] sm:$0xff] }
 0x1d7   :  { %v389_v14 = vmul.f32 %v2995_v0, %v385_v7  ;;  %v3716_v7 = vld [vmem:[#allocation17_spill] sm:$0xff] }
 0x1d8   :  { %v505_v2 = vadd.f32 %v2702_v36, %v471_v18  ;;  %v384_v18 = vsel %vm364_vm4, %v2778_v51, %v2776_v50  ;;  %v3710_v51 = vld [vmem:[#allocation32_spill] sm:$0xff] }
 0x1d9   :  { %v1126_v21 = vld.sshfl [vmem:[#allocation1 + $0x10] sm:$0xff pattern:$0x73625140]  ;;  %v1125_v23 = vld.sshfl [vmem:[#allocation1 + $0x8] sm:$0xff pattern:$0x73625140] }
 0x1da   :  { %1131 = vrot.lane.b32.xlu2 %v1126_v21, %s2524_s16  ;;  %1129 = vrot.lane.b32.xlu1 %v1125_v23, %s2524_s16  ;;  %v1124_v27 = vld.sshfl [vmem:[#allocation1] sm:$0xff pattern:$0x73625140] }
 0x1db   :  { %1142 = vst [vmem:[#allocation1] ss:$4 sm:$0xff] %v1101_v44  ;;  %v566_v44 = vadd.f32 %v562_v42, %v505_v2 }
 0x1dd   :  { %v695_v32 = vpop.permute.xlu1 %694 }
 0x1de   :  { %870 = vrot.lane.b32.xlu0 %v866_v61, %s2520_s13  ;;  %v697_v61 = vpop.permute.xlu2 %696  ;;  %v693_v62 = vpop.permute.xlu0 %692 }
 0x1df   :  { %v3030_v59 = vsel %vm149_vm0, %v695_v32, %v697_v61  ;;  %v3036_v31 = vsel %vm149_vm0, %v693_v62, %v695_v32  ;;  %v124_v61 = vstv %s123_s19  ;;  %s2427_s19 = sld [smem:[#allocation7 + $0x23]] }
 0x1e0   :  { %v372_v38 = vadd.f32 %v370_v39, %v124_v61 }
 0x1e2   :  { %1127 = vrot.lane.b32.xlu1 %v1124_v27, %s2524_s16  ;;  %v1144_v30 = vld.sshfl [vmem:[#allocation1 + $0x8] sm:$0xff pattern:$0x73625140]  ;;  %v1145_v13 = vld.sshfl [vmem:[#allocation1 + $0x10] sm:$0xff pattern:$0x73625140] }
 0x1e3   :  { %1148 = vrot.lane.b32.xlu2 %v1144_v30, %s2524_s16  ;;  %v1143_v37 = vld.sshfl [vmem:[#allocation1] sm:$0xff pattern:$0x73625140]  ;;  %v369_v30 = vmul.f32 %v3020_v46, %v365_v53  ;;  %v3713_v53 = vld [vmem:[#allocation22_spill] sm:$0xff] }
 0x1e4   :  { %v447_v39 = vsel %vm426_vm2, %v3713_v53, %v3712_v24 }
 0x1e5   :  { %v371_v40 = vadd.f32 %v369_v30, %v124_v61  ;;  %v679_v61 = vsel %vm149_vm0, %v3003_v52, %v2997_v16 }
 0x1e6   :  { %1150 = vrot.lane.b32.xlu0 %v1145_v13, %s2524_s16  ;;  %v717_v4 = vpop.permute.xlu1 %716  ;;  %v715_v43 = vpop.permute.xlu0 %714  ;;  %v432_v13 = vadd.f32 %v428_v17, %v372_v38  ;;  %v3715_v38 = vld [vmem:[#allocation24_spill] sm:$0xff] }
 0x1e7   :  { %v719_v22 = vsel %vm149_vm0, %v715_v43, %v717_v4  ;;  %v738_v63 = vpop.permute.xlu2 %737  ;;  %v431_v33 = vadd.f32 %v427_v8, %v371_v40  ;;  %v3708_v4 = vld [vmem:[#allocation28_spill] sm:$0xff]  ;;  %v3714_v8 = vld [vmem:[#allocation23_spill] sm:$0xff] }
 0x1e8   :  { %v3049_v19 = vadd.f32 %v719_v22, %v662_v47  ;;  %v484_v41 = vadd.f32 %v2696_v29, %v432_v13  ;;  %v388_v47 = vmul.f32 %v3020_v46, %v384_v18  ;;  %v3711_v22 = vld [vmem:[#allocation20_spill] sm:$0xff]  ;;  %v543_v40 = vsel %vm149_vm0, %v3715_v38, %v3714_v8 }
 0x1e9   :  { %v448_v25 = vsel %vm426_vm2, %v3712_v24, %v3711_v22 }
 0x1ea   :  { %868 = vrot.lane.b32.xlu1 %v2960_v15, %s2520_s13  ;;  %v627_v15 = vadd.f32 %v2932_v35, %v566_v44  ;;  %v527_v29 = vadd.f32 %v523_v3, %v484_v41  ;;  %v390_v30 = vadd.f32 %v388_v47, %v126_v12  ;;  %v3718_v3 = vld [vmem:[#allocation15_spill] sm:$0xff] }
 0x1eb   :  { %1146 = vrot.lane.b32.xlu2 %v1143_v37, %s2524_s16  ;;  %v483_v37 = vadd.f32 %v3707_v48, %v431_v33  ;;  %v3717_v33 = vld [vmem:[#allocation16_spill] sm:$0xff]  ;;  %v3719_v41 = vld [vmem:[#allocation35_spill] sm:$0xff] }
 0x1ec   :  { %v661_v23 = vadd.f32 %v2780_v5, %v627_v15  ;;  %v451_v17 = vadd.f32 %v447_v39, %v390_v30  ;;  %v3720_v48 = vld [vmem:[#allocation36_spill] sm:$0xff] }
 0x1ed   :  { %v526_v44 = vadd.f32 %v522_v11, %v483_v37 }
 0x1ee   :  { %v713_v21 = vpop.permute.xlu0 %712 }
 0x1ef   :  { %v718_v58 = vsel %vm149_vm0, %v713_v21, %v715_v43  ;;  %v3056_v36 = vpop.permute.xlu2 %757  ;;  %v736_v54 = vpop.permute.xlu1 %735  ;;  %v3709_v43 = vld [vmem:[#allocation31_spill] sm:$0xff]  ;;  %v391_v21 = vadd.f32 %v389_v14, %v126_v12  ;;  %v604_v12 = vsel %vm426_vm2, %v3720_v48, %v3719_v41 }
 0x1f0   :  { %v3054_v20 = vadd.f32 %v718_v58, %v661_v23  ;;  %v584_v50 = vsel %vm426_vm2, %v3709_v43, %v3708_v4  ;;  %v583_v9 = vsel %vm426_vm2, %v3710_v51, %v3709_v43  ;;  %v740_v37 = vsel %vm426_vm2, %v736_v54, %v738_v63  ;;  %v3722_v63 = vld [vmem:[#allocation14_spill] sm:$0xff] }
 0x1f1   :  { %v588_v23 = vadd.f32 %v584_v50, %v527_v29  ;;  %v587_v58 = vadd.f32 %v583_v9, %v526_v44  ;;  %v452_v10 = vadd.f32 %v448_v25, %v391_v21  ;;  %v3721_v9 = vld [vmem:[#allocation25_spill] sm:$0xff]  ;;  %v603_v25 = vsel %vm426_vm2, %v3723_v28, %v3720_v48  ;;  %v3724_v21 = vld [vmem:[#allocation27_spill] sm:$0xff] }
 0x1f2   :  { %v542_v47 = vsel %vm149_vm0, %v3721_v9, %v3715_v38 }
 0x1f3   :  { %v640_v13 = vadd.f32 %v3716_v7, %v588_v23  ;;  %v639_v14 = vadd.f32 %v3717_v33, %v587_v58  ;;  %v495_v11 = vadd.f32 %v3718_v3, %v452_v10  ;;  %v3725_v58 = vld [vmem:[#allocation26_spill] sm:$0xff] }
 0x1f5   :  { %v683_v52 = vadd.f32 %v679_v61, %v640_v13  ;;  %v682_v4 = vadd.f32 %v3008_v1, %v639_v14  ;;  %v547_v50 = vadd.f32 %v543_v40, %v495_v11  ;;  %v3147_v1 = vsel %vm95_vm7, 1.0, %v3706_v60  ;;  %v3726_v61 = vld [vmem:[#allocation19_spill] sm:$0xff]  ;;  %v3727_v14 = vld [vmem:[#allocation18_spill] sm:$0xff] }
 0x1f6   :  { %v734_v6 = vpop.permute.xlu0 %733 }
 0x1f7   :  { %v3058_v27 = vpop.permute.xlu2 %753  ;;  %v739_v16 = vsel %vm426_vm2, %v734_v6, %v736_v54  ;;  %v744_v22 = vadd.f32 %v740_v37, %v683_v52  ;;  %v494_v54 = vadd.f32 %v3722_v63, %v451_v17  ;;  %v608_v6 = vadd.f32 %v604_v12, %v547_v50  ;;  %v3728_v50 = vld [vmem:[#allocation30_spill] sm:$0xff] }
 0x1f8   :  { %v3062_v34 = vpop.permute.xlu1 %755  ;;  %v743_v24 = vadd.f32 %v739_v16, %v682_v4 }
 0x1f9   :  { %v546_v29 = vadd.f32 %v542_v47, %v494_v54  ;;  %v796_v23 = vadd.f32 %v3724_v21, %v744_v22  ;;  %v651_v17 = vadd.f32 %v3726_v61, %v608_v6  ;;  %v3729_v47 = vld [vmem:[#allocation29_spill] sm:$0xff] }
 0x1fa   :  { %v795_v10 = vadd.f32 %v3725_v58, %v743_v24  ;;  %v1246_v58 = vstv %s3184_s21  ;;  %s2433_s21 = sld [smem:[#allocation7 + $0x29]] }
 0x1fb   :  { %v607_v30 = vadd.f32 %v603_v25, %v546_v29  ;;  %v703_v38 = vadd.f32 %v3030_v59, %v651_v17 }
 0x1fd   :  { %v650_v3 = vadd.f32 %v3727_v14, %v607_v30  ;;  %v3731_v30 = vld [vmem:[#allocation33_spill] sm:$0xff] }
 0x1ff   :  { %v3060_v55 = vpop.permute.xlu2 %777  ;;  %v702_v48 = vadd.f32 %v3036_v31, %v650_v3 }
 0x201   :  { %v3068_v5 = vpop.permute.xlu1 %775 }
 0x202   :  { %v780_v4 = vsel %vm426_vm2, %v3068_v5, %v3060_v55 }
 0x207   :  { %v3064_v45 = vpop.permute.xlu2 %773 }
 0x208   :  { %v779_v9 = vsel %vm426_vm2, %v3064_v45, %v3068_v5 }
 0x21a   :  { %v3078_v49 = vpop.permute.xlu2 %850 }
 0x228   :  { %v3066_v35 = vpop.permute.xlu0 %830  ;;  %v833_v62 = vpop.permute.xlu1 %832 }
 0x229   :  { %v835_v44 = vsel %vm149_vm0, %v3066_v35, %v833_v62  ;;  %v760_v62 = vsel %vm426_vm2, %v3062_v34, %v3056_v36 }
 0x22a   :  { %v764_v11 = vadd.f32 %v760_v62, %v703_v38 }
 0x22b   :  { %v1110_v42 = vpop.permute.xlu2 %1109 }
 0x230   :  { %v829_v32 = vpop.permute.xlu0 %828 }
 0x231   :  { %v834_v56 = vsel %vm149_vm0, %v829_v32, %v3066_v35  ;;  %v839_v35 = vadd.f32 %v835_v44, %v796_v23 }
 0x232   :  { %v838_v32 = vadd.f32 %v834_v56, %v795_v10  ;;  %v1236_v10 = vstv %s3187_s22  ;;  %s2428_s22 = sld [smem:[#allocation7 + $0x3e]] }
 0x234   :  { %v1132_v43 = vpop.permute.xlu2 %1131 }
 0x238   :  { %v3104_v2 = vpop.permute.xlu0 %852 }
 0x239   :  { %v855_v59 = vsel %vm149_vm0, %v3078_v49, %v3104_v2  ;;  %v784_v2 = vadd.f32 %v780_v4, %v3049_v19  ;;  %v1225_v4 = vstv %s2371_s28  ;;  %s2445_s28 = sld [smem:[#allocation7 + $0x35]] }
 0x23a   :  { %v3116_v15 = vpop.permute.xlu1 %872 }
 0x23d   :  { %v1149_v40 = vpop.permute.xlu2 %1148 }
 0x240   :  { %v3129_v18 = vpop.permute.xlu0 %848 }
 0x241   :  { %v854_v55 = vsel %vm149_vm0, %v3129_v18, %v3078_v49  ;;  %v3730_v49 = vld [vmem:[#allocation34_spill] sm:$0xff] }
 0x242   :  { %v818_v18 = vadd.f32 %v3730_v49, %v784_v2  ;;  %v1384_v2 = vstv %s2390_s30  ;;  %s2443_s30 = sld [smem:[#allocation7 + $0x4d]] }
 0x243   :  { %v1108_v51 = vpop.permute.xlu1 %1107 }
 0x244   :  { %v1114_v57 = vsel %vm1113_vm6, %v1108_v51, %v1110_v42 }
 0x245   :  { %v1118_v53 = vmul.f32 %v3147_v1, %v1114_v57  ;;  %v1147_v54 = vpop.permute.xlu2 %1146  ;;  %v783_v57 = vadd.f32 %v779_v9, %v3054_v20  ;;  %v1205_v20 = vstv %s3189_s23  ;;  %s2425_s23 = sld [smem:[#allocation7 + $0x3b]] }
 0x246   :  { %v1152_v5 = vsel %vm1113_vm6, %v1147_v54, %v1149_v40  ;;  %v1363_v54 = vstv %s2388_s3  ;;  %s2375_s3 = sld [smem:[#allocation7 + $0x9]] }
 0x247   :  { %v1120_v7 = vadd.f32 %v1118_v53, %v838_v32  ;;  %v817_v61 = vadd.f32 %v3731_v30, %v783_v57  ;;  %v1993_v30 = vstv %s2427_s19  ;;  %s3313_s19 = sld [smem:[#allocation7 + $0x1]] }
 0x248   :  { %v1112_v39 = vpop.permute.xlu0 %1111 }
 0x249   :  { %v1115_v8 = vsel %vm1113_vm6, %v1110_v42, %v1112_v39  ;;  %v759_v42 = vsel %vm426_vm2, %v3058_v27, %v3062_v34  ;;  %v1160_v12 = vmax.f32 %v1120_v7, 0.0  ;;  %v807_v27 = vadd.f32 %v3728_v50, %v764_v11 }
 0x24a   :  { %v1119_v60 = vmul.f32 %v3158_v26, %v1115_v8  ;;  %v763_v52 = vadd.f32 %v759_v42, %v702_v48  ;;  %v1156_v39 = vmul.f32 %v3147_v1, %v1152_v5  ;;  %v1256_v11 = vstv %s2374_s24  ;;  %s2436_s24 = sld [smem:[#allocation7 + $0x2c]] }
 0x24b   :  { %v1310_v48 = vstv %s2381_s26  ;;  %v1373_v5 = vstv %s2389_s11  ;;  %s2437_s26 = sld [smem:[#allocation7 + $0x47]] }
 0x24c   :  { %v1121_v13 = vadd.f32 %v1119_v60, %v839_v35  ;;  %v1130_v33 = vpop.permute.xlu1 %1129  ;;  %v806_v22 = vadd.f32 %v3729_v47, %v763_v52  ;;  %v1279_v52 = vstv %s2378_s27  ;;  %v1320_v47 = vstv %s2382_s7  ;;  %s2434_s27 = sld [smem:[#allocation7 + $0x44]] }
 0x24d   :  { %v1134_v36 = vsel %vm1113_vm6, %v1130_v33, %v1132_v43  ;;  %v859_v43 = vadd.f32 %v855_v59, %v807_v27  ;;  %v1289_v27 = vstv %s2379_s29  ;;  %s2441_s29 = sld [smem:[#allocation7 + $0x17]] }
 0x24e   :  { %v1161_v41 = vmax.f32 %v1121_v13, 0.0  ;;  %v1138_v34 = vmul.f32 %v3158_v26, %v1134_v36  ;;  %v858_v19 = vadd.f32 %v854_v55, %v806_v22  ;;  %s2442_s7 = sld [smem:[#allocation7 + $0x32]] }
 0x24f   :  { %s2377_s11 = sld [smem:[#allocation7 + $0x3f]] }
 0x250   :  { %v1164_v37 = vrot.slane %v1161_v41, 6  ;;  %v871_v16 = vpop.permute.xlu0 %870  ;;  %v1140_v24 = vadd.f32 %v1138_v34, %v859_v43  ;;  %v1215_v41 = vstv %s2370_s25  ;;  %s2444_s25 = sld [smem:[#allocation7 + $0x1a]] }
 0x251   :  { %v875_v28 = vsel %vm149_vm0, %v871_v16, %v3116_v15 }
 0x252   :  { %v1166_v31 = vsel %vm1165_vm9, %v1160_v12, %v1164_v37  ;;  %v1170_v25 = vmax.f32 %v1140_v24, 0.0  ;;  %v879_v21 = vadd.f32 %v875_v28, %v818_v18  ;;  %v1404_v18 = vstv %s2392_s9  ;;  %s2384_s9 = sld [smem:[#allocation7 + $0x12]] }
 0x253   :  { %1168 = vst [vmem:[#allocation2 + $0x2] sm:$0xf] %v1166_v31  ;;  %v1330_v28 = vstv %s2383_s10  ;;  %s2368_s10 = sld [smem:[#allocation7 + $0x36]] }
 0x254   :  { %v1128_v51 = vpop.permute.xlu1 %1127  ;;  %v1173_v17 = vrot.slane %v1170_v25, 6 }
 0x255   :  { %v1133_v63 = vsel %vm1113_vm6, %v1128_v51, %v1130_v33  ;;  %v1353_v51 = vstv %s2387_s6  ;;  %s2446_s6 = sld [smem:[#allocation7 + $0x50]] }
 0x256   :  { %v1137_v6 = vmul.f32 %v3147_v1, %v1133_v63  ;;  %v1394_v63 = vstv %s2391_s1  ;;  %s1192_s1 = sld [smem:[#allocation7]] }
 0x258   :  { %v1151_v45 = vpop.permute.xlu0 %1150  ;;  %v1139_v29 = vadd.f32 %v1137_v6, %v858_v19  ;;  %v1299_v19 = vstv %s2380_s4  ;;  %s2367_s4 = sld [smem:[#allocation7 + $0x1b]] }
 0x259   :  { %v1153_v44 = vsel %vm1113_vm6, %v1149_v40, %v1151_v45 }
 0x25a   :  { %v1157_v56 = vmul.f32 %v3158_v26, %v1153_v44  ;;  %v1234_v23 = vld [vmem:[#allocation2 + $0x2] sm:$0x3f]  ;;  %v1169_v8 = vmax.f32 %v1139_v29, 0.0 }
 0x25b   :  { %v3210_v53 = vld [vmem:[#allocation2] sm:$0x3f]  ;;  %v1247_v60 = vmul.f32 %v1246_v58, %v1234_v23  ;;  %v1237_v38 = vmul.f32 %v1236_v10, %v1234_v23  ;;  %v1257_v36 = vmul.f32 %v1256_v11, %v1234_v23  ;;  %v2027_v23 = vstv %s2432_s14  ;;  %s2386_s14 = sld [smem:[#allocation7 + $0x48]] }
 0x25c   :  { %v869_v15 = vpop.permute.xlu1 %868  ;;  %v1159_v35 = vadd.f32 %v1157_v56, %v879_v21  ;;  %v1206_v40 = vmul.f32 %v1205_v20, %v3210_v53  ;;  %v1174_v7 = vsel %vm1165_vm9, %v1169_v8, %v1173_v17  ;;  %v1216_v59 = vmul.f32 %v1215_v41, %v3210_v53  ;;  %v1951_v44 = vld [vmem:[#allocation2 + $0x2] sm:$0x3f] }
 0x25d   :  { %v874_v62 = vsel %vm149_vm0, %v869_v15, %v871_v16  ;;  %1176 = vst [vmem:[#allocation2 + $0xa] sm:$0xf] %v1174_v7  ;;  %1249 = vrot.lane.b32.xlu2 %v1247_v60, %s2521_s18  ;;  %1239 = vrot.lane.b32.xlu1 %v1237_v38, %s2521_s18  ;;  %v1226_v34 = vmul.f32 %v1225_v4, %v3210_v53  ;;  %v1983_v56 = vstv %s2426_s12  ;;  %v1953_v10 = vstv %s2423_s15  ;;  %s2385_s12 = sld [smem:[#allocation7 + $0x2d]] }
 0x25e   :  { %v878_v32 = vadd.f32 %v874_v62, %v817_v61  ;;  %v1178_v13 = vmax.f32 %v1159_v35, 0.0  ;;  %1208 = vrot.lane.b32.xlu0 %v1206_v40, %s2520_s13  ;;  %v1984_v58 = vmul.f32 %v1983_v56, %v1951_v44  ;;  %v2057_v15 = vstv %s2435_s17  ;;  %s2420_s15 = sld [smem:[#allocation7 + $0x2]] }
 0x25f   :  { %v1963_v17 = vstv %s2424_s20  ;;  %v1994_v8 = vmul.f32 %v1993_v30, %v1951_v44  ;;  %v2037_v35 = vstv %s2433_s21  ;;  %v1973_v38 = vstv %s2425_s23  ;;  %s3310_s17 = sld [smem:[#allocation7 + $0xb]] }
 0x260   :  { %v1158_v33 = vadd.f32 %v1156_v39, %v878_v32  ;;  %v1181_v14 = vrot.slane %v1178_v13, 6  ;;  %v1954_v39 = vmul.f32 %v1953_v10, %v1951_v44  ;;  %v1964_v62 = vmul.f32 %v1963_v17, %v1951_v44  ;;  %s3320_s20 = sld [smem:[#allocation7 + $0x1d]] }
 0x261   :  { %v2003_v32 = vstv %s2428_s22  ;;  %v1974_v7 = vmul.f32 %v1973_v38, %v1951_v44  ;;  %v2067_v13 = vstv %s2436_s24  ;;  %v2077_v11 = vstv %s2437_s26  ;;  %s3332_s21 = sld [smem:[#allocation7 + $0x26]] }
 0x262   :  { %v1177_v3 = vmax.f32 %v1158_v33, 0.0  ;;  %v2004_v40 = vmul.f32 %v2003_v32, %v1951_v44  ;;  %v2121_v4 = vstv %s2443_s30  ;;  %s3339_s22 = sld [smem:[#allocation7 + $0x1c]] }
 0x263   :  { %s3344_s23 = sld [smem:[#allocation7 + $0x38]] }
 0x264   :  { %v1182_v42 = vsel %vm1165_vm9, %v1177_v3, %v1181_v14  ;;  %v1308_v12 = vld [vmem:[#allocation2 + $0xa] sm:$0x3f]  ;;  %v2131_v14 = vstv %s2444_s25  ;;  %s3356_s24 = sld [smem:[#allocation7 + $0x41]] }
 0x265   :  { %1184 = vst [vmem:[#allocation2 + $0x12] sm:$0xf] %v1182_v42  ;;  %1259 = vrot.lane.b32.xlu2 %v1257_v36, %s2521_s18  ;;  %v1311_v37 = vmul.f32 %v1310_v48, %v1308_v12  ;;  %v3225_v16 = vld [vmem:[#allocation2 + $0x8] sm:$0x3f]  ;;  %v1321_v24 = vmul.f32 %v1320_v47, %v1308_v12  ;;  %v1331_v25 = vmul.f32 %v1330_v28, %v1308_v12  ;;  %v2047_v36 = vstv %s2434_s27  ;;  %s2396_s25 = sld [smem:[#allocation7 + $0x4]] }
 0x266   :  { %1218 = vrot.lane.b32.xlu0 %v1216_v59, %s2520_s13  ;;  %v1280_v50 = vmul.f32 %v1279_v52, %v3225_v16  ;;  %v1290_v31 = vmul.f32 %v1289_v27, %v3225_v16  ;;  %v1300_v49 = vmul.f32 %v1299_v19, %v3225_v16  ;;  %v2025_v21 = vld [vmem:[#allocation2 + $0xa] sm:$0x3f]  ;;  %v2141_v48 = vstv %s2445_s28  ;;  %s2397_s26 = sld [smem:[#allocation7 + $0x1f]] }
 0x267   :  { %1313 = vrot.lane.b32.xlu1 %v1311_v37, %s2521_s18  ;;  %v2028_v20 = vmul.f32 %v2027_v23, %v2025_v21  ;;  %v2058_v61 = vmul.f32 %v2057_v15, %v2025_v21  ;;  %v2038_v60 = vmul.f32 %v2037_v35, %v2025_v21  ;;  %v2068_v3 = vmul.f32 %v2067_v13, %v2025_v21  ;;  %s2398_s27 = sld [smem:[#allocation7 + $0x3a]] }
 0x268   :  { %v2078_v41 = vmul.f32 %v2077_v11, %v2025_v21  ;;  %v2048_v59 = vmul.f32 %v2047_v36, %v2025_v21  ;;  %v2101_v12 = vstv %s2441_s29  ;;  %s2399_s28 = sld [smem:[#allocation7 + $0x7]] }
 0x269   :  { %s2400_s29 = sld [smem:[#allocation7 + $0x22]] }
 0x26a   :  { %s2401_s30 = sld [smem:[#allocation7 + $0x3d]] }
 0x26c   :  { %v1382_v43 = vld [vmem:[#allocation2 + $0x12] sm:$0x3f] }
 0x26d   :  { %1282 = vrot.lane.b32.xlu2 %v1280_v50, %s2520_s13  ;;  %v3234_v55 = vld [vmem:[#allocation2 + $0x10] sm:$0x3f]  ;;  %v1385_v9 = vmul.f32 %v1384_v2, %v1382_v43  ;;  %v1395_v6 = vmul.f32 %v1394_v63, %v1382_v43  ;;  %v1405_v45 = vmul.f32 %v1404_v18, %v1382_v43  ;;  %v2151_v50 = vstv %s2446_s6  ;;  %s2402_s6 = sld [smem:[#allocation7 + $0xa]] }
 0x26e   :  { %1228 = vrot.lane.b32.xlu0 %v1226_v34, %s2520_s13  ;;  %v1354_v22 = vmul.f32 %v1353_v51, %v3234_v55  ;;  %v1364_v57 = vmul.f32 %v1363_v54, %v3234_v55  ;;  %v1374_v29 = vmul.f32 %v1373_v5, %v3234_v55  ;;  %v2099_v33 = vld [vmem:[#allocation2 + $0x12] sm:$0x3f]  ;;  %v2111_v34 = vstv %s2442_s7  ;;  %s2403_s7 = sld [smem:[#allocation7 + $0x25]] }
 0x26f   :  { %1292 = vrot.lane.b32.xlu1 %v1290_v31, %s2520_s13  ;;  %v2132_v42 = vmul.f32 %v2131_v14, %v2099_v33  ;;  %v2142_v37 = vmul.f32 %v2141_v48, %v2099_v33  ;;  %v2102_v52 = vmul.f32 %v2101_v12, %v2099_v33  ;;  %v2122_v27 = vmul.f32 %v2121_v4, %v2099_v33 }
 0x270   :  { %v2152_v31 = vmul.f32 %v2151_v50, %v2099_v33  ;;  %v2112_v43 = vmul.f32 %v2111_v34, %v2099_v33  ;;  %v1275_v12 = vstv %s2377_s11  ;;  %s2365_s11 = sld [smem:[#allocation8 + $0x1]] }
 0x275   :  { %1387 = vrot.lane.b32.xlu2 %v1385_v9, %s2521_s18 }
 0x276   :  { %1356 = vrot.lane.b32.xlu0 %v1354_v22, %s2520_s13 }
 0x277   :  { %1323 = vrot.lane.b32.xlu1 %v1321_v24, %s2521_s18  ;;  %v1193_v24 = vstv %s1192_s1  ;;  %s2404_s1 = sld [smem:[#allocation7 + $0x40]] }
 0x278   :  { %v1194_v19 = vmul.f32 %v1193_v24, %v3210_v53 }
 0x27d   :  { %1397 = vrot.lane.b32.xlu2 %v1395_v6, %s2521_s18 }
 0x27e   :  { %1366 = vrot.lane.b32.xlu0 %v1364_v57, %s2520_s13 }
 0x27f   :  { %1302 = vrot.lane.b32.xlu1 %v1300_v49, %s2520_s13  ;;  %v1267_v49 = vstv %s2375_s3  ;;  %s2405_s3 = sld [smem:[#allocation7 + $0xd]] }
 0x285   :  { %1407 = vrot.lane.b32.xlu2 %v1405_v45, %s2521_s18 }
 0x286   :  { %1333 = vrot.lane.b32.xlu0 %v1331_v25, %s2521_s18  ;;  %v1268_v25 = vmul.f32 %v1267_v49, %v3225_v16 }
 0x287   :  { %1376 = vrot.lane.b32.xlu1 %v1374_v29, %s2520_s13  ;;  %v1197_v29 = vstv %s2367_s4  ;;  %s2406_s4 = sld [smem:[#allocation7 + $0x28]] }
 0x28d   :  { %1986 = vrot.lane.b32.xlu2 %v1984_v58, %s2521_s18 }
 0x28e   :  { %2030 = vrot.lane.b32.xlu0 %v2028_v20, %s2520_s13  ;;  %v1198_v20 = vmul.f32 %v1197_v29, %v3210_v53 }
 0x28f   :  { %1956 = vrot.lane.b32.xlu1 %v1954_v39, %s2520_s13 }
 0x295   :  { %2060 = vrot.lane.b32.xlu2 %v2058_v61, %s2521_s18 }
 0x296   :  { %1996 = vrot.lane.b32.xlu0 %v1994_v8, %s2521_s18 }
 0x297   :  { %1966 = vrot.lane.b32.xlu1 %v1964_v62, %s2520_s13  ;;  %v1341_v62 = vstv %s2384_s9  ;;  %s1185_s9 = sld [smem:[#allocation8]] }
 0x298   :  { %v1342_v13 = vmul.f32 %v1341_v62, %v3234_v55 }
 0x29d   :  { %2040 = vrot.lane.b32.xlu2 %v2038_v60, %s2520_s13 }
 0x29e   :  { %2006 = vrot.lane.b32.xlu0 %v2004_v40, %s2521_s18 }
 0x29f   :  { %1976 = vrot.lane.b32.xlu1 %v1974_v7, %s2520_s13  ;;  %v1201_v7 = vstv %s2368_s10  ;;  %s2408_s10 = sld [smem:[#allocation7 + $0x10]] }
 0x2a5   :  { %2070 = vrot.lane.b32.xlu2 %v2068_v3, %s2521_s18 }
 0x2a6   :  { %2134 = vrot.lane.b32.xlu0 %v2132_v42, %s2521_s18 }
 0x2a7   :  { %2080 = vrot.lane.b32.xlu1 %v2078_v41, %s2521_s18  ;;  %v1202_v41 = vmul.f32 %v1201_v7, %v3210_v53 }
 0x2ad   :  { %2050 = vrot.lane.b32.xlu2 %v2048_v59, %s2520_s13 }
 0x2ae   :  { %2144 = vrot.lane.b32.xlu0 %v2142_v37, %s2521_s18 }
 0x2af   :  { %2104 = vrot.lane.b32.xlu1 %v2102_v52, %s2520_s13 }
 0x2b5   :  { %2124 = vrot.lane.b32.xlu2 %v2122_v27, %s2520_s13  ;;  %v1276_v27 = vmul.f32 %v1275_v12, %v3225_v16 }
 0x2b6   :  { %2154 = vrot.lane.b32.xlu0 %v2152_v31, %s2521_s18  ;;  %s2376_s18 = sld [smem:[#allocation7 + $0x24]] }
 0x2b7   :  { %v1250_v2 = vpop.permute.xlu2 %1249  ;;  %2114 = vrot.lane.b32.xlu1 %v2112_v43, %s2520_s13 }
 0x2b8   :  { %v1251_v21 = vrot.slane %v1250_v2, 6 }
 0x2ba   :  { %v1252_v35 = vsel %vm181_vm1, %v1251_v21, %v1250_v2 }
 0x2bc   :  { %v1271_v61 = vstv %s2376_s18  ;;  %s2407_s18 = sld [smem:[#allocation7 + $0x43]] }
 0x2bd   :  { %v1272_v38 = vmul.f32 %v1271_v61, %v3225_v16 }
 0x2bf   :  { %v1260_v51 = vpop.permute.xlu2 %1259 }
 0x2c0   :  { %v1261_v3 = vrot.slane %v1260_v51, 6 }
 0x2c2   :  { %v1262_v52 = vsel %vm181_vm1, %v1261_v3, %v1260_v51 }
 0x2c7   :  { %v1283_v9 = vpop.permute.xlu2 %1282 }
 0x2c8   :  { %v1284_v45 = vrot.slane %v1283_v9, 2 }
 0x2ca   :  { %v1285_v10 = vsel %vm149_vm0, %v1283_v9, %v1284_v45 }
 0x2cf   :  { %v3267_v47 = vpop.permute.xlu2 %1387  ;;  %v1240_v22 = vpop.permute.xlu1 %1239 }
 0x2d0   :  { %v1209_v63 = vpop.permute.xlu0 %1208  ;;  %v1241_v54 = vrot.slane %v1240_v22, 6  ;;  %v1389_v43 = vrot.slane %v3267_v47, 6 }
 0x2d1   :  { %v1210_v6 = vrot.slane %v1209_v63, 2 }
 0x2d2   :  { %v1242_v28 = vsel %vm181_vm1, %v1241_v54, %v1240_v22  ;;  %v1345_v54 = vstv %s2385_s12  ;;  %v1390_v51 = vsel %vm181_vm1, %v1389_v43, %v3267_v47  ;;  %v1472_v43 = vstv %s3313_s19  ;;  %s2409_s12 = sld [smem:[#allocation7 + $0x2b]] }
 0x2d3   :  { %v1211_v57 = vsel %vm149_vm0, %v1209_v63, %v1210_v6  ;;  %s2412_s19 = sld [smem:[#allocation7 + $0x2e]] }
 0x2d4   :  { %v1213_v18 = vadd.f32 %v1211_v57, %v1194_v19 }
 0x2d6   :  { %v1244_v5 = vadd.f32 %v1242_v28, %v1213_v18  ;;  %v1346_v18 = vmul.f32 %v1345_v54, %v3234_v55 }
 0x2d7   :  { %v3273_v23 = vpop.permute.xlu2 %1397 }
 0x2d8   :  { %v1269_v44 = vadd.f32 %v1268_v25, %v1244_v5  ;;  %v1219_v56 = vpop.permute.xlu0 %1218  ;;  %v1399_v45 = vrot.slane %v3273_v23, 6 }
 0x2d9   :  { %v1220_v58 = vrot.slane %v1219_v56, 2  ;;  %v1314_v39 = vpop.permute.xlu1 %1313 }
 0x2da   :  { %v1287_v15 = vadd.f32 %v1285_v10, %v1269_v44  ;;  %v1315_v17 = vrot.slane %v1314_v39, 6  ;;  %v1400_v21 = vsel %vm181_vm1, %v1399_v45, %v3273_v23 }
 0x2db   :  { %v1221_v30 = vsel %vm149_vm0, %v1219_v56, %v1220_v58 }
 0x2dc   :  { %v1223_v8 = vadd.f32 %v1221_v30, %v1198_v20  ;;  %v1316_v32 = vsel %vm181_vm1, %v1315_v17, %v1314_v39  ;;  %v1349_v17 = vstv %s2386_s14  ;;  %s2366_s14 = sld [smem:[#allocation8 + $0x2]] }
 0x2dd   :  { %v1318_v40 = vadd.f32 %v1316_v32, %v1287_v15 }
 0x2de   :  { %v1254_v60 = vadd.f32 %v1252_v35, %v1223_v8 }
 0x2df   :  { %v1343_v42 = vadd.f32 %v1342_v13, %v1318_v40  ;;  %v3283_v36 = vpop.permute.xlu2 %1407 }
 0x2e0   :  { %v1273_v33 = vadd.f32 %v1272_v38, %v1254_v60  ;;  %v1229_v14 = vpop.permute.xlu0 %1228  ;;  %v1350_v60 = vmul.f32 %v1349_v17, %v3234_v55  ;;  %v1409_v40 = vrot.slane %v3283_v36, 6 }
 0x2e1   :  { %v1230_v11 = vrot.slane %v1229_v14, 2  ;;  %v1293_v48 = vpop.permute.xlu1 %1292 }
 0x2e2   :  { %v1294_v4 = vrot.slane %v1293_v48, 2 }
 0x2e3   :  { %v1231_v59 = vsel %vm149_vm0, %v1229_v14, %v1230_v11  ;;  %v1410_v11 = vsel %vm181_vm1, %v1409_v40, %v3283_v36 }
 0x2e4   :  { %v1233_v37 = vadd.f32 %v1231_v59, %v1202_v41  ;;  %v1295_v53 = vsel %vm149_vm0, %v1293_v48, %v1294_v4  ;;  %v3322_v48 = vld [vmem:[#allocation2] sm:$0x3f]  ;;  %v1940_v59 = vstv %s2420_s15  ;;  %s2410_s15 = sld [smem:[#allocation7 + $0x46]] }
 0x2e5   :  { %v1297_v6 = vadd.f32 %v1295_v53, %v1273_v33  ;;  %v1941_v4 = vmul.f32 %v1940_v59, %v3322_v48  ;;  %v2022_v59 = vstv %s3356_s24  ;;  %s2418_s24 = sld [smem:[#allocation7 + $0x34]] }
 0x2e6   :  { %v1264_v50 = vadd.f32 %v1262_v52, %v1233_v37 }
 0x2e7   :  { %v3293_v19 = vpop.permute.xlu2 %1986 }
 0x2e8   :  { %v1357_v34 = vpop.permute.xlu0 %1356  ;;  %v1277_v31 = vadd.f32 %v1276_v27, %v1264_v50  ;;  %v1988_v36 = vrot.slane %v3293_v19, 6  ;;  %v3329_v27 = vld [vmem:[#allocation2 + $0x8] sm:$0x3f] }
 0x2e9   :  { %v1358_v2 = vrot.slane %v1357_v34, 2  ;;  %v1324_v9 = vpop.permute.xlu1 %1323 }
 0x2ea   :  { %v1325_v24 = vrot.slane %v1324_v9, 6  ;;  %v1989_v53 = vsel %vm181_vm1, %v1988_v36, %v3293_v19  ;;  %v2023_v36 = vmul.f32 %v2022_v59, %v3329_v27 }
 0x2eb   :  { %v1359_v22 = vsel %vm149_vm0, %v1357_v34, %v1358_v2  ;;  %v2014_v34 = vstv %s3310_s17  ;;  %v3335_v2 = vld [vmem:[#allocation2] sm:$0x3f]  ;;  %s2411_s17 = sld [smem:[#allocation7 + $0x13]] }
 0x2ec   :  { %v1361_v63 = vadd.f32 %v1359_v22, %v1343_v42  ;;  %v1326_v16 = vsel %vm181_vm1, %v1325_v24, %v1324_v9 }
 0x2ed   :  { %v1328_v49 = vadd.f32 %v1326_v16, %v1297_v6  ;;  %v1473_v6 = vmul.f32 %v1472_v43, %v3335_v2 }
 0x2ee   :  { %v1392_v57 = vadd.f32 %v1390_v51, %v1361_v63  ;;  %v2015_v63 = vmul.f32 %v2014_v34, %v3329_v27  ;;  %v1944_v51 = vstv %s3320_s20  ;;  %s2413_s20 = sld [smem:[#allocation7 + $0x49]] }
 0x2ef   :  { %v1347_v5 = vadd.f32 %v1346_v18, %v1328_v49  ;;  %v3301_v10 = vpop.permute.xlu2 %2060 }
 0x2f0   :  { %1414 = vst [vmem:[#allocation1] ss:$4 sm:$0xff] %v1392_v57  ;;  %v1367_v28 = vpop.permute.xlu0 %1366  ;;  %v2062_v54 = vrot.slane %v3301_v10, 6 }
 0x2f1   :  { %v1368_v25 = vrot.slane %v1367_v28, 2  ;;  %v1303_v29 = vpop.permute.xlu1 %1302 }
 0x2f2   :  { %v1304_v47 = vrot.slane %v1303_v29, 2 }
 0x2f3   :  { %v1369_v44 = vsel %vm149_vm0, %v1367_v28, %v1368_v25 }
 0x2f4   :  { %v1371_v56 = vadd.f32 %v1369_v44, %v1347_v5  ;;  %v1305_v20 = vsel %vm149_vm0, %v1303_v29, %v1304_v47  ;;  %v1945_v44 = vmul.f32 %v1944_v51, %v3322_v48  ;;  %v2063_v47 = vsel %vm181_vm1, %v2062_v54, %v3301_v10 }
 0x2f5   :  { %v1307_v62 = vadd.f32 %v1305_v20, %v1277_v31  ;;  %v1533_v51 = vstv %s2396_s25  ;;  %s2438_s25 = sld [smem:[#allocation7 + $0x14]] }
 0x2f6   :  { %v1402_v58 = vadd.f32 %v1400_v21, %v1371_v56  ;;  %v2018_v21 = vstv %s3332_s21  ;;  %s2414_s21 = sld [smem:[#allocation7 + $0x16]] }
 0x2f7   :  { %v1417_v39 = vld.sshfl [vmem:[#allocation1 + $0x10] sm:$0xff pattern:$0x73625140]  ;;  %v1416_v15 = vld.sshfl [vmem:[#allocation1 + $0x8] sm:$0xff pattern:$0x73625140]  ;;  %v3317_v42 = vpop.permute.xlu2 %2040 }
 0x2f8   :  { %v1334_v30 = vpop.permute.xlu0 %1333  ;;  %1422 = vrot.lane.b32.xlu2 %v1417_v39, %s2522_s2  ;;  %1420 = vrot.lane.b32.xlu1 %v1416_v15, %s2522_s2  ;;  %v1415_v61 = vld.sshfl [vmem:[#allocation1] sm:$0xff pattern:$0x73625140]  ;;  %v2042_v39 = vrot.slane %v3317_v42, 6 }
 0x2f9   :  { %v1335_v8 = vrot.slane %v1334_v30, 6  ;;  %1418 = vrot.lane.b32.xlu0 %v1415_v61, %s2522_s2  ;;  %1433 = vst [vmem:[#allocation1] ss:$4 sm:$0xff] %v1402_v58  ;;  %v1377_v23 = vpop.permute.xlu1 %1376  ;;  %v2019_v61 = vmul.f32 %v2018_v21, %v3329_v27 }
 0x2fa   :  { %v1378_v32 = vrot.slane %v1377_v23, 2 }
 0x2fb   :  { %v1336_v35 = vsel %vm181_vm1, %v1335_v8, %v1334_v30  ;;  %v1492_v30 = vstv %s3339_s22  ;;  %s2415_s22 = sld [smem:[#allocation7 + $0x31]] }
 0x2fc   :  { %v1338_v38 = vadd.f32 %v1336_v35, %v1307_v62  ;;  %v1379_v13 = vsel %vm149_vm0, %v1377_v23, %v1378_v32  ;;  %v1948_v62 = vstv %s3344_s23  ;;  %v1493_v32 = vmul.f32 %v1492_v30, %v3335_v2  ;;  %s2416_s23 = sld [smem:[#allocation7 + $0x4c]] }
 0x2fe   :  { %v1351_v7 = vadd.f32 %v1350_v60, %v1338_v38  ;;  %v2043_v60 = vsel %vm149_vm0, %v2042_v39, %v3317_v42 }
 0x2ff   :  { %v2071_v16 = vpop.permute.xlu2 %2070 }
 0x300   :  { %v1381_v33 = vadd.f32 %v1379_v13, %v1351_v7  ;;  %v2031_v14 = vpop.permute.xlu0 %2030  ;;  %v1436_v3 = vld.sshfl [vmem:[#allocation1 + $0x10] sm:$0xff pattern:$0x73625140]  ;;  %v1435_v55 = vld.sshfl [vmem:[#allocation1 + $0x8] sm:$0xff pattern:$0x73625140] }
 0x301   :  { %1441 = vrot.lane.b32.xlu2 %v1436_v3, %s2522_s2  ;;  %1439 = vrot.lane.b32.xlu1 %v1435_v55, %s2522_s2  ;;  %v1434_v12 = vld.sshfl [vmem:[#allocation1] sm:$0xff pattern:$0x73625140]  ;;  %v1957_v37 = vpop.permute.xlu1 %1956  ;;  %v2032_v9 = vrot.slane %v2031_v14, 6  ;;  %v2072_v10 = vrot.slane %v2071_v16, 6 }
 0x302   :  { %v1412_v41 = vadd.f32 %v1410_v11, %v1381_v33  ;;  %1437 = vrot.lane.b32.xlu0 %v1434_v12, %s2522_s2  ;;  %v1958_v52 = vrot.slane %v1957_v37, 6 }
 0x303   :  { %v2033_v28 = vsel %vm149_vm0, %v2032_v9, %v2031_v14  ;;  %v1949_v14 = vmul.f32 %v1948_v62, %v3322_v48  ;;  %v2073_v55 = vsel %vm181_vm1, %v2072_v10, %v2071_v16  ;;  %v1607_v10 = vstv %s2401_s30 }
 0x304   :  { %1452 = vst [vmem:[#allocation1] ss:$4 sm:$0xff] %v1412_v41  ;;  %v1959_v50 = vsel %vm149_vm0, %v1958_v52, %v1957_v37 }
 0x305   :  { %v1961_v31 = vadd.f32 %v1959_v50, %v1941_v4 }
 0x307   :  { %v1991_v24 = vadd.f32 %v1989_v53, %v1961_v31  ;;  %v2051_v13 = vpop.permute.xlu2 %2050 }
 0x308   :  { %v1997_v22 = vpop.permute.xlu0 %1996  ;;  %v2052_v37 = vrot.slane %v2051_v13, 6 }
 0x309   :  { %v2016_v57 = vadd.f32 %v2015_v63, %v1991_v24  ;;  %v1967_v49 = vpop.permute.xlu1 %1966  ;;  %v1998_v5 = vrot.slane %v1997_v22, 6 }
 0x30a   :  { %v1968_v45 = vrot.slane %v1967_v49, 6  ;;  %v2053_v31 = vsel %vm149_vm0, %v2052_v37, %v2051_v13 }
 0x30b   :  { %v1455_v18 = vld.sshfl [vmem:[#allocation1 + $0x10] sm:$0xff pattern:$0x73625140]  ;;  %v1454_v19 = vld.sshfl [vmem:[#allocation1 + $0x8] sm:$0xff pattern:$0x73625140]  ;;  %v2035_v29 = vadd.f32 %v2033_v28, %v2016_v57  ;;  %v1999_v15 = vsel %vm181_vm1, %v1998_v5, %v1997_v22  ;;  %v1555_v5 = vstv %s2398_s27 }
 0x30c   :  { %1460 = vrot.lane.b32.xlu2 %v1455_v18, %s2522_s2  ;;  %1458 = vrot.lane.b32.xlu1 %v1454_v19, %s2522_s2  ;;  %v1453_v25 = vld.sshfl [vmem:[#allocation1] sm:$0xff pattern:$0x73625140]  ;;  %v1969_v56 = vsel %vm149_vm0, %v1968_v45, %v1967_v49  ;;  %v1544_v18 = vstv %s2397_s26  ;;  %s2439_s26 = sld [smem:[#allocation7 + $0x2f]] }
 0x30d   :  { %1456 = vrot.lane.b32.xlu0 %v1453_v25, %s2522_s2  ;;  %1475 = vst [vmem:[#allocation1] ss:$4 sm:$0xff] %v1473_v6  ;;  %v3358_v58 = vadd.f32 %v2063_v47, %v2035_v29  ;;  %v1971_v20 = vadd.f32 %v1969_v56, %v1945_v44  ;;  %s3364_s2 = sld [smem:[#allocation7 + $0x37]]  ;;  %v1531_v6 = vld [vmem:[#allocation2 + $0x2] sm:$0xf]  ;;  %v1567_v47 = vstv %s2399_s28 }
 0x30e   :  { %v1534_v16 = vmul.f32 %v1533_v51, %v1531_v6  ;;  %v1545_v19 = vmul.f32 %v1544_v18, %v1531_v6  ;;  %v1556_v25 = vmul.f32 %v1555_v5, %v1531_v6  ;;  %v1565_v56 = vld [vmem:[#allocation2 + $0x2] sm:$0x3f]  ;;  %v1687_v51 = vld [vmem:[#allocation2 + $0xa] sm:$0xf]  ;;  %s2440_s27 = sld [smem:[#allocation7 + $0x4a]] }
 0x30f   :  { %v2001_v17 = vadd.f32 %v1999_v15, %v1971_v20  ;;  %v1568_v21 = vmul.f32 %v1567_v47, %v1565_v56  ;;  %v1587_v15 = vstv %s2400_s29  ;;  %v1700_v47 = vstv %s2406_s4 }
 0x310   :  { %v2007_v8 = vpop.permute.xlu0 %2006  ;;  %v1588_v30 = vmul.f32 %v1587_v15, %v1565_v56 }
 0x311   :  { %v2020_v23 = vadd.f32 %v2019_v61, %v2001_v17  ;;  %v1977_v35 = vpop.permute.xlu1 %1976  ;;  %v2008_v40 = vrot.slane %v2007_v8, 6 }
 0x312   :  { %v1978_v38 = vrot.slane %v1977_v35, 6 }
 0x313   :  { %v2045_v33 = vadd.f32 %v2043_v60, %v2020_v23  ;;  %v2009_v48 = vsel %vm181_vm1, %v2008_v40, %v2007_v8  ;;  %v1512_v4 = vstv %s3364_s2  ;;  %v1608_v23 = vmul.f32 %v1607_v10, %v1565_v56  ;;  %v1626_v40 = vld [vmem:[#allocation2 + $0x8] sm:$0x3f]  ;;  %s2419_s2 = sld [smem:[#allocation7 + $0x4f]] }
 0x314   :  { %v1478_v7 = vld.sshfl [vmem:[#allocation1 + $0x10] sm:$0xff pattern:$0x73625140]  ;;  %v1477_v3 = vld.sshfl [vmem:[#allocation1 + $0x8] sm:$0xff pattern:$0x73625140]  ;;  %v1979_v41 = vsel %vm149_vm0, %v1978_v38, %v1977_v35  ;;  %v1513_v53 = vmul.f32 %v1512_v4, %v3335_v2  ;;  %v1628_v38 = vstv %s2402_s6  ;;  %v1668_v4 = vstv %s2404_s1 }
 0x315   :  { %1483 = vrot.lane.b32.xlu2 %v1478_v7, %s2523_s8  ;;  %v1476_v11 = vld.sshfl [vmem:[#allocation1] sm:$0xff pattern:$0x73625140]  ;;  %1481 = vrot.lane.b32.xlu1 %v1477_v3, %s2523_s8  ;;  %v1981_v42 = vadd.f32 %v1979_v41, %v1949_v14  ;;  %v3377_v12 = vadd.f32 %v2073_v55, %v2045_v33  ;;  %v1629_v13 = vmul.f32 %v1628_v38, %v1626_v40  ;;  %v1648_v55 = vstv %s2403_s7  ;;  %v3420_v41 = vpop.permute.xlu2 %2124 }
 0x316   :  { %1479 = vrot.lane.b32.xlu0 %v1476_v11, %s2523_s8  ;;  %1495 = vst [vmem:[#allocation1] ss:$4 sm:$0xff] %v1493_v32  ;;  %v1649_v59 = vmul.f32 %v1648_v55, %v1626_v40 }
 0x317   :  { %v2011_v52 = vadd.f32 %v2009_v48, %v1981_v42 }
 0x318   :  { %v3408_v62 = vpop.permute.xlu0 %2134 }
 0x319   :  { %v2024_v50 = vadd.f32 %v2023_v36, %v2011_v52  ;;  %v2081_v34 = vpop.permute.xlu1 %2080 }
 0x31a   :  { %v2082_v43 = vrot.slane %v2081_v34, 6 }
 0x31b   :  { %v2055_v9 = vadd.f32 %v2053_v31, %v2024_v50  ;;  %v1669_v31 = vmul.f32 %v1668_v4, %v1626_v40 }
 0x31c   :  { %v2083_v63 = vsel %vm181_vm1, %v2082_v43, %v2081_v34 }
 0x31d   :  { %v1498_v22 = vld.sshfl [vmem:[#allocation1 + $0x10] sm:$0xff pattern:$0x73625140]  ;;  %v1497_v24 = vld.sshfl [vmem:[#allocation1 + $0x8] sm:$0xff pattern:$0x73625140]  ;;  %v3387_v54 = vadd.f32 %v2083_v63, %v2055_v9 }
 0x31e   :  { %1503 = vrot.lane.b32.xlu2 %v1498_v22, %s2523_s8  ;;  %1501 = vrot.lane.b32.xlu1 %v1497_v24, %s2523_s8  ;;  %v1496_v27 = vld.sshfl [vmem:[#allocation1] sm:$0xff pattern:$0x73625140] }
 0x31f   :  { %1499 = vrot.lane.b32.xlu0 %v1496_v27, %s2523_s8  ;;  %1515 = vst [vmem:[#allocation1] ss:$4 sm:$0xff] %v1513_v53  ;;  %v1689_v27 = vstv %s2405_s3 }
 0x320   :  { %v3415_v33 = vpop.permute.xlu0 %2144 }
 0x321   :  { %v3413_v7 = vpop.permute.xlu1 %2104 }
 0x326   :  { %v1518_v2 = vld.sshfl [vmem:[#allocation1 + $0x10] sm:$0xff pattern:$0x73625140]  ;;  %v1517_v57 = vld.sshfl [vmem:[#allocation1 + $0x8] sm:$0xff pattern:$0x73625140] }
 0x327   :  { %1523 = vrot.lane.b32.xlu2 %v1518_v2, %s2523_s8  ;;  %1521 = vrot.lane.b32.xlu1 %v1517_v57, %s2523_s8  ;;  %v1516_v49 = vld.sshfl [vmem:[#allocation1] sm:$0xff pattern:$0x73625140] }
 0x328   :  { %1519 = vrot.lane.b32.xlu0 %v1516_v49, %s2523_s8  ;;  %1536 = vst [vmem:[#allocation1] ss:$4 sm:$0xff] %v1534_v16  ;;  %v3424_v36 = vpop.permute.xlu0 %2154  ;;  %v1690_v16 = vmul.f32 %v1689_v27, %v1687_v51 }
 0x329   :  { %v3422_v42 = vpop.permute.xlu1 %2114 }
 0x32f   :  { %v3393_v28 = vld.sshfl [vmem:[#allocation1] sm:$0xff pattern:$0x73625140]  ;;  %v3395_v45 = vld.sshfl [vmem:[#allocation1 + $0x8] sm:$0xff pattern:$0x73625140] }
 0x330   :  { %1547 = vst [vmem:[#allocation1] ss:$4 sm:$0xff] %v1545_v19 }
 0x337   :  { %v3397_v29 = vld.sshfl [vmem:[#allocation1] sm:$0xff pattern:$0x73625140]  ;;  %v3399_v44 = vld.sshfl [vmem:[#allocation1 + $0x8] sm:$0xff pattern:$0x73625140] }
 0x338   :  { %1558 = vst [vmem:[#allocation1] ss:$4 sm:$0xff] %v1556_v25 }
 0x33f   :  { %v3401_v20 = vld.sshfl [vmem:[#allocation1] sm:$0xff pattern:$0x73625140]  ;;  %v3403_v39 = vld.sshfl [vmem:[#allocation1 + $0x8] sm:$0xff pattern:$0x73625140] }
 0x340   :  { %1570 = vst [vmem:[#allocation1] ss:$4 sm:$0xff] %v1568_v21  ;;  %v1701_v21 = vmul.f32 %v1700_v47, %v1687_v51 }
 0x347   :  { %v1573_v61 = vld.sshfl [vmem:[#allocation1 + $0x10] sm:$0xff pattern:$0x73625140]  ;;  %v1572_v17 = vld.sshfl [vmem:[#allocation1 + $0x8] sm:$0xff pattern:$0x73625140] }
 0x348   :  { %1578 = vrot.lane.b32.xlu2 %v1573_v61, %s2520_s13  ;;  %1576 = vrot.lane.b32.xlu1 %v1572_v17, %s2520_s13  ;;  %v1571_v8 = vld.sshfl [vmem:[#allocation1] sm:$0xff pattern:$0x73625140] }
 0x349   :  { %1574 = vrot.lane.b32.xlu0 %v1571_v8, %s2520_s13  ;;  %1590 = vst [vmem:[#allocation1] ss:$4 sm:$0xff] %v1588_v30 }
 0x350   :  { %v1593_v35 = vld.sshfl [vmem:[#allocation1 + $0x10] sm:$0xff pattern:$0x73625140]  ;;  %v1592_v32 = vld.sshfl [vmem:[#allocation1 + $0x8] sm:$0xff pattern:$0x73625140] }
 0x351   :  { %1598 = vrot.lane.b32.xlu2 %v1593_v35, %s2520_s13  ;;  %1596 = vrot.lane.b32.xlu1 %v1592_v32, %s2520_s13  ;;  %v1591_v60 = vld.sshfl [vmem:[#allocation1] sm:$0xff pattern:$0x73625140] }
 0x352   :  { %1594 = vrot.lane.b32.xlu0 %v1591_v60, %s2520_s13  ;;  %1610 = vst [vmem:[#allocation1] ss:$4 sm:$0xff] %v1608_v23  ;;  %v1423_v50 = vpop.permute.xlu2 %1422  ;;  %v1711_v23 = vstv %s2407_s18 }
 0x353   :  { %v1712_v35 = vmul.f32 %v1711_v23, %v1687_v51 }
 0x359   :  { %v1613_v14 = vld.sshfl [vmem:[#allocation1 + $0x10] sm:$0xff pattern:$0x73625140]  ;;  %v1612_v3 = vld.sshfl [vmem:[#allocation1 + $0x8] sm:$0xff pattern:$0x73625140] }
 0x35a   :  { %1618 = vrot.lane.b32.xlu2 %v1613_v14, %s2520_s13  ;;  %1616 = vrot.lane.b32.xlu1 %v1612_v3, %s2520_s13  ;;  %v1611_v11 = vld.sshfl [vmem:[#allocation1] sm:$0xff pattern:$0x73625140]  ;;  %v1186_v14 = vstv %s1185_s9 }
 0x35b   :  { %1614 = vrot.lane.b32.xlu0 %v1611_v11, %s2520_s13  ;;  %1631 = vst [vmem:[#allocation1] ss:$4 sm:$0xff] %v1629_v13  ;;  %v1442_v6 = vpop.permute.xlu2 %1441 }
 0x362   :  { %v1634_v37 = vld.sshfl [vmem:[#allocation1 + $0x10] sm:$0xff pattern:$0x73625140]  ;;  %v1633_v48 = vld.sshfl [vmem:[#allocation1 + $0x8] sm:$0xff pattern:$0x73625140] }
 0x363   :  { %1639 = vrot.lane.b32.xlu2 %v1634_v37, %s2523_s8  ;;  %1637 = vrot.lane.b32.xlu1 %v1633_v48, %s2523_s8  ;;  %v1632_v52 = vld.sshfl [vmem:[#allocation1] sm:$0xff pattern:$0x73625140]  ;;  %v1723_v37 = vstv %s2408_s10  ;;  %v1721_v48 = vld [vmem:[#allocation2 + $0xa] sm:$0x3f] }
 0x364   :  { %1635 = vrot.lane.b32.xlu0 %v1632_v52, %s2523_s8  ;;  %1651 = vst [vmem:[#allocation1] ss:$4 sm:$0xff] %v1649_v59 }
 0x366   :  { %v1461_v56 = vpop.permute.xlu2 %1460 }
 0x36a   :  { %v1421_v34 = vpop.permute.xlu1 %1420 }
 0x36b   :  { %v1654_v43 = vld.sshfl [vmem:[#allocation1 + $0x10] sm:$0xff pattern:$0x73625140]  ;;  %v1653_v53 = vld.sshfl [vmem:[#allocation1 + $0x8] sm:$0xff pattern:$0x73625140]  ;;  %v1425_v9 = vsel %vm364_vm4, %v1421_v34, %v1423_v50  ;;  %v1419_v22 = vpop.permute.xlu0 %1418 }
 0x36c   :  { %1659 = vrot.lane.b32.xlu2 %v1654_v43, %s2523_s8  ;;  %1657 = vrot.lane.b32.xlu1 %v1653_v53, %s2523_s8  ;;  %v1652_v24 = vld.sshfl [vmem:[#allocation1] sm:$0xff pattern:$0x73625140]  ;;  %v1424_v63 = vsel %vm364_vm4, %v1419_v22, %v1421_v34  ;;  %v1429_v32 = vmul.f32 %v2995_v0, %v1425_v9 }
 0x36d   :  { %1655 = vrot.lane.b32.xlu0 %v1652_v24, %s2523_s8  ;;  %1671 = vst [vmem:[#allocation1] ss:$4 sm:$0xff] %v1669_v31  ;;  %v1428_v60 = vmul.f32 %v3020_v46, %v1424_v63  ;;  %v1724_v31 = vmul.f32 %v1723_v37, %v1721_v48  ;;  %v1188_v24 = vstv %s2365_s11  ;;  %v1784_v37 = vstv %s2411_s17 }
 0x36e   :  { %v1431_v3 = vadd.f32 %v1429_v32, %v1186_v14 }
 0x36f   :  { %v1484_v13 = vpop.permute.xlu2 %1483  ;;  %v1430_v55 = vadd.f32 %v1428_v60, %v1186_v14 }
 0x373   :  { %v1440_v49 = vpop.permute.xlu1 %1439 }
 0x374   :  { %v1674_v2 = vld.sshfl [vmem:[#allocation1 + $0x10] sm:$0xff pattern:$0x73625140]  ;;  %v1673_v57 = vld.sshfl [vmem:[#allocation1 + $0x8] sm:$0xff pattern:$0x73625140]  ;;  %v1444_v19 = vsel %vm364_vm4, %v1440_v49, %v1442_v6  ;;  %v1438_v5 = vpop.permute.xlu0 %1437 }
 0x375   :  { %1679 = vrot.lane.b32.xlu2 %v1674_v2, %s2523_s8  ;;  %1677 = vrot.lane.b32.xlu1 %v1673_v57, %s2523_s8  ;;  %v1672_v18 = vld.sshfl [vmem:[#allocation1] sm:$0xff pattern:$0x73625140]  ;;  %v1443_v25 = vsel %vm364_vm4, %v1438_v5, %v1440_v49  ;;  %v1448_v43 = vmul.f32 %v2995_v0, %v1444_v19  ;;  %v1743_v57 = vstv %s2409_s12 }
 0x376   :  { %1675 = vrot.lane.b32.xlu0 %v1672_v18, %s2523_s8  ;;  %1692 = vst [vmem:[#allocation1] ss:$4 sm:$0xff] %v1690_v16  ;;  %v1447_v53 = vmul.f32 %v3020_v46, %v1443_v25  ;;  %v1744_v5 = vmul.f32 %v1743_v57, %v1721_v48 }
 0x377   :  { %v1450_v27 = vadd.f32 %v1448_v43, %v1188_v24 }
 0x378   :  { %v1504_v63 = vpop.permute.xlu2 %1503  ;;  %v1449_v16 = vadd.f32 %v1447_v53, %v1188_v24  ;;  %v1804_v53 = vstv %s2412_s19 }
 0x37d   :  { %v3439_v15 = vld.sshfl [vmem:[#allocation1] sm:$0xff pattern:$0x73625140]  ;;  %v3441_v30 = vld.sshfl [vmem:[#allocation1 + $0x8] sm:$0xff pattern:$0x73625140] }
 0x37e   :  { %1703 = vst [vmem:[#allocation1] ss:$4 sm:$0xff] %v1701_v21  ;;  %v1459_v61 = vpop.permute.xlu1 %1458 }
 0x37f   :  { %v1463_v17 = vsel %vm364_vm4, %v1459_v61, %v1461_v56  ;;  %v1457_v8 = vpop.permute.xlu0 %1456 }
 0x380   :  { %v1462_v10 = vsel %vm364_vm4, %v1457_v8, %v1459_v61  ;;  %v1467_v25 = vmul.f32 %v2995_v0, %v1463_v17  ;;  %v1190_v8 = vstv %s2366_s14  ;;  %v1763_v17 = vstv %s2410_s15 }
 0x381   :  { %v1466_v21 = vmul.f32 %v3020_v46, %v1462_v10  ;;  %v1524_v23 = vpop.permute.xlu2 %1523 }
 0x385   :  { %v3447_v38 = vld.sshfl [vmem:[#allocation1] sm:$0xff pattern:$0x73625140]  ;;  %v3449_v40 = vld.sshfl [vmem:[#allocation1 + $0x8] sm:$0xff pattern:$0x73625140] }
 0x386   :  { %1714 = vst [vmem:[#allocation1] ss:$4 sm:$0xff] %v1712_v35  ;;  %v1469_v35 = vadd.f32 %v1467_v25, %v1190_v8 }
 0x387   :  { %v1482_v11 = vpop.permute.xlu1 %1481 }
 0x388   :  { %v1480_v59 = vpop.permute.xlu0 %1479  ;;  %v1486_v52 = vsel %vm426_vm2, %v1482_v11, %v1484_v13  ;;  %v1468_v13 = vadd.f32 %v1466_v21, %v1190_v8 }
 0x389   :  { %v1485_v4 = vsel %vm426_vm2, %v1480_v59, %v1482_v11  ;;  %v3453_v50 = vadd.f32 %v1486_v52, %v1431_v3  ;;  %v1764_v3 = vmul.f32 %v1763_v17, %v1721_v48  ;;  %v1782_v52 = vld [vmem:[#allocation2 + $0x10] sm:$0x3f] }
 0x38a   :  { %v3455_v34 = vadd.f32 %v1485_v4, %v1430_v55  ;;  %v1785_v4 = vmul.f32 %v1784_v37, %v1782_v52  ;;  %v1805_v24 = vmul.f32 %v1804_v53, %v1782_v52 }
 0x38b   :  { %v1542_v25 = vadd.f32 %v3395_v45, %v3453_v50 }
 0x38d   :  { %v3459_v9 = vld.sshfl [vmem:[#allocation1] sm:$0xff pattern:$0x73625140]  ;;  %v3461_v22 = vld.sshfl [vmem:[#allocation1 + $0x8] sm:$0xff pattern:$0x73625140] }
 0x38e   :  { %1726 = vst [vmem:[#allocation1] ss:$4 sm:$0xff] %v1724_v31 }
 0x390   :  { %v1502_v51 = vpop.permute.xlu1 %1501 }
 0x391   :  { %v1506_v6 = vsel %vm426_vm2, %v1502_v51, %v1504_v63  ;;  %v1500_v2 = vpop.permute.xlu0 %1499 }
 0x392   :  { %v3464_v49 = vadd.f32 %v1506_v6, %v1450_v27  ;;  %v1505_v18 = vsel %vm426_vm2, %v1500_v2, %v1502_v51 }
 0x393   :  { %v3467_v19 = vadd.f32 %v1505_v18, %v1449_v16  ;;  %v1824_v16 = vstv %s2413_s20 }
 0x394   :  { %v1825_v2 = vmul.f32 %v1824_v16, %v1782_v52  ;;  %v1856_v52 = vstv %s2415_s22 }
 0x395   :  { %v1729_v47 = vld.sshfl [vmem:[#allocation1 + $0x10] sm:$0xff pattern:$0x73625140]  ;;  %v1728_v56 = vld.sshfl [vmem:[#allocation1 + $0x8] sm:$0xff pattern:$0x73625140] }
 0x396   :  { %1734 = vrot.lane.b32.xlu2 %v1729_v47, %s2520_s13  ;;  %1732 = vrot.lane.b32.xlu1 %v1728_v56, %s2520_s13  ;;  %v1727_v61 = vld.sshfl [vmem:[#allocation1] sm:$0xff pattern:$0x73625140] }
 0x397   :  { %1730 = vrot.lane.b32.xlu0 %v1727_v61, %s2520_s13  ;;  %1746 = vst [vmem:[#allocation1] ss:$4 sm:$0xff] %v1744_v5  ;;  %v1541_v61 = vadd.f32 %v3393_v28, %v3455_v34 }
 0x399   :  { %v1522_v32 = vpop.permute.xlu1 %1521 }
 0x39a   :  { %v1526_v60 = vsel %vm426_vm2, %v1522_v32, %v1524_v23  ;;  %v1520_v0 = vpop.permute.xlu0 %1519 }
 0x39b   :  { %v3475_v14 = vadd.f32 %v1526_v60, %v1469_v35  ;;  %v1525_v46 = vsel %vm426_vm2, %v1520_v0, %v1522_v32  ;;  %v1845_v32 = vstv %s2414_s21  ;;  %v1843_v60 = vld [vmem:[#allocation2 + $0x12] sm:$0xf] }
 0x39c   :  { %v3478_v10 = vadd.f32 %v1525_v46, %v1468_v13  ;;  %v1846_v0 = vmul.f32 %v1845_v32, %v1843_v60  ;;  %v1553_v46 = vadd.f32 %v3399_v44, %v3464_v49 }
 0x39d   :  { %v1564_v49 = vadd.f32 %v3403_v39, %v3475_v14 }
 0x39e   :  { %v1749_v11 = vld.sshfl [vmem:[#allocation1 + $0x10] sm:$0xff pattern:$0x73625140]  ;;  %v1748_v55 = vld.sshfl [vmem:[#allocation1 + $0x8] sm:$0xff pattern:$0x73625140] }
 0x39f   :  { %1754 = vrot.lane.b32.xlu2 %v1749_v11, %s2520_s13  ;;  %1752 = vrot.lane.b32.xlu1 %v1748_v55, %s2520_s13  ;;  %v1747_v59 = vld.sshfl [vmem:[#allocation1] sm:$0xff pattern:$0x73625140]  ;;  %v1552_v11 = vadd.f32 %v3397_v29, %v3467_v19  ;;  %v1563_v19 = vadd.f32 %v3401_v20, %v3478_v10 }
 0x3a0   :  { %1750 = vrot.lane.b32.xlu0 %v1747_v59, %s2520_s13  ;;  %1766 = vst [vmem:[#allocation1] ss:$4 sm:$0xff] %v1764_v3 }
 0x3a2   :  { %v1579_v6 = vpop.permute.xlu2 %1578 }
 0x3a7   :  { %v1769_v31 = vld.sshfl [vmem:[#allocation1 + $0x10] sm:$0xff pattern:$0x73625140]  ;;  %v1768_v43 = vld.sshfl [vmem:[#allocation1 + $0x8] sm:$0xff pattern:$0x73625140] }
 0x3a8   :  { %1774 = vrot.lane.b32.xlu2 %v1769_v31, %s2520_s13  ;;  %1772 = vrot.lane.b32.xlu1 %v1768_v43, %s2520_s13  ;;  %v1767_v48 = vld.sshfl [vmem:[#allocation1] sm:$0xff pattern:$0x73625140]  ;;  %v1857_v31 = vmul.f32 %v1856_v52, %v1843_v60 }
 0x3a9   :  { %1770 = vrot.lane.b32.xlu0 %v1767_v48, %s2520_s13  ;;  %1787 = vst [vmem:[#allocation1] ss:$4 sm:$0xff] %v1785_v4 }
 0x3ab   :  { %v1599_v13 = vpop.permute.xlu2 %1598 }
 0x3b0   :  { %v1790_v63 = vld.sshfl [vmem:[#allocation1 + $0x10] sm:$0xff pattern:$0x73625140]  ;;  %v1789_v27 = vld.sshfl [vmem:[#allocation1 + $0x8] sm:$0xff pattern:$0x73625140] }
 0x3b1   :  { %1795 = vrot.lane.b32.xlu2 %v1790_v63, %s2523_s8  ;;  %1793 = vrot.lane.b32.xlu1 %v1789_v27, %s2523_s8  ;;  %v1788_v51 = vld.sshfl [vmem:[#allocation1] sm:$0xff pattern:$0x73625140]  ;;  %v1867_v27 = vstv %s2416_s23 }
 0x3b2   :  { %1791 = vrot.lane.b32.xlu0 %v1788_v51, %s2523_s8  ;;  %1807 = vst [vmem:[#allocation1] ss:$4 sm:$0xff] %v1805_v24 }
 0x3b4   :  { %v1619_v4 = vpop.permute.xlu2 %1618 }
 0x3b9   :  { %v1810_v57 = vld.sshfl [vmem:[#allocation1 + $0x10] sm:$0xff pattern:$0x73625140]  ;;  %v1809_v18 = vld.sshfl [vmem:[#allocation1 + $0x8] sm:$0xff pattern:$0x73625140] }
 0x3ba   :  { %1815 = vrot.lane.b32.xlu2 %v1810_v57, %s2523_s8  ;;  %1813 = vrot.lane.b32.xlu1 %v1809_v18, %s2523_s8  ;;  %v1808_v5 = vld.sshfl [vmem:[#allocation1] sm:$0xff pattern:$0x73625140]  ;;  %v1577_v47 = vpop.permute.xlu1 %1576 }
 0x3bb   :  { %1811 = vrot.lane.b32.xlu0 %v1808_v5, %s2523_s8  ;;  %1827 = vst [vmem:[#allocation1] ss:$4 sm:$0xff] %v1825_v2  ;;  %v1581_v56 = vsel %vm149_vm0, %v1577_v47, %v1579_v6  ;;  %v1575_v21 = vpop.permute.xlu0 %1574  ;;  %v1868_v6 = vmul.f32 %v1867_v27, %v1843_v60 }
 0x3bc   :  { %v1585_v8 = vadd.f32 %v1581_v56, %v1542_v25  ;;  %v1580_v23 = vsel %vm149_vm0, %v1575_v21, %v1577_v47  ;;  %v1877_v25 = vld [vmem:[#allocation2 + $0x12] sm:$0x3f] }
 0x3bd   :  { %v1584_v35 = vadd.f32 %v1580_v23, %v1541_v61  ;;  %v1640_v57 = vpop.permute.xlu2 %1639 }
 0x3c2   :  { %v1830_v45 = vld.sshfl [vmem:[#allocation1 + $0x10] sm:$0xff pattern:$0x73625140]  ;;  %v1829_v50 = vld.sshfl [vmem:[#allocation1 + $0x8] sm:$0xff pattern:$0x73625140] }
 0x3c3   :  { %1835 = vrot.lane.b32.xlu2 %v1830_v45, %s2523_s8  ;;  %1833 = vrot.lane.b32.xlu1 %v1829_v50, %s2523_s8  ;;  %v1828_v17 = vld.sshfl [vmem:[#allocation1] sm:$0xff pattern:$0x73625140]  ;;  %v1597_v28 = vpop.permute.xlu1 %1596 }
 0x3c4   :  { %1831 = vrot.lane.b32.xlu0 %v1828_v17, %s2523_s8  ;;  %1848 = vst [vmem:[#allocation1] ss:$4 sm:$0xff] %v1846_v0  ;;  %v1601_v34 = vsel %vm149_vm0, %v1597_v28, %v1599_v13  ;;  %v1595_v3 = vpop.permute.xlu0 %1594  ;;  %s2417_s8 = sld [smem:[#allocation7 + $0x19]]  ;;  %v1899_v0 = vstv %s2418_s24 }
 0x3c5   :  { %v1605_v55 = vadd.f32 %v1601_v34, %v1553_v46  ;;  %v1600_v59 = vsel %vm149_vm0, %v1595_v3, %v1597_v28 }
 0x3c6   :  { %v1604_v37 = vadd.f32 %v1600_v59, %v1552_v11  ;;  %v1660_v23 = vpop.permute.xlu2 %1659  ;;  %v1919_v59 = vstv %s2419_s2 }
 0x3ca   :  { %v1879_v5 = vstv %s2417_s8 }
 0x3cb   :  { %v3507_v43 = vld.sshfl [vmem:[#allocation1] sm:$0xff pattern:$0x73625140]  ;;  %v3509_v44 = vld.sshfl [vmem:[#allocation1 + $0x8] sm:$0xff pattern:$0x73625140]  ;;  %v1880_v56 = vmul.f32 %v1879_v5, %v1877_v25 }
 0x3cc   :  { %1859 = vst [vmem:[#allocation1] ss:$4 sm:$0xff] %v1857_v31  ;;  %v1617_v48 = vpop.permute.xlu1 %1616  ;;  %v2088_v31 = vstv %s2438_s25 }
 0x3cd   :  { %v1621_v53 = vsel %vm149_vm0, %v1617_v48, %v1619_v4  ;;  %v1615_v29 = vpop.permute.xlu0 %1614  ;;  %v2086_v4 = vld [vmem:[#allocation2 + $0x10] sm:$0x3f] }
 0x3ce   :  { %v1625_v24 = vadd.f32 %v1621_v53, %v1564_v49  ;;  %v1620_v63 = vsel %vm149_vm0, %v1615_v29, %v1617_v48  ;;  %v2106_v49 = vrot.slane %v3413_v7, 6  ;;  %v1920_v53 = vmul.f32 %v1919_v59, %v1877_v25 }
 0x3cf   :  { %v1624_v51 = vadd.f32 %v1620_v63, %v1563_v19  ;;  %v1680_v34 = vpop.permute.xlu2 %1679  ;;  %v2089_v63 = vmul.f32 %v2088_v31, %v2086_v4 }
 0x3d3   :  { %v3517_v16 = vld.sshfl [vmem:[#allocation1] sm:$0xff pattern:$0x73625140]  ;;  %v3519_v2 = vld.sshfl [vmem:[#allocation1 + $0x8] sm:$0xff pattern:$0x73625140] }
 0x3d4   :  { %1870 = vst [vmem:[#allocation1] ss:$4 sm:$0xff] %v1868_v6  ;;  %v2090_v6 = vadd.f32 %v2089_v63, %v3358_v58 }
 0x3d5   :  { %v1638_v39 = vpop.permute.xlu1 %1637 }
 0x3d6   :  { %v1642_v14 = vsel %vm426_vm2, %v1638_v39, %v1640_v57  ;;  %v1636_v18 = vpop.permute.xlu0 %1635  ;;  %v2136_v57 = vrot.slane %v3408_v62, 6 }
 0x3d7   :  { %v3522_v20 = vadd.f32 %v1642_v14, %v1585_v8  ;;  %v1641_v10 = vsel %vm426_vm2, %v1636_v18, %v1638_v39  ;;  %v2092_v39 = vstv %s2439_s26  ;;  %v2116_v14 = vrot.slane %v3422_v42, 6 }
 0x3d8   :  { %v3525_v47 = vadd.f32 %v1641_v10, %v1584_v35  ;;  %v1900_v35 = vmul.f32 %v1899_v0, %v1877_v25  ;;  %v2137_v18 = vsel %vm181_vm1, %v2136_v57, %v3408_v62 }
 0x3db   :  { %v3527_v21 = vld.sshfl [vmem:[#allocation1] sm:$0xff pattern:$0x73625140]  ;;  %v3529_v61 = vld.sshfl [vmem:[#allocation1 + $0x8] sm:$0xff pattern:$0x73625140] }
 0x3dc   :  { %1882 = vst [vmem:[#allocation1] ss:$4 sm:$0xff] %v1880_v56  ;;  %v2093_v56 = vmul.f32 %v2092_v39, %v2086_v4 }
 0x3de   :  { %v1658_v32 = vpop.permute.xlu1 %1657 }
 0x3df   :  { %v1662_v60 = vsel %vm426_vm2, %v1658_v32, %v1660_v23  ;;  %v1656_v13 = vpop.permute.xlu0 %1655  ;;  %v2094_v23 = vadd.f32 %v2093_v56, %v3377_v12  ;;  %v2156_v12 = vrot.slane %v3424_v36, 6 }
 0x3e0   :  { %v3532_v45 = vadd.f32 %v1662_v60, %v1605_v55  ;;  %v1661_v8 = vsel %vm426_vm2, %v1656_v13, %v1658_v32  ;;  %v2146_v32 = vrot.slane %v3415_v33, 6  ;;  %v2096_v60 = vstv %s2440_s27 }
 0x3e1   :  { %v3535_v50 = vadd.f32 %v1661_v8, %v1604_v37 }
 0x3e2   :  { %v2147_v13 = vsel %vm181_vm1, %v2146_v32, %v3415_v33  ;;  %v2157_v33 = vsel %vm181_vm1, %v2156_v12, %v3424_v36 }
 0x3e3   :  { %v1885_v17 = vld.sshfl [vmem:[#allocation1 + $0x10] sm:$0xff pattern:$0x73625140]  ;;  %v1884_v46 = vld.sshfl [vmem:[#allocation1 + $0x8] sm:$0xff pattern:$0x73625140] }
 0x3e4   :  { %1890 = vrot.lane.b32.xlu2 %v1885_v17, %s2520_s13  ;;  %1888 = vrot.lane.b32.xlu1 %v1884_v46, %s2520_s13  ;;  %v1883_v28 = vld.sshfl [vmem:[#allocation1] sm:$0xff pattern:$0x73625140]  ;;  %v2097_v17 = vmul.f32 %v2096_v60, %v2086_v4 }
 0x3e5   :  { %1886 = vrot.lane.b32.xlu0 %v1883_v28, %s2520_s13  ;;  %1902 = vst [vmem:[#allocation1] ss:$4 sm:$0xff] %v1900_v35 }
 0x3e6   :  { %v2098_v28 = vadd.f32 %v2097_v17, %v3387_v54  ;;  %v1698_v54 = vadd.f32 %v3441_v30, %v3522_v20  ;;  %v1709_v30 = vadd.f32 %v3449_v40, %v3532_v45 }
 0x3e7   :  { %v1678_v3 = vpop.permute.xlu1 %1677 }
 0x3e8   :  { %v1682_v11 = vsel %vm426_vm2, %v1678_v3, %v1680_v34  ;;  %v1676_v55 = vpop.permute.xlu0 %1675 }
 0x3e9   :  { %v3541_v37 = vadd.f32 %v1682_v11, %v1625_v24  ;;  %v1681_v52 = vsel %vm426_vm2, %v1676_v55, %v1678_v3  ;;  %v2107_v24 = vsel %vm149_vm0, %v2106_v49, %v3413_v7  ;;  %v2117_v7 = vsel %vm149_vm0, %v2116_v14, %v3422_v42 }
 0x3ea   :  { %v3545_v48 = vadd.f32 %v1681_v52, %v1624_v51  ;;  %v2109_v51 = vadd.f32 %v2107_v24, %v2090_v6  ;;  %v2119_v62 = vadd.f32 %v2117_v7, %v2094_v23  ;;  %v2126_v42 = vrot.slane %v3420_v41, 6 }
 0x3eb   :  { %v1697_v49 = vadd.f32 %v3439_v15, %v3525_v47  ;;  %v1708_v47 = vadd.f32 %v3447_v38, %v3535_v50  ;;  %v1720_v40 = vadd.f32 %v3461_v22, %v3541_v37 }
 0x3ec   :  { %v1905_v29 = vld.sshfl [vmem:[#allocation1 + $0x10] sm:$0xff pattern:$0x73625140]  ;;  %v1904_v19 = vld.sshfl [vmem:[#allocation1 + $0x8] sm:$0xff pattern:$0x73625140]  ;;  %v2139_v5 = vadd.f32 %v2137_v18, %v2109_v51  ;;  %v2149_v0 = vadd.f32 %v2147_v13, %v2119_v62  ;;  %v2127_v34 = vsel %vm149_vm0, %v2126_v42, %v3420_v41  ;;  %v1719_v38 = vadd.f32 %v3459_v9, %v3545_v48 }
 0x3ed   :  { %1910 = vrot.lane.b32.xlu1 %v1905_v29, %s2520_s13  ;;  %1908 = vrot.lane.b32.xlu0 %v1904_v19, %s2520_s13  ;;  %v1903_v27 = vld.sshfl [vmem:[#allocation1] sm:$0xff pattern:$0x73625140]  ;;  %v2129_v3 = vadd.f32 %v2127_v34, %v2098_v28  ;;  %v2449_v28 = vld [vmem:[%s3669_s0 + $0x8] sm:$0xf] }
 0x3ee   :  { %1922 = vst [vmem:[#allocation1] ss:$4 sm:$0xff] %v1920_v53  ;;  %v2219_v9 = vld [vmem:[%s3669_s0] sm:$0xf] }
 0x3ef   :  { %v2159_v55 = vadd.f32 %v2157_v33, %v2129_v3 }
 0x3f0   :  { %v1735_v11 = vpop.permute.xlu2 %1734 }
 0x3f5   :  { %1906 = vrot.lane.b32.xlu1 %v1903_v27, %s2520_s13  ;;  %v1925_v25 = vld.sshfl [vmem:[#allocation1 + $0x10] sm:$0xff pattern:$0x73625140]  ;;  %v1924_v10 = vld.sshfl [vmem:[#allocation1 + $0x8] sm:$0xff pattern:$0x73625140] }
 0x3f6   :  { %1930 = vrot.lane.b32.xlu0 %v1925_v25, %s2520_s13  ;;  %1928 = vrot.lane.b32.xlu2 %v1924_v10, %s2520_s13  ;;  %v1923_v58 = vld.sshfl [vmem:[#allocation1] sm:$0xff pattern:$0x73625140] }
 0x3f7   :  { %2161 = vst [vmem:[#allocation1] ss:$4 sm:$0xff] %v2139_v5 }
 0x3f9   :  { %v1755_v63 = vpop.permute.xlu2 %1754 }
 0x3fe   :  { %1926 = vrot.lane.b32.xlu2 %v1923_v58, %s2520_s13  ;;  %v2163_v8 = vld.sshfl [vmem:[#allocation1 + $0x8] sm:$0xff pattern:$0x73625140]  ;;  %v2164_v35 = vld.sshfl [vmem:[#allocation1 + $0x10] sm:$0xff pattern:$0x73625140] }
 0x3ff   :  { %2167 = vrot.lane.b32.xlu1 %v2163_v8, %s2524_s16  ;;  %v2162_v46 = vld.sshfl [vmem:[#allocation1] sm:$0xff pattern:$0x73625140] }
 0x400   :  { %2180 = vst [vmem:[#allocation1] ss:$4 sm:$0xff] %v2149_v0 }
 0x402   :  { %v1775_v18 = vpop.permute.xlu2 %1774 }
 0x406   :  { %2169 = vrot.lane.b32.xlu2 %v2164_v35, %s2524_s16  ;;  %v2447_v35 = vld [vmem:[%s3669_s0 + $0x4] sm:$0xf] }
 0x407   :  { %v2183_v59 = vld.sshfl [vmem:[#allocation1 + $0x10] sm:$0xff pattern:$0x73625140]  ;;  %v2182_v52 = vld.sshfl [vmem:[#allocation1 + $0x8] sm:$0xff pattern:$0x73625140] }
 0x408   :  { %2188 = vrot.lane.b32.xlu1 %v2183_v59, %s2524_s16  ;;  %2186 = vrot.lane.b32.xlu0 %v2182_v52, %s2524_s16  ;;  %v2181_v4 = vld.sshfl [vmem:[#allocation1] sm:$0xff pattern:$0x73625140]  ;;  %v1733_v31 = vpop.permute.xlu1 %1732 }
 0x409   :  { %2199 = vst [vmem:[#allocation1] ss:$4 sm:$0xff] %v2159_v55  ;;  %v1737_v41 = vsel %vm149_vm0, %v1733_v31, %v1735_v11  ;;  %v1731_v36 = vpop.permute.xlu0 %1730 }
 0x40a   :  { %v1741_v53 = vadd.f32 %v1737_v41, %v1698_v54  ;;  %v1736_v29 = vsel %vm149_vm0, %v1731_v36, %v1733_v31 }
 0x40b   :  { %v1740_v19 = vadd.f32 %v1736_v29, %v1697_v49  ;;  %v1796_v58 = vpop.permute.xlu2 %1795 }
 0x410   :  { %2184 = vrot.lane.b32.xlu1 %v2181_v4, %s2524_s16  ;;  %v2202_v27 = vld.sshfl [vmem:[#allocation1 + $0x10] sm:$0xff pattern:$0x73625140]  ;;  %v2201_v24 = vld.sshfl [vmem:[#allocation1 + $0x8] sm:$0xff pattern:$0x73625140] }
 0x411   :  { %2207 = vrot.lane.b32.xlu0 %v2202_v27, %s2524_s16  ;;  %2205 = vrot.lane.b32.xlu2 %v2201_v24, %s2524_s16  ;;  %v1753_v20 = vpop.permute.xlu1 %1752  ;;  %v2200_v14 = vld.sshfl [vmem:[#allocation1] sm:$0xff pattern:$0x73625140] }
 0x412   :  { %v1757_v6 = vsel %vm149_vm0, %v1753_v20, %v1755_v63  ;;  %v1751_v15 = vpop.permute.xlu0 %1750  ;;  %2221 = vst [vmem:[#allocation1] ss:$4 sm:$0xff] %v2219_v9 }
 0x413   :  { %v1761_v57 = vadd.f32 %v1757_v6, %v1709_v30  ;;  %v1756_v51 = vsel %vm149_vm0, %v1751_v15, %v1753_v20 }
 0x414   :  { %v3592_v39 = vadd.f32 %v1756_v51, %v1708_v47  ;;  %v1816_v60 = vpop.permute.xlu2 %1815 }
 0x419   :  { %2165 = vrot.lane.b32.xlu0 %v2162_v46, %s2524_s16  ;;  %2203 = vrot.lane.b32.xlu2 %v2200_v14, %s2524_s16  ;;  %v2223_v8 = vld.sshfl [vmem:[#allocation1 + $0x8] sm:$0xff pattern:$0x73625140]  ;;  %v3614_v46 = vld.sshfl [vmem:[#allocation1] sm:$0xff pattern:$0x73625140] }
 0x41a   :  { %v1773_v45 = vpop.permute.xlu1 %1772  ;;  %2238 = vst [vmem:[#allocation1] ss:$4 sm:$0xff] %v2447_v35 }
 0x41b   :  { %v1777_v5 = vsel %vm149_vm0, %v1773_v45, %v1775_v18  ;;  %v1771_v25 = vpop.permute.xlu0 %1770 }
 0x41c   :  { %v3601_v50 = vadd.f32 %v1777_v5, %v1720_v40  ;;  %v1776_v10 = vsel %vm149_vm0, %v1771_v25, %v1773_v45 }
 0x41d   :  { %v1780_v56 = vadd.f32 %v1776_v10, %v1719_v38  ;;  %v1836_v13 = vpop.permute.xlu2 %1835 }
 0x421   :  { %v3619_v34 = vld.sshfl [vmem:[#allocation1] sm:$0xff pattern:$0x73625140]  ;;  %v2240_v33 = vld.sshfl [vmem:[#allocation1 + $0x8] sm:$0xff pattern:$0x73625140] }
 0x422   :  { %2256 = vst [vmem:[#allocation1] ss:$4 sm:$0xff] %v2449_v28 }
 0x423   :  { %v1794_v7 = vpop.permute.xlu1 %1793 }
 0x424   :  { %v1798_v23 = vsel %vm426_vm2, %v1794_v7, %v1796_v58  ;;  %v1792_v32 = vpop.permute.xlu0 %1791 }
 0x425   :  { %v1802_v62 = vadd.f32 %v1798_v23, %v1741_v53  ;;  %v1797_v22 = vsel %vm426_vm2, %v1792_v32, %v1794_v7 }
 0x426   :  { %v3606_v37 = vadd.f32 %v1797_v22, %v1740_v19 }
 0x427   :  { %v1854_v36 = vadd.f32 %v3509_v44, %v1802_v62 }
 0x42c   :  { %v1814_v48 = vpop.permute.xlu1 %1813 }
 0x42d   :  { %v1812_v17 = vpop.permute.xlu0 %1811  ;;  %v1818_v63 = vsel %vm426_vm2, %v1814_v48, %v1816_v60 }
 0x42e   :  { %v1822_v20 = vadd.f32 %v1818_v63, %v1761_v57  ;;  %v1817_v40 = vsel %vm426_vm2, %v1812_v17, %v1814_v48 }
 0x42f   :  { %v1821_v58 = vadd.f32 %v1817_v40, %v3592_v39 }
 0x430   :  { %v1865_v44 = vadd.f32 %v3519_v2, %v1822_v20 }
 0x435   :  { %v1834_v42 = vpop.permute.xlu1 %1833 }
 0x436   :  { %v1832_v3 = vpop.permute.xlu0 %1831  ;;  %v1838_v25 = vsel %vm426_vm2, %v1834_v42, %v1836_v13  ;;  %v1864_v13 = vadd.f32 %v3517_v16, %v1821_v58 }
 0x437   :  { %v1837_v51 = vsel %vm426_vm2, %v1832_v3, %v1834_v42  ;;  %v1842_v2 = vadd.f32 %v1838_v25, %v3601_v50 }
 0x438   :  { %v1841_v10 = vadd.f32 %v1837_v51, %v1780_v56 }
 0x43a   :  { %v1875_v62 = vadd.f32 %v3527_v21, %v1841_v10 }
 0x43e   :  { %v1891_v0 = vpop.permute.xlu2 %1890 }
 0x450   :  { %v1929_v12 = vpop.permute.xlu2 %1928 }
 0x456   :  { %v1889_v11 = vpop.permute.xlu1 %1888 }
 0x457   :  { %v1887_v59 = vpop.permute.xlu0 %1886  ;;  %v1893_v41 = vsel %vm149_vm0, %v1889_v11, %v1891_v0  ;;  %v1876_v0 = vadd.f32 %v3529_v61, %v1842_v2 }
 0x458   :  { %v1927_v55 = vpop.permute.xlu2 %1926  ;;  %v1897_v27 = vadd.f32 %v1893_v41, %v1854_v36  ;;  %v1892_v61 = vsel %vm149_vm0, %v1887_v59, %v1889_v11  ;;  %v2257_v41 = vld.sshfl [vmem:[#allocation1] sm:$0xff pattern:$0x73625140] }
 0x459   :  { %v1932_v32 = vsel %vm149_vm0, %v1927_v55, %v1929_v12 }
 0x45a   :  { %v1936_v39 = vadd.f32 %v1932_v32, %v1875_v62 }
 0x45f   :  { %v1911_v52 = vpop.permute.xlu1 %1910  ;;  %v1909_v31 = vpop.permute.xlu0 %1908 }
 0x460   :  { %v2170_v4 = vpop.permute.xlu2 %2169  ;;  %v1913_v15 = vsel %vm149_vm0, %v1909_v31, %v1911_v52 }
 0x461   :  { %v1917_v38 = vadd.f32 %v1913_v15, %v1865_v44 }
 0x467   :  { %v1907_v54 = vpop.permute.xlu1 %1906 }
 0x468   :  { %v1931_v29 = vpop.permute.xlu0 %1930  ;;  %v1912_v22 = vsel %vm149_vm0, %v1907_v54, %v1909_v31 }
 0x469   :  { %v1933_v9 = vsel %vm149_vm0, %v1929_v12, %v1931_v29  ;;  %v1916_v35 = vadd.f32 %v1912_v22, %v1864_v13 }
 0x46a   :  { %v1937_v42 = vadd.f32 %v1933_v9, %v1876_v0 }
 0x46b   :  { %v2206_v49 = vpop.permute.xlu2 %2205 }
 0x471   :  { %v2168_v53 = vpop.permute.xlu1 %2167 }
 0x472   :  { %v2172_v19 = vsel %vm1113_vm6, %v2168_v53, %v2170_v4  ;;  %v2258_v4 = vld.sshfl [vmem:[#allocation1 + $0x8] sm:$0xff pattern:$0x73625140] }
 0x473   :  { %v2176_v24 = vmul.f32 %v3158_v26, %v2172_v19  ;;  %v2204_v45 = vpop.permute.xlu2 %2203 }
 0x474   :  { %v2209_v7 = vsel %vm1113_vm6, %v2204_v45, %v2206_v49 }
 0x475   :  { %v2178_v30 = vadd.f32 %v2176_v24, %v1897_v27  ;;  %v2213_v60 = vmul.f32 %v3147_v1, %v2209_v7 }
 0x477   :  { %v2218_v6 = vmax.f32 %v2178_v30, 0.0  ;;  %v2215_v28 = vadd.f32 %v2213_v60, %v1936_v39 }
 0x479   :  { %v3627_v47 = vadd.f32 %v2223_v8, %v2218_v6  ;;  %v2252_v54 = vmax.f32 %v2215_v28, 0.0 }
 0x47a   :  { %v2189_v14 = vpop.permute.xlu1 %2188  ;;  %v2187_v18 = vpop.permute.xlu0 %2186 }
 0x47b   :  { %v2191_v5 = vsel %vm1113_vm6, %v2187_v18, %v2189_v14  ;;  %v2261_v24 = vadd.f32 %v2257_v41, %v2252_v54 }
 0x47c   :  { %v2195_v57 = vmul.f32 %v3158_v26, %v2191_v5 }
 0x47e   :  { %v2197_v23 = vadd.f32 %v2195_v57, %v1917_v38 }
 0x480   :  { %v2235_v56 = vmax.f32 %v2197_v23, 0.0 }
 0x482   :  { %v2185_v48 = vpop.permute.xlu1 %2184  ;;  %v2244_v16 = vadd.f32 %v2240_v33, %v2235_v56 }
 0x483   :  { %v2190_v8 = vsel %vm1113_vm6, %v2185_v48, %v2187_v18  ;;  %v2208_v50 = vpop.permute.xlu0 %2207 }
 0x484   :  { %v2194_v17 = vmul.f32 %v3147_v1, %v2190_v8  ;;  %v2210_v21 = vsel %vm1113_vm6, %v2206_v49, %v2208_v50  ;;  %v2247_v36 = vrot.slane %v2244_v16, 6  ;;  %v1853_v49 = vadd.f32 %v3507_v43, %v3606_v37 }
 0x485   :  { %v2214_v3 = vmul.f32 %v3158_v26, %v2210_v21  ;;  %v2230_v37 = vrot.slane %v3627_v47, 6 }
 0x486   :  { %v2196_v55 = vadd.f32 %v2194_v17, %v1916_v35  ;;  %v1896_v27 = vadd.f32 %v1892_v61, %v1853_v49 }
 0x487   :  { %v2216_v12 = vadd.f32 %v2214_v3, %v1937_v42 }
 0x488   :  { %v2234_v52 = vmax.f32 %v2196_v55, 0.0 }
 0x489   :  { %v2253_v31 = vmax.f32 %v2216_v12, 0.0 }
 0x48a   :  { %v2243_v29 = vadd.f32 %v3619_v34, %v2234_v52 }
 0x48b   :  { %v2262_v19 = vadd.f32 %v2258_v4, %v2253_v31  ;;  %v2166_v63 = vpop.permute.xlu0 %2165 }
 0x48c   :  { %v2248_v26 = vsel %vm1165_vm9, %v2243_v29, %v2247_v36  ;;  %v2171_v33 = vsel %vm1113_vm6, %v2166_v63, %v2168_v53 }
 0x48d   :  { %2448 = vst [vmem:[%s3674_s5 + $0x4] sm:$0xf] %v2248_v26  ;;  %v2265_v11 = vrot.slane %v2262_v19, 6  ;;  %v2175_v59 = vmul.f32 %v3147_v1, %v2171_v33 }
 0x48f   :  { %v2266_v34 = vsel %vm1165_vm9, %v2261_v24, %v2265_v11  ;;  %v2177_v30 = vadd.f32 %v2175_v59, %v1896_v27 }
 0x490   :  { %2450 = vst [vmem:[%s3674_s5 + $0x8] sm:$0xf] %v2266_v34 }
 0x491   :  { %v2217_v43 = vmax.f32 %v2177_v30, 0.0 }
 0x493   :  { %v2226_v53 = vadd.f32 %v3614_v46, %v2217_v43 }
 0x495   :  { %v2231_v20 = vsel %vm1165_vm9, %v2226_v53, %v2230_v37 }
 0x496   :  { %2233 = vst [vmem:[%s3674_s5] sm:$0xf] %v2231_v20 }
 0x497   :  { %2274 = vsyncpa [#allocation4], 1 }
 0x498   :  { %2275 = vsyncpa [#allocation6], 1 }
 0x499   :  { %2276 = vsyncpa [#allocation9], 1 }

</bundles_post_ra>
